<compile_context>
chip_gen: v7x
topology: tpu7x:2x2x1
jax: 0.10.0
libtpu: 0.0.40
codegen_flags: <defaults>
</compile_context>

<pallas_src>
import functools

import jax
import jax.numpy as jnp
from jax.experimental import pallas as pl
from jax.experimental.pallas import tpu as pltpu

BN_EPS = 1e-5
LEAKY_SLOPE = 0.01
LANE = 128


def _round_up(x, m):
    return (x + m - 1) // m * m


def _conv_stats_kernel(x_ref, w_ref, mask_ref, y_ref, st_ref, *, l_rows, wq, cp):
    """Per-batch-element conv (9-tap MXU accumulation) + BN partial stats.

    x_ref:    (4, Hq*Wq, Cin)  bf16  four stride-2 parity planes, spatially flattened
    w_ref:    (9, Cin, Cp)     bf16  per-tap weights (VMEM-resident across the grid)
    mask_ref: (L, 1)           f32   1.0 on rows that are real output pixels
    y_ref:    (1, L, Cp)       f32   pre-BN conv output ("frame" rows, incl. junk col)
    st_ref:   (1, 2, Cp)       f32   per-sample [sum, sum_of_squares] over valid rows
    """
    acc = jnp.zeros((l_rows, cp), jnp.float32)
    for kh in range(3):
        for kw in range(3):
            plane = (kh % 2) * 2 + (kw % 2)          # parity plane for this tap
            start = (kh // 2) * wq + (kw // 2)       # row offset inside the plane
            xt = x_ref[plane, pl.ds(start, l_rows), :]         # (L, Cin), contiguous
            acc = acc + jnp.dot(xt, w_ref[kh * 3 + kw],
                                preferred_element_type=jnp.float32)
    y_ref[0] = acc

    m = mask_ref[...]                                # (L, 1) -> broadcast over Cp
    am = acc * m
    s1 = jnp.sum(am, axis=0, keepdims=True)          # per-channel sum
    s2 = jnp.sum(acc * am, axis=0, keepdims=True)    # per-channel sum of squares
    st_ref[0] = jnp.concatenate([s1, s2], axis=0)    # (2, Cp)


def _bn_lrelu_kernel(y_ref, scale_ref, shift_ref, o_ref):
    """Fused BatchNorm (pre-folded scale/shift) + LeakyReLU; f32 math, bf16 store."""
    z = y_ref[...] * scale_ref[...] + shift_ref[...]
    o_ref[...] = jnp.where(z >= 0.0, z, LEAKY_SLOPE * z).astype(o_ref.dtype)


def conv_bn_lrelu_layer(x_nhwc, w9, gamma_p, beta_p):
    """One encoder block.

    x_nhwc:  (N, H, W, Cin)  bf16   (Cin already channel-padded for layers > 0)
    w9:      (9, Cin, Cp)    bf16   tap-major conv weights, channel-padded
    gamma_p, beta_p: (Cp,)   f32    BN affine, zero-padded
    returns: (N, Ho, Wo, Cp) bf16
    """
    N, H, W, Cin = x_nhwc.shape
    Cp = w9.shape[-1]
    Ho = (H - 1) // 2 + 1
    Wo = (W - 1) // 2 + 1
    Hq, Wq = Ho + 1, Wo + 1
    F = Hq * Wq                        # rows of one flattened parity plane
    L = (Ho - 1) * Wq + Wo             # "frame" rows carried through the kernels

    # --- host glue (pure data movement, ~1x input bytes, fused by XLA) -----------
    # zero-pad to 2*Hq x 2*Wq, split into the 4 stride-2 parity planes and flatten
    # each plane's spatial dims; every conv tap is then a contiguous row window.
    xp = jnp.pad(x_nhwc, ((0, 0), (1, 2 * Hq - 1 - H), (1, 2 * Wq - 1 - W), (0, 0)))
    planes = [xp[:, a::2, b::2, :] for a in (0, 1) for b in (0, 1)]
    xpp = jnp.stack(planes, axis=1).reshape(N * 4, F, Cin)

    # frame rows that correspond to real output pixels (frame column Wq-1 is junk)
    mask = ((jnp.arange(L) % Wq) < Wo).astype(jnp.float32).reshape(L, 1)

    cparams = pltpu.CompilerParams(
        dimension_semantics=("parallel",),       # shard batch across TCs on v7x
        vmem_limit_bytes=32 * 1024 * 1024,       # explicit: v5e scoped default is 16 MiB
    )
    # NOTE: for large spatial sizes one would additionally tile the L (row) dimension;
    # at these shapes one batch element per grid step is far below the VMEM limit.

    # --- pass 1: conv (9-tap accumulation) + per-sample BN partial stats ----------
    kern = functools.partial(_conv_stats_kernel, l_rows=L, wq=Wq, cp=Cp)
    y, stats = pl.pallas_call(
        kern,
        grid=(N,),
        in_specs=[
            pl.BlockSpec((4, F, Cin), lambda n: (n, 0, 0)),   # this sample's planes
            pl.BlockSpec((9, Cin, Cp), lambda n: (0, 0, 0)),  # weights: resident
            pl.BlockSpec((L, 1), lambda n: (0, 0)),           # row mask: resident
        ],
        out_specs=(
            pl.BlockSpec((1, L, Cp), lambda n: (n, 0, 0)),
            pl.BlockSpec((1, 2, Cp), lambda n: (n, 0, 0)),
        ),
        out_shape=(
            jax.ShapeDtypeStruct((N, L, Cp), jnp.float32),    # pre-BN conv output
            jax.ShapeDtypeStruct((N, 2, Cp), jnp.float32),    # per-sample sum / sumsq
        ),
        compiler_params=cparams,
    )(xpp, w9, mask)

    # --- tiny per-channel BN fold (2*Cp scalars, plain XLA) ------------------------
    m_total = float(N * Ho * Wo)
    tot = jnp.sum(stats, axis=0)                              # (2, Cp)
    mean = tot[0] / m_total
    var = jnp.maximum(tot[1] / m_total - mean * mean, 0.0)    # biased (train-mode BN)
    scale = gamma_p * jax.lax.rsqrt(var + BN_EPS)
    shift = beta_p - mean * scale

    # --- pass 2: fused normalize + affine + LeakyReLU ------------------------------
    out = pl.pallas_call(
        _bn_lrelu_kernel,
        grid=(N,),
        in_specs=[
            pl.BlockSpec((1, L, Cp), lambda n: (n, 0, 0)),
            pl.BlockSpec((1, 1, Cp), lambda n: (0, 0, 0)),    # scale: resident
            pl.BlockSpec((1, 1, Cp), lambda n: (0, 0, 0)),    # shift: resident
        ],
        out_specs=pl.BlockSpec((1, L, Cp), lambda n: (n, 0, 0)),
        out_shape=jax.ShapeDtypeStruct((N, L, Cp), jnp.bfloat16),
        compiler_params=cparams,
    )(y, scale.reshape(1, 1, Cp), shift.reshape(1, 1, Cp))

    # --- host glue: frame rows -> (N, Ho, Wo, Cp) -----------------------------------
    act = jnp.pad(out, ((0, 0), (0, Ho * Wq - L), (0, 0)))
    act = act.reshape(N, Ho, Wq, Cp)[:, :, :Wo, :]
    return act


def encoder_v1(x_nchw, prepped):
    """Full encoder forward.  x_nchw: (N, C, H, W) f32 (PyTorch layout).

    Returns (N, Ho, Wo, Cp_last) bf16 with the channel padding still attached.
    """
    h = jnp.transpose(x_nchw, (0, 2, 3, 1)).astype(jnp.bfloat16)   # NCHW -> NHWC, bf16
    for (w9, gamma_p, beta_p) in prepped:
        h = conv_bn_lrelu_layer(h, w9, gamma_p, beta_p)
    return h


def init_params(key, in_channels, hidden_dims):
    """PyTorch-layout parameters: conv w (Cout, Cin, 3, 3), conv b, BN gamma/beta."""
    params = []
    cin = in_channels
    for h_dim in hidden_dims:
        key, kw, kb, kg, kbt = jax.random.split(key, 5)
        fan_in = cin * 9
        w = jax.random.normal(kw, (h_dim, cin, 3, 3), jnp.float32) / jnp.sqrt(float(fan_in))
        b = 0.1 * jax.random.normal(kb, (h_dim,), jnp.float32)
        gamma = 1.0 + 0.1 * jax.random.normal(kg, (h_dim,), jnp.float32)
        beta = 0.1 * jax.random.normal(kbt, (h_dim,), jnp.float32)
        params.append((w, b, gamma, beta))
        cin = h_dim
    return params


def prepare_params(params, in_channels):
    """Convert to kernel layout: w -> (9, Cin_pad, Cout_pad) bf16 (tap = kh*3+kw);
    gamma/beta -> (Cout_pad,) f32 zero-padded.

    The conv bias is intentionally dropped: a per-channel constant added before a
    train-mode BatchNorm is exactly cancelled by the mean subtraction.
    """
    prepped = []
    cin_pad = in_channels                      # the raw input is not channel-padded
    for (w, _b, gamma, beta) in params:
        cout, cin, _, _ = w.shape
        cp = _round_up(cout, LANE)
        w9 = jnp.transpose(w, (2, 3, 1, 0)).reshape(9, cin, cout)
        w9 = jnp.pad(w9, ((0, 0), (0, cin_pad - cin), (0, cp - cout)))
        prepped.append((
            w9.astype(jnp.bfloat16),
            jnp.pad(gamma, (0, cp - cout)),
            jnp.pad(beta, (0, cp - cout)),
        ))
        cin_pad = cp
    return prepped


if __name__ == "__main__":
    key = jax.random.PRNGKey(0)

    # Small shapes consistent with the module: NCHW input (2, 4, 16, 16); the default
    # hidden_dims [32, 64, 128, 256, 512] shrunk for the test.
    N, in_channels, H, W = 2, 4, 16, 16
    hidden_dims = [8, 16, 32]

    key, kx = jax.random.split(key)
    x_nchw = jax.random.normal(kx, (N, in_channels, H, W), jnp.float32)

    params = init_params(key, in_channels, hidden_dims)
    prepped = prepare_params(params, in_channels)

    encode = jax.jit(encoder_v1)
    y_pad = jax.block_until_ready(encode(x_nchw, prepped))

    # Strip channel padding, convert back to the PyTorch NCHW / float32 convention.
    y_nchw = jnp.transpose(y_pad[..., :hidden_dims[-1]].astype(jnp.float32), (0, 3, 1, 2))
    y_nchw = jax.block_until_ready(y_nchw)

    expected_spatial = H // (2 ** len(hidden_dims))
    assert y_nchw.shape == (N, hidden_dims[-1], expected_spatial, expected_spatial), y_nchw.shape
    assert bool(jnp.all(jnp.isfinite(y_nchw)))

    print("KERNEL_OK")
</pallas_src>

<mosaic_0001>
module attributes {stable_mosaic.version = 11 : i64} {
  func.func @_conv_stats_kernel(%arg0: i32, %arg1: memref<4x81x4xbf16, #tpu.memory_space<vmem>>, %arg2: memref<9x4x128xbf16, #tpu.memory_space<vmem>>, %arg3: memref<71x1xf32, #tpu.memory_space<vmem>>, %arg4: memref<1x71x128xf32, #tpu.memory_space<vmem>>, %arg5: memref<1x2x128xf32, #tpu.memory_space<vmem>>) attributes {dimension_semantics = [#tpu.dimension_semantics<parallel>], iteration_bounds = array<i64: 2>, scalar_prefetch = 0 : i64, scratch_operands = 0 : i64, tpu.core_type = #tpu.core_type<tc>, window_params = [{transform_indices = @transform_0, window_bounds = array<i64: 4, 81, 4>}, {pipeline_mode = #tpu.pipeline_mode<synchronous>, transform_indices = @transform_1, window_bounds = array<i64: 9, 4, 128>}, {pipeline_mode = #tpu.pipeline_mode<synchronous>, transform_indices = @transform_2, window_bounds = array<i64: 71, 1>}, {transform_indices = @transform_3, window_bounds = array<i64: 1, 71, 128>}, {transform_indices = @transform_4, window_bounds = array<i64: 1, 2, 128>}]} {
    %cst = arith.constant 0.000000e+00 : f32
    %0 = vector.broadcast %cst : f32 to vector<71x128xf32>
    %c0 = arith.constant 0 : index
    %c0_0 = arith.constant 0 : index
    %c0_1 = arith.constant 0 : index
    %1 = vector.load %arg1[%c0, %c0_0, %c0_1] : memref<4x81x4xbf16, #tpu.memory_space<vmem>>, vector<1x71x4xbf16>
    %2 = vector.shape_cast %1 : vector<1x71x4xbf16> to vector<71x4xbf16>
    %c0_2 = arith.constant 0 : index
    %c0_3 = arith.constant 0 : index
    %c0_4 = arith.constant 0 : index
    %3 = vector.load %arg2[%c0_2, %c0_3, %c0_4] : memref<9x4x128xbf16, #tpu.memory_space<vmem>>, vector<1x4x128xbf16>
    %4 = vector.shape_cast %3 : vector<1x4x128xbf16> to vector<4x128xbf16>
    %cst_5 = arith.constant dense<0.000000e+00> : vector<71x128xf32>
    %5 = tpu.matmul %2, %4, %cst_5 {dimension_numbers = #tpu.dot_dimension_numbers<[1], [0], [0], [1], [0, 0, 1, 1], [], []>} : vector<71x4xbf16>, vector<4x128xbf16>, vector<71x128xf32> -> vector<71x128xf32>
    %6 = arith.addf %0, %5 : vector<71x128xf32>
    %c1 = arith.constant 1 : index
    %c0_6 = arith.constant 0 : index
    %c0_7 = arith.constant 0 : index
    %7 = vector.load %arg1[%c1, %c0_6, %c0_7] : memref<4x81x4xbf16, #tpu.memory_space<vmem>>, vector<1x71x4xbf16>
    %8 = vector.shape_cast %7 : vector<1x71x4xbf16> to vector<71x4xbf16>
    %c1_8 = arith.constant 1 : index
    %c0_9 = arith.constant 0 : index
    %c0_10 = arith.constant 0 : index
    %9 = vector.load %arg2[%c1_8, %c0_9, %c0_10] : memref<9x4x128xbf16, #tpu.memory_space<vmem>>, vector<1x4x128xbf16>
    %10 = vector.shape_cast %9 : vector<1x4x128xbf16> to vector<4x128xbf16>
    %cst_11 = arith.constant dense<0.000000e+00> : vector<71x128xf32>
    %11 = tpu.matmul %8, %10, %cst_11 {dimension_numbers = #tpu.dot_dimension_numbers<[1], [0], [0], [1], [0, 0, 1, 1], [], []>} : vector<71x4xbf16>, vector<4x128xbf16>, vector<71x128xf32> -> vector<71x128xf32>
    %12 = arith.addf %6, %11 : vector<71x128xf32>
    %c0_12 = arith.constant 0 : index
    %c1_13 = arith.constant 1 : index
    %c0_14 = arith.constant 0 : index
    %13 = vector.load %arg1[%c0_12, %c1_13, %c0_14] : memref<4x81x4xbf16, #tpu.memory_space<vmem>>, vector<1x71x4xbf16>
    %14 = vector.shape_cast %13 : vector<1x71x4xbf16> to vector<71x4xbf16>
    %c2 = arith.constant 2 : index
    %c0_15 = arith.constant 0 : index
    %c0_16 = arith.constant 0 : index
    %15 = vector.load %arg2[%c2, %c0_15, %c0_16] : memref<9x4x128xbf16, #tpu.memory_space<vmem>>, vector<1x4x128xbf16>
    %16 = vector.shape_cast %15 : vector<1x4x128xbf16> to vector<4x128xbf16>
    %cst_17 = arith.constant dense<0.000000e+00> : vector<71x128xf32>
    %17 = tpu.matmul %14, %16, %cst_17 {dimension_numbers = #tpu.dot_dimension_numbers<[1], [0], [0], [1], [0, 0, 1, 1], [], []>} : vector<71x4xbf16>, vector<4x128xbf16>, vector<71x128xf32> -> vector<71x128xf32>
    %18 = arith.addf %12, %17 : vector<71x128xf32>
    %c2_18 = arith.constant 2 : index
    %c0_19 = arith.constant 0 : index
    %c0_20 = arith.constant 0 : index
    %19 = vector.load %arg1[%c2_18, %c0_19, %c0_20] : memref<4x81x4xbf16, #tpu.memory_space<vmem>>, vector<1x71x4xbf16>
    %20 = vector.shape_cast %19 : vector<1x71x4xbf16> to vector<71x4xbf16>
    %c3 = arith.constant 3 : index
    %c0_21 = arith.constant 0 : index
    %c0_22 = arith.constant 0 : index
    %21 = vector.load %arg2[%c3, %c0_21, %c0_22] : memref<9x4x128xbf16, #tpu.memory_space<vmem>>, vector<1x4x128xbf16>
    %22 = vector.shape_cast %21 : vector<1x4x128xbf16> to vector<4x128xbf16>
    %cst_23 = arith.constant dense<0.000000e+00> : vector<71x128xf32>
    %23 = tpu.matmul %20, %22, %cst_23 {dimension_numbers = #tpu.dot_dimension_numbers<[1], [0], [0], [1], [0, 0, 1, 1], [], []>} : vector<71x4xbf16>, vector<4x128xbf16>, vector<71x128xf32> -> vector<71x128xf32>
    %24 = arith.addf %18, %23 : vector<71x128xf32>
    %c3_24 = arith.constant 3 : index
    %c0_25 = arith.constant 0 : index
    %c0_26 = arith.constant 0 : index
    %25 = vector.load %arg1[%c3_24, %c0_25, %c0_26] : memref<4x81x4xbf16, #tpu.memory_space<vmem>>, vector<1x71x4xbf16>
    %26 = vector.shape_cast %25 : vector<1x71x4xbf16> to vector<71x4xbf16>
    %c4 = arith.constant 4 : index
    %c0_27 = arith.constant 0 : index
    %c0_28 = arith.constant 0 : index
    %27 = vector.load %arg2[%c4, %c0_27, %c0_28] : memref<9x4x128xbf16, #tpu.memory_space<vmem>>, vector<1x4x128xbf16>
    %28 = vector.shape_cast %27 : vector<1x4x128xbf16> to vector<4x128xbf16>
    %cst_29 = arith.constant dense<0.000000e+00> : vector<71x128xf32>
    %29 = tpu.matmul %26, %28, %cst_29 {dimension_numbers = #tpu.dot_dimension_numbers<[1], [0], [0], [1], [0, 0, 1, 1], [], []>} : vector<71x4xbf16>, vector<4x128xbf16>, vector<71x128xf32> -> vector<71x128xf32>
    %30 = arith.addf %24, %29 : vector<71x128xf32>
    %c2_30 = arith.constant 2 : index
    %c1_31 = arith.constant 1 : index
    %c0_32 = arith.constant 0 : index
    %31 = vector.load %arg1[%c2_30, %c1_31, %c0_32] : memref<4x81x4xbf16, #tpu.memory_space<vmem>>, vector<1x71x4xbf16>
    %32 = vector.shape_cast %31 : vector<1x71x4xbf16> to vector<71x4xbf16>
    %c5 = arith.constant 5 : index
    %c0_33 = arith.constant 0 : index
    %c0_34 = arith.constant 0 : index
    %33 = vector.load %arg2[%c5, %c0_33, %c0_34] : memref<9x4x128xbf16, #tpu.memory_space<vmem>>, vector<1x4x128xbf16>
    %34 = vector.shape_cast %33 : vector<1x4x128xbf16> to vector<4x128xbf16>
    %cst_35 = arith.constant dense<0.000000e+00> : vector<71x128xf32>
    %35 = tpu.matmul %32, %34, %cst_35 {dimension_numbers = #tpu.dot_dimension_numbers<[1], [0], [0], [1], [0, 0, 1, 1], [], []>} : vector<71x4xbf16>, vector<4x128xbf16>, vector<71x128xf32> -> vector<71x128xf32>
    %36 = arith.addf %30, %35 : vector<71x128xf32>
    %c0_36 = arith.constant 0 : index
    %c9 = arith.constant 9 : index
    %c0_37 = arith.constant 0 : index
    %37 = vector.load %arg1[%c0_36, %c9, %c0_37] : memref<4x81x4xbf16, #tpu.memory_space<vmem>>, vector<1x71x4xbf16>
    %38 = vector.shape_cast %37 : vector<1x71x4xbf16> to vector<71x4xbf16>
    %c6 = arith.constant 6 : index
    %c0_38 = arith.constant 0 : index
    %c0_39 = arith.constant 0 : index
    %39 = vector.load %arg2[%c6, %c0_38, %c0_39] : memref<9x4x128xbf16, #tpu.memory_space<vmem>>, vector<1x4x128xbf16>
    %40 = vector.shape_cast %39 : vector<1x4x128xbf16> to vector<4x128xbf16>
    %cst_40 = arith.constant dense<0.000000e+00> : vector<71x128xf32>
    %41 = tpu.matmul %38, %40, %cst_40 {dimension_numbers = #tpu.dot_dimension_numbers<[1], [0], [0], [1], [0, 0, 1, 1], [], []>} : vector<71x4xbf16>, vector<4x128xbf16>, vector<71x128xf32> -> vector<71x128xf32>
    %42 = arith.addf %36, %41 : vector<71x128xf32>
    %c1_41 = arith.constant 1 : index
    %c9_42 = arith.constant 9 : index
    %c0_43 = arith.constant 0 : index
    %43 = vector.load %arg1[%c1_41, %c9_42, %c0_43] : memref<4x81x4xbf16, #tpu.memory_space<vmem>>, vector<1x71x4xbf16>
    %44 = vector.shape_cast %43 : vector<1x71x4xbf16> to vector<71x4xbf16>
    %c7 = arith.constant 7 : index
    %c0_44 = arith.constant 0 : index
    %c0_45 = arith.constant 0 : index
    %45 = vector.load %arg2[%c7, %c0_44, %c0_45] : memref<9x4x128xbf16, #tpu.memory_space<vmem>>, vector<1x4x128xbf16>
    %46 = vector.shape_cast %45 : vector<1x4x128xbf16> to vector<4x128xbf16>
    %cst_46 = arith.constant dense<0.000000e+00> : vector<71x128xf32>
    %47 = tpu.matmul %44, %46, %cst_46 {dimension_numbers = #tpu.dot_dimension_numbers<[1], [0], [0], [1], [0, 0, 1, 1], [], []>} : vector<71x4xbf16>, vector<4x128xbf16>, vector<71x128xf32> -> vector<71x128xf32>
    %48 = arith.addf %42, %47 : vector<71x128xf32>
    %c0_47 = arith.constant 0 : index
    %c10 = arith.constant 10 : index
    %c0_48 = arith.constant 0 : index
    %49 = vector.load %arg1[%c0_47, %c10, %c0_48] : memref<4x81x4xbf16, #tpu.memory_space<vmem>>, vector<1x71x4xbf16>
    %50 = vector.shape_cast %49 : vector<1x71x4xbf16> to vector<71x4xbf16>
    %c8 = arith.constant 8 : index
    %c0_49 = arith.constant 0 : index
    %c0_50 = arith.constant 0 : index
    %51 = vector.load %arg2[%c8, %c0_49, %c0_50] : memref<9x4x128xbf16, #tpu.memory_space<vmem>>, vector<1x4x128xbf16>
    %52 = vector.shape_cast %51 : vector<1x4x128xbf16> to vector<4x128xbf16>
    %cst_51 = arith.constant dense<0.000000e+00> : vector<71x128xf32>
    %53 = tpu.matmul %50, %52, %cst_51 {dimension_numbers = #tpu.dot_dimension_numbers<[1], [0], [0], [1], [0, 0, 1, 1], [], []>} : vector<71x4xbf16>, vector<4x128xbf16>, vector<71x128xf32> -> vector<71x128xf32>
    %54 = arith.addf %48, %53 : vector<71x128xf32>
    %c0_52 = arith.constant 0 : index
    %c0_53 = arith.constant 0 : index
    %c0_54 = arith.constant 0 : index
    %55 = vector.load %arg4[%c0_52, %c0_53, %c0_54] : memref<1x71x128xf32, #tpu.memory_space<vmem>>, vector<1x71x128xf32>
    %56 = vector.shape_cast %55 : vector<1x71x128xf32> to vector<71x128xf32>
    %57 = vector.shape_cast %54 : vector<71x128xf32> to vector<1x71x128xf32>
    tpu.vector_store %arg4[%c0_52, %c0_53, %c0_54], %57 {strides = array<i32>} : memref<1x71x128xf32, #tpu.memory_space<vmem>>, vector<1x71x128xf32>,
    %c0_55 = arith.constant 0 : index
    %c0_56 = arith.constant 0 : index
    %58 = vector.load %arg3[%c0_55, %c0_56] : memref<71x1xf32, #tpu.memory_space<vmem>>, vector<71x1xf32>
    %59 = vector.broadcast %58 : vector<71x1xf32> to vector<71x128xf32>
    %60 = arith.mulf %54, %59 : vector<71x128xf32>
    %cst_57 = arith.constant dense<0.000000e+00> : vector<128xf32>
    %61 = vector.multi_reduction <add>, %60, %cst_57 [0] : vector<71x128xf32> to vector<128xf32>
    %62 = vector.shape_cast %61 : vector<128xf32> to vector<1x128xf32>
    %63 = arith.mulf %54, %60 : vector<71x128xf32>
    %cst_58 = arith.constant dense<0.000000e+00> : vector<128xf32>
    %64 = vector.multi_reduction <add>, %63, %cst_58 [0] : vector<71x128xf32> to vector<128xf32>
    %65 = vector.shape_cast %64 : vector<128xf32> to vector<1x128xf32>
    %66 = tpu.concatenate %62, %65 in 0 : vector<1x128xf32>, vector<1x128xf32> -> vector<2x128xf32>
    %c0_59 = arith.constant 0 : index
    %c0_60 = arith.constant 0 : index
    %c0_61 = arith.constant 0 : index
    %67 = vector.load %arg5[%c0_59, %c0_60, %c0_61] : memref<1x2x128xf32, #tpu.memory_space<vmem>>, vector<1x2x128xf32>
    %68 = vector.shape_cast %67 : vector<1x2x128xf32> to vector<2x128xf32>
    %69 = vector.shape_cast %66 : vector<2x128xf32> to vector<1x2x128xf32>
    tpu.vector_store %arg5[%c0_59, %c0_60, %c0_61], %69 {strides = array<i32>} : memref<1x2x128xf32, #tpu.memory_space<vmem>>, vector<1x2x128xf32>,
    return
  }
  func.func @transform_0(%arg0: i32) -> (i32, i32, i32) {
    %c0_i32 = arith.constant 0 : i32
    %c0_i32_0 = arith.constant 0 : i32
    %c0_i32_1 = arith.constant 0 : i32
    return %arg0, %c0_i32, %c0_i32_0 : i32, i32, i32
  }
  func.func @transform_1(%arg0: i32) -> (i32, i32, i32) {
    %c0_i32 = arith.constant 0 : i32
    %c0_i32_0 = arith.constant 0 : i32
    %c0_i32_1 = arith.constant 0 : i32
    %c0_i32_2 = arith.constant 0 : i32
    return %c0_i32, %c0_i32_0, %c0_i32_1 : i32, i32, i32
  }
  func.func @transform_2(%arg0: i32) -> (i32, i32) {
    %c0_i32 = arith.constant 0 : i32
    %c0_i32_0 = arith.constant 0 : i32
    %c0_i32_1 = arith.constant 0 : i32
    return %c0_i32, %c0_i32_0 : i32, i32
  }
  func.func @transform_3(%arg0: i32) -> (i32, i32, i32) {
    %c0_i32 = arith.constant 0 : i32
    %c0_i32_0 = arith.constant 0 : i32
    %c0_i32_1 = arith.constant 0 : i32
    return %arg0, %c0_i32, %c0_i32_0 : i32, i32, i32
  }
  func.func @transform_4(%arg0: i32) -> (i32, i32, i32) {
    %c0_i32 = arith.constant 0 : i32
    %c0_i32_0 = arith.constant 0 : i32
    %c0_i32_1 = arith.constant 0 : i32
    return %arg0, %c0_i32, %c0_i32_0 : i32, i32, i32
  }
}

module attributes {stable_mosaic.version = 11 : i64} {
  func.func @_bn_lrelu_kernel(%arg0: i32, %arg1: memref<1x71x128xf32, #tpu.memory_space<vmem>>, %arg2: memref<1x1x128xf32, #tpu.memory_space<vmem>>, %arg3: memref<1x1x128xf32, #tpu.memory_space<vmem>>, %arg4: memref<1x71x128xbf16, #tpu.memory_space<vmem>>) attributes {dimension_semantics = [#tpu.dimension_semantics<parallel>], iteration_bounds = array<i64: 2>, scalar_prefetch = 0 : i64, scratch_operands = 0 : i64, tpu.core_type = #tpu.core_type<tc>, window_params = [{transform_indices = @transform_0, window_bounds = array<i64: 1, 71, 128>}, {pipeline_mode = #tpu.pipeline_mode<synchronous>, transform_indices = @transform_1, window_bounds = array<i64: 1, 1, 128>}, {pipeline_mode = #tpu.pipeline_mode<synchronous>, transform_indices = @transform_2, window_bounds = array<i64: 1, 1, 128>}, {transform_indices = @transform_3, window_bounds = array<i64: 1, 71, 128>}]} {
    %c0 = arith.constant 0 : index
    %c0_0 = arith.constant 0 : index
    %c0_1 = arith.constant 0 : index
    %0 = vector.load %arg1[%c0, %c0_0, %c0_1] : memref<1x71x128xf32, #tpu.memory_space<vmem>>, vector<1x71x128xf32>
    %c0_2 = arith.constant 0 : index
    %c0_3 = arith.constant 0 : index
    %c0_4 = arith.constant 0 : index
    %1 = vector.load %arg2[%c0_2, %c0_3, %c0_4] : memref<1x1x128xf32, #tpu.memory_space<vmem>>, vector<1x1x128xf32>
    %2 = vector.broadcast %1 : vector<1x1x128xf32> to vector<1x71x128xf32>
    %3 = arith.mulf %0, %2 : vector<1x71x128xf32>
    %c0_5 = arith.constant 0 : index
    %c0_6 = arith.constant 0 : index
    %c0_7 = arith.constant 0 : index
    %4 = vector.load %arg3[%c0_5, %c0_6, %c0_7] : memref<1x1x128xf32, #tpu.memory_space<vmem>>, vector<1x1x128xf32>
    %5 = vector.broadcast %4 : vector<1x1x128xf32> to vector<1x71x128xf32>
    %6 = arith.addf %3, %5 : vector<1x71x128xf32>
    %cst = arith.constant 0.000000e+00 : f32
    %7 = vector.broadcast %cst : f32 to vector<1x71x128xf32>
    %8 = arith.cmpf oge, %6, %7 : vector<1x71x128xf32>
    %cst_8 = arith.constant 0.00999999977 : f32
    %9 = vector.broadcast %cst_8 : f32 to vector<1x71x128xf32>
    %10 = arith.mulf %9, %6 : vector<1x71x128xf32>
    %11 = arith.select %8, %6, %10 : vector<1x71x128xi1>, vector<1x71x128xf32>
    %12 = arith.truncf %11 : vector<1x71x128xf32> to vector<1x71x128xbf16>
    %c0_9 = arith.constant 0 : index
    %c0_10 = arith.constant 0 : index
    %c0_11 = arith.constant 0 : index
    %13 = vector.load %arg4[%c0_9, %c0_10, %c0_11] : memref<1x71x128xbf16, #tpu.memory_space<vmem>>, vector<1x71x128xbf16>
    tpu.vector_store %arg4[%c0_9, %c0_10, %c0_11], %12 {strides = array<i32>} : memref<1x71x128xbf16, #tpu.memory_space<vmem>>, vector<1x71x128xbf16>,
    return
  }
  func.func @transform_0(%arg0: i32) -> (i32, i32, i32) {
    %c0_i32 = arith.constant 0 : i32
    %c0_i32_0 = arith.constant 0 : i32
    %c0_i32_1 = arith.constant 0 : i32
    return %arg0, %c0_i32, %c0_i32_0 : i32, i32, i32
  }
  func.func @transform_1(%arg0: i32) -> (i32, i32, i32) {
    %c0_i32 = arith.constant 0 : i32
    %c0_i32_0 = arith.constant 0 : i32
    %c0_i32_1 = arith.constant 0 : i32
    %c0_i32_2 = arith.constant 0 : i32
    return %c0_i32, %c0_i32_0, %c0_i32_1 : i32, i32, i32
  }
  func.func @transform_2(%arg0: i32) -> (i32, i32, i32) {
    %c0_i32 = arith.constant 0 : i32
    %c0_i32_0 = arith.constant 0 : i32
    %c0_i32_1 = arith.constant 0 : i32
    %c0_i32_2 = arith.constant 0 : i32
    return %c0_i32, %c0_i32_0, %c0_i32_1 : i32, i32, i32
  }
  func.func @transform_3(%arg0: i32) -> (i32, i32, i32) {
    %c0_i32 = arith.constant 0 : i32
    %c0_i32_0 = arith.constant 0 : i32
    %c0_i32_1 = arith.constant 0 : i32
    return %arg0, %c0_i32, %c0_i32_0 : i32, i32, i32
  }
}

module attributes {stable_mosaic.version = 11 : i64} {
  func.func @_conv_stats_kernel(%arg0: i32, %arg1: memref<4x25x128xbf16, #tpu.memory_space<vmem>>, %arg2: memref<9x128x128xbf16, #tpu.memory_space<vmem>>, %arg3: memref<19x1xf32, #tpu.memory_space<vmem>>, %arg4: memref<1x19x128xf32, #tpu.memory_space<vmem>>, %arg5: memref<1x2x128xf32, #tpu.memory_space<vmem>>) attributes {dimension_semantics = [#tpu.dimension_semantics<parallel>], iteration_bounds = array<i64: 2>, scalar_prefetch = 0 : i64, scratch_operands = 0 : i64, tpu.core_type = #tpu.core_type<tc>, window_params = [{transform_indices = @transform_0, window_bounds = array<i64: 4, 25, 128>}, {pipeline_mode = #tpu.pipeline_mode<synchronous>, transform_indices = @transform_1, window_bounds = array<i64: 9, 128, 128>}, {pipeline_mode = #tpu.pipeline_mode<synchronous>, transform_indices = @transform_2, window_bounds = array<i64: 19, 1>}, {transform_indices = @transform_3, window_bounds = array<i64: 1, 19, 128>}, {transform_indices = @transform_4, window_bounds = array<i64: 1, 2, 128>}]} {
    %cst = arith.constant 0.000000e+00 : f32
    %0 = vector.broadcast %cst : f32 to vector<19x128xf32>
    %c0 = arith.constant 0 : index
    %c0_0 = arith.constant 0 : index
    %c0_1 = arith.constant 0 : index
    %1 = vector.load %arg1[%c0, %c0_0, %c0_1] : memref<4x25x128xbf16, #tpu.memory_space<vmem>>, vector<1x19x128xbf16>
    %2 = vector.shape_cast %1 : vector<1x19x128xbf16> to vector<19x128xbf16>
    %c0_2 = arith.constant 0 : index
    %c0_3 = arith.constant 0 : index
    %c0_4 = arith.constant 0 : index
    %3 = vector.load %arg2[%c0_2, %c0_3, %c0_4] : memref<9x128x128xbf16, #tpu.memory_space<vmem>>, vector<1x128x128xbf16>
    %4 = vector.shape_cast %3 : vector<1x128x128xbf16> to vector<128x128xbf16>
    %cst_5 = arith.constant dense<0.000000e+00> : vector<19x128xf32>
    %5 = tpu.matmul %2, %4, %cst_5 {dimension_numbers = #tpu.dot_dimension_numbers<[1], [0], [0], [1], [0, 0, 1, 1], [], []>} : vector<19x128xbf16>, vector<128x128xbf16>, vector<19x128xf32> -> vector<19x128xf32>
    %6 = arith.addf %0, %5 : vector<19x128xf32>
    %c1 = arith.constant 1 : index
    %c0_6 = arith.constant 0 : index
    %c0_7 = arith.constant 0 : index
    %7 = vector.load %arg1[%c1, %c0_6, %c0_7] : memref<4x25x128xbf16, #tpu.memory_space<vmem>>, vector<1x19x128xbf16>
    %8 = vector.shape_cast %7 : vector<1x19x128xbf16> to vector<19x128xbf16>
    %c1_8 = arith.constant 1 : index
    %c0_9 = arith.constant 0 : index
    %c0_10 = arith.constant 0 : index
    %9 = vector.load %arg2[%c1_8, %c0_9, %c0_10] : memref<9x128x128xbf16, #tpu.memory_space<vmem>>, vector<1x128x128xbf16>
    %10 = vector.shape_cast %9 : vector<1x128x128xbf16> to vector<128x128xbf16>
    %cst_11 = arith.constant dense<0.000000e+00> : vector<19x128xf32>
    %11 = tpu.matmul %8, %10, %cst_11 {dimension_numbers = #tpu.dot_dimension_numbers<[1], [0], [0], [1], [0, 0, 1, 1], [], []>} : vector<19x128xbf16>, vector<128x128xbf16>, vector<19x128xf32> -> vector<19x128xf32>
    %12 = arith.addf %6, %11 : vector<19x128xf32>
    %c0_12 = arith.constant 0 : index
    %c1_13 = arith.constant 1 : index
    %c0_14 = arith.constant 0 : index
    %13 = vector.load %arg1[%c0_12, %c1_13, %c0_14] : memref<4x25x128xbf16, #tpu.memory_space<vmem>>, vector<1x19x128xbf16>
    %14 = vector.shape_cast %13 : vector<1x19x128xbf16> to vector<19x128xbf16>
    %c2 = arith.constant 2 : index
    %c0_15 = arith.constant 0 : index
    %c0_16 = arith.constant 0 : index
    %15 = vector.load %arg2[%c2, %c0_15, %c0_16] : memref<9x128x128xbf16, #tpu.memory_space<vmem>>, vector<1x128x128xbf16>
    %16 = vector.shape_cast %15 : vector<1x128x128xbf16> to vector<128x128xbf16>
    %cst_17 = arith.constant dense<0.000000e+00> : vector<19x128xf32>
    %17 = tpu.matmul %14, %16, %cst_17 {dimension_numbers = #tpu.dot_dimension_numbers<[1], [0], [0], [1], [0, 0, 1, 1], [], []>} : vector<19x128xbf16>, vector<128x128xbf16>, vector<19x128xf32> -> vector<19x128xf32>
    %18 = arith.addf %12, %17 : vector<19x128xf32>
    %c2_18 = arith.constant 2 : index
    %c0_19 = arith.constant 0 : index
    %c0_20 = arith.constant 0 : index
    %19 = vector.load %arg1[%c2_18, %c0_19, %c0_20] : memref<4x25x128xbf16, #tpu.memory_space<vmem>>, vector<1x19x128xbf16>
    %20 = vector.shape_cast %19 : vector<1x19x128xbf16> to vector<19x128xbf16>
    %c3 = arith.constant 3 : index
    %c0_21 = arith.constant 0 : index
    %c0_22 = arith.constant 0 : index
    %21 = vector.load %arg2[%c3, %c0_21, %c0_22] : memref<9x128x128xbf16, #tpu.memory_space<vmem>>, vector<1x128x128xbf16>
    %22 = vector.shape_cast %21 : vector<1x128x128xbf16> to vector<128x128xbf16>
    %cst_23 = arith.constant dense<0.000000e+00> : vector<19x128xf32>
    %23 = tpu.matmul %20, %22, %cst_23 {dimension_numbers = #tpu.dot_dimension_numbers<[1], [0], [0], [1], [0, 0, 1, 1], [], []>} : vector<19x128xbf16>, vector<128x128xbf16>, vector<19x128xf32> -> vector<19x128xf32>
    %24 = arith.addf %18, %23 : vector<19x128xf32>
    %c3_24 = arith.constant 3 : index
    %c0_25 = arith.constant 0 : index
    %c0_26 = arith.constant 0 : index
    %25 = vector.load %arg1[%c3_24, %c0_25, %c0_26] : memref<4x25x128xbf16, #tpu.memory_space<vmem>>, vector<1x19x128xbf16>
    %26 = vector.shape_cast %25 : vector<1x19x128xbf16> to vector<19x128xbf16>
    %c4 = arith.constant 4 : index
    %c0_27 = arith.constant 0 : index
    %c0_28 = arith.constant 0 : index
    %27 = vector.load %arg2[%c4, %c0_27, %c0_28] : memref<9x128x128xbf16, #tpu.memory_space<vmem>>, vector<1x128x128xbf16>
    %28 = vector.shape_cast %27 : vector<1x128x128xbf16> to vector<128x128xbf16>
    %cst_29 = arith.constant dense<0.000000e+00> : vector<19x128xf32>
    %29 = tpu.matmul %26, %28, %cst_29 {dimension_numbers = #tpu.dot_dimension_numbers<[1], [0], [0], [1], [0, 0, 1, 1], [], []>} : vector<19x128xbf16>, vector<128x128xbf16>, vector<19x128xf32> -> vector<19x128xf32>
    %30 = arith.addf %24, %29 : vector<19x128xf32>
    %c2_30 = arith.constant 2 : index
    %c1_31 = arith.constant 1 : index
    %c0_32 = arith.constant 0 : index
    %31 = vector.load %arg1[%c2_30, %c1_31, %c0_32] : memref<4x25x128xbf16, #tpu.memory_space<vmem>>, vector<1x19x128xbf16>
    %32 = vector.shape_cast %31 : vector<1x19x128xbf16> to vector<19x128xbf16>
    %c5 = arith.constant 5 : index
    %c0_33 = arith.constant 0 : index
    %c0_34 = arith.constant 0 : index
    %33 = vector.load %arg2[%c5, %c0_33, %c0_34] : memref<9x128x128xbf16, #tpu.memory_space<vmem>>, vector<1x128x128xbf16>
    %34 = vector.shape_cast %33 : vector<1x128x128xbf16> to vector<128x128xbf16>
    %cst_35 = arith.constant dense<0.000000e+00> : vector<19x128xf32>
    %35 = tpu.matmul %32, %34, %cst_35 {dimension_numbers = #tpu.dot_dimension_numbers<[1], [0], [0], [1], [0, 0, 1, 1], [], []>} : vector<19x128xbf16>, vector<128x128xbf16>, vector<19x128xf32> -> vector<19x128xf32>
    %36 = arith.addf %30, %35 : vector<19x128xf32>
    %c0_36 = arith.constant 0 : index
    %c5_37 = arith.constant 5 : index
    %c0_38 = arith.constant 0 : index
    %37 = vector.load %arg1[%c0_36, %c5_37, %c0_38] : memref<4x25x128xbf16, #tpu.memory_space<vmem>>, vector<1x19x128xbf16>
    %38 = vector.shape_cast %37 : vector<1x19x128xbf16> to vector<19x128xbf16>
    %c6 = arith.constant 6 : index
    %c0_39 = arith.constant 0 : index
    %c0_40 = arith.constant 0 : index
    %39 = vector.load %arg2[%c6, %c0_39, %c0_40] : memref<9x128x128xbf16, #tpu.memory_space<vmem>>, vector<1x128x128xbf16>
    %40 = vector.shape_cast %39 : vector<1x128x128xbf16> to vector<128x128xbf16>
    %cst_41 = arith.constant dense<0.000000e+00> : vector<19x128xf32>
    %41 = tpu.matmul %38, %40, %cst_41 {dimension_numbers = #tpu.dot_dimension_numbers<[1], [0], [0], [1], [0, 0, 1, 1], [], []>} : vector<19x128xbf16>, vector<128x128xbf16>, vector<19x128xf32> -> vector<19x128xf32>
    %42 = arith.addf %36, %41 : vector<19x128xf32>
    %c1_42 = arith.constant 1 : index
    %c5_43 = arith.constant 5 : index
    %c0_44 = arith.constant 0 : index
    %43 = vector.load %arg1[%c1_42, %c5_43, %c0_44] : memref<4x25x128xbf16, #tpu.memory_space<vmem>>, vector<1x19x128xbf16>
    %44 = vector.shape_cast %43 : vector<1x19x128xbf16> to vector<19x128xbf16>
    %c7 = arith.constant 7 : index
    %c0_45 = arith.constant 0 : index
    %c0_46 = arith.constant 0 : index
    %45 = vector.load %arg2[%c7, %c0_45, %c0_46] : memref<9x128x128xbf16, #tpu.memory_space<vmem>>, vector<1x128x128xbf16>
    %46 = vector.shape_cast %45 : vector<1x128x128xbf16> to vector<128x128xbf16>
    %cst_47 = arith.constant dense<0.000000e+00> : vector<19x128xf32>
    %47 = tpu.matmul %44, %46, %cst_47 {dimension_numbers = #tpu.dot_dimension_numbers<[1], [0], [0], [1], [0, 0, 1, 1], [], []>} : vector<19x128xbf16>, vector<128x128xbf16>, vector<19x128xf32> -> vector<19x128xf32>
    %48 = arith.addf %42, %47 : vector<19x128xf32>
    %c0_48 = arith.constant 0 : index
    %c6_49 = arith.constant 6 : index
    %c0_50 = arith.constant 0 : index
    %49 = vector.load %arg1[%c0_48, %c6_49, %c0_50] : memref<4x25x128xbf16, #tpu.memory_space<vmem>>, vector<1x19x128xbf16>
    %50 = vector.shape_cast %49 : vector<1x19x128xbf16> to vector<19x128xbf16>
    %c8 = arith.constant 8 : index
    %c0_51 = arith.constant 0 : index
    %c0_52 = arith.constant 0 : index
    %51 = vector.load %arg2[%c8, %c0_51, %c0_52] : memref<9x128x128xbf16, #tpu.memory_space<vmem>>, vector<1x128x128xbf16>
    %52 = vector.shape_cast %51 : vector<1x128x128xbf16> to vector<128x128xbf16>
    %cst_53 = arith.constant dense<0.000000e+00> : vector<19x128xf32>
    %53 = tpu.matmul %50, %52, %cst_53 {dimension_numbers = #tpu.dot_dimension_numbers<[1], [0], [0], [1], [0, 0, 1, 1], [], []>} : vector<19x128xbf16>, vector<128x128xbf16>, vector<19x128xf32> -> vector<19x128xf32>
    %54 = arith.addf %48, %53 : vector<19x128xf32>
    %c0_54 = arith.constant 0 : index
    %c0_55 = arith.constant 0 : index
    %c0_56 = arith.constant 0 : index
    %55 = vector.load %arg4[%c0_54, %c0_55, %c0_56] : memref<1x19x128xf32, #tpu.memory_space<vmem>>, vector<1x19x128xf32>
    %56 = vector.shape_cast %55 : vector<1x19x128xf32> to vector<19x128xf32>
    %57 = vector.shape_cast %54 : vector<19x128xf32> to vector<1x19x128xf32>
    tpu.vector_store %arg4[%c0_54, %c0_55, %c0_56], %57 {strides = array<i32>} : memref<1x19x128xf32, #tpu.memory_space<vmem>>, vector<1x19x128xf32>,
    %c0_57 = arith.constant 0 : index
    %c0_58 = arith.constant 0 : index
    %58 = vector.load %arg3[%c0_57, %c0_58] : memref<19x1xf32, #tpu.memory_space<vmem>>, vector<19x1xf32>
    %59 = vector.broadcast %58 : vector<19x1xf32> to vector<19x128xf32>
    %60 = arith.mulf %54, %59 : vector<19x128xf32>
    %cst_59 = arith.constant dense<0.000000e+00> : vector<128xf32>
    %61 = vector.multi_reduction <add>, %60, %cst_59 [0] : vector<19x128xf32> to vector<128xf32>
    %62 = vector.shape_cast %61 : vector<128xf32> to vector<1x128xf32>
    %63 = arith.mulf %54, %60 : vector<19x128xf32>
    %cst_60 = arith.constant dense<0.000000e+00> : vector<128xf32>
    %64 = vector.multi_reduction <add>, %63, %cst_60 [0] : vector<19x128xf32> to vector<128xf32>
    %65 = vector.shape_cast %64 : vector<128xf32> to vector<1x128xf32>
    %66 = tpu.concatenate %62, %65 in 0 : vector<1x128xf32>, vector<1x128xf32> -> vector<2x128xf32>
    %c0_61 = arith.constant 0 : index
    %c0_62 = arith.constant 0 : index
    %c0_63 = arith.constant 0 : index
    %67 = vector.load %arg5[%c0_61, %c0_62, %c0_63] : memref<1x2x128xf32, #tpu.memory_space<vmem>>, vector<1x2x128xf32>
    %68 = vector.shape_cast %67 : vector<1x2x128xf32> to vector<2x128xf32>
    %69 = vector.shape_cast %66 : vector<2x128xf32> to vector<1x2x128xf32>
    tpu.vector_store %arg5[%c0_61, %c0_62, %c0_63], %69 {strides = array<i32>} : memref<1x2x128xf32, #tpu.memory_space<vmem>>, vector<1x2x128xf32>,
    return
  }
  func.func @transform_0(%arg0: i32) -> (i32, i32, i32) {
    %c0_i32 = arith.constant 0 : i32
    %c0_i32_0 = arith.constant 0 : i32
    %c0_i32_1 = arith.constant 0 : i32
    return %arg0, %c0_i32, %c0_i32_0 : i32, i32, i32
  }
  func.func @transform_1(%arg0: i32) -> (i32, i32, i32) {
    %c0_i32 = arith.constant 0 : i32
    %c0_i32_0 = arith.constant 0 : i32
    %c0_i32_1 = arith.constant 0 : i32
    %c0_i32_2 = arith.constant 0 : i32
    return %c0_i32, %c0_i32_0, %c0_i32_1 : i32, i32, i32
  }
  func.func @transform_2(%arg0: i32) -> (i32, i32) {
    %c0_i32 = arith.constant 0 : i32
    %c0_i32_0 = arith.constant 0 : i32
    %c0_i32_1 = arith.constant 0 : i32
    return %c0_i32, %c0_i32_0 : i32, i32
  }
  func.func @transform_3(%arg0: i32) -> (i32, i32, i32) {
    %c0_i32 = arith.constant 0 : i32
    %c0_i32_0 = arith.constant 0 : i32
    %c0_i32_1 = arith.constant 0 : i32
    return %arg0, %c0_i32, %c0_i32_0 : i32, i32, i32
  }
  func.func @transform_4(%arg0: i32) -> (i32, i32, i32) {
    %c0_i32 = arith.constant 0 : i32
    %c0_i32_0 = arith.constant 0 : i32
    %c0_i32_1 = arith.constant 0 : i32
    return %arg0, %c0_i32, %c0_i32_0 : i32, i32, i32
  }
}

module attributes {stable_mosaic.version = 11 : i64} {
  func.func @_bn_lrelu_kernel(%arg0: i32, %arg1: memref<1x19x128xf32, #tpu.memory_space<vmem>>, %arg2: memref<1x1x128xf32, #tpu.memory_space<vmem>>, %arg3: memref<1x1x128xf32, #tpu.memory_space<vmem>>, %arg4: memref<1x19x128xbf16, #tpu.memory_space<vmem>>) attributes {dimension_semantics = [#tpu.dimension_semantics<parallel>], iteration_bounds = array<i64: 2>, scalar_prefetch = 0 : i64, scratch_operands = 0 : i64, tpu.core_type = #tpu.core_type<tc>, window_params = [{transform_indices = @transform_0, window_bounds = array<i64: 1, 19, 128>}, {pipeline_mode = #tpu.pipeline_mode<synchronous>, transform_indices = @transform_1, window_bounds = array<i64: 1, 1, 128>}, {pipeline_mode = #tpu.pipeline_mode<synchronous>, transform_indices = @transform_2, window_bounds = array<i64: 1, 1, 128>}, {transform_indices = @transform_3, window_bounds = array<i64: 1, 19, 128>}]} {
    %c0 = arith.constant 0 : index
    %c0_0 = arith.constant 0 : index
    %c0_1 = arith.constant 0 : index
    %0 = vector.load %arg1[%c0, %c0_0, %c0_1] : memref<1x19x128xf32, #tpu.memory_space<vmem>>, vector<1x19x128xf32>
    %c0_2 = arith.constant 0 : index
    %c0_3 = arith.constant 0 : index
    %c0_4 = arith.constant 0 : index
    %1 = vector.load %arg2[%c0_2, %c0_3, %c0_4] : memref<1x1x128xf32, #tpu.memory_space<vmem>>, vector<1x1x128xf32>
    %2 = vector.broadcast %1 : vector<1x1x128xf32> to vector<1x19x128xf32>
    %3 = arith.mulf %0, %2 : vector<1x19x128xf32>
    %c0_5 = arith.constant 0 : index
    %c0_6 = arith.constant 0 : index
    %c0_7 = arith.constant 0 : index
    %4 = vector.load %arg3[%c0_5, %c0_6, %c0_7] : memref<1x1x128xf32, #tpu.memory_space<vmem>>, vector<1x1x128xf32>
    %5 = vector.broadcast %4 : vector<1x1x128xf32> to vector<1x19x128xf32>
    %6 = arith.addf %3, %5 : vector<1x19x128xf32>
    %cst = arith.constant 0.000000e+00 : f32
    %7 = vector.broadcast %cst : f32 to vector<1x19x128xf32>
    %8 = arith.cmpf oge, %6, %7 : vector<1x19x128xf32>
    %cst_8 = arith.constant 0.00999999977 : f32
    %9 = vector.broadcast %cst_8 : f32 to vector<1x19x128xf32>
    %10 = arith.mulf %9, %6 : vector<1x19x128xf32>
    %11 = arith.select %8, %6, %10 : vector<1x19x128xi1>, vector<1x19x128xf32>
    %12 = arith.truncf %11 : vector<1x19x128xf32> to vector<1x19x128xbf16>
    %c0_9 = arith.constant 0 : index
    %c0_10 = arith.constant 0 : index
    %c0_11 = arith.constant 0 : index
    %13 = vector.load %arg4[%c0_9, %c0_10, %c0_11] : memref<1x19x128xbf16, #tpu.memory_space<vmem>>, vector<1x19x128xbf16>
    tpu.vector_store %arg4[%c0_9, %c0_10, %c0_11], %12 {strides = array<i32>} : memref<1x19x128xbf16, #tpu.memory_space<vmem>>, vector<1x19x128xbf16>,
    return
  }
  func.func @transform_0(%arg0: i32) -> (i32, i32, i32) {
    %c0_i32 = arith.constant 0 : i32
    %c0_i32_0 = arith.constant 0 : i32
    %c0_i32_1 = arith.constant 0 : i32
    return %arg0, %c0_i32, %c0_i32_0 : i32, i32, i32
  }
  func.func @transform_1(%arg0: i32) -> (i32, i32, i32) {
    %c0_i32 = arith.constant 0 : i32
    %c0_i32_0 = arith.constant 0 : i32
    %c0_i32_1 = arith.constant 0 : i32
    %c0_i32_2 = arith.constant 0 : i32
    return %c0_i32, %c0_i32_0, %c0_i32_1 : i32, i32, i32
  }
  func.func @transform_2(%arg0: i32) -> (i32, i32, i32) {
    %c0_i32 = arith.constant 0 : i32
    %c0_i32_0 = arith.constant 0 : i32
    %c0_i32_1 = arith.constant 0 : i32
    %c0_i32_2 = arith.constant 0 : i32
    return %c0_i32, %c0_i32_0, %c0_i32_1 : i32, i32, i32
  }
  func.func @transform_3(%arg0: i32) -> (i32, i32, i32) {
    %c0_i32 = arith.constant 0 : i32
    %c0_i32_0 = arith.constant 0 : i32
    %c0_i32_1 = arith.constant 0 : i32
    return %arg0, %c0_i32, %c0_i32_0 : i32, i32, i32
  }
}

module attributes {stable_mosaic.version = 11 : i64} {
  func.func @_bn_lrelu_kernel(%arg0: i32, %arg1: memref<1x5x128xf32, #tpu.memory_space<vmem>>, %arg2: memref<1x1x128xf32, #tpu.memory_space<vmem>>, %arg3: memref<1x1x128xf32, #tpu.memory_space<vmem>>, %arg4: memref<1x5x128xbf16, #tpu.memory_space<vmem>>) attributes {dimension_semantics = [#tpu.dimension_semantics<parallel>], iteration_bounds = array<i64: 2>, scalar_prefetch = 0 : i64, scratch_operands = 0 : i64, tpu.core_type = #tpu.core_type<tc>, window_params = [{transform_indices = @transform_0, window_bounds = array<i64: 1, 5, 128>}, {pipeline_mode = #tpu.pipeline_mode<synchronous>, transform_indices = @transform_1, window_bounds = array<i64: 1, 1, 128>}, {pipeline_mode = #tpu.pipeline_mode<synchronous>, transform_indices = @transform_2, window_bounds = array<i64: 1, 1, 128>}, {transform_indices = @transform_3, window_bounds = array<i64: 1, 5, 128>}]} {
    %c0 = arith.constant 0 : index
    %c0_0 = arith.constant 0 : index
    %c0_1 = arith.constant 0 : index
    %0 = vector.load %arg1[%c0, %c0_0, %c0_1] : memref<1x5x128xf32, #tpu.memory_space<vmem>>, vector<1x5x128xf32>
    %c0_2 = arith.constant 0 : index
    %c0_3 = arith.constant 0 : index
    %c0_4 = arith.constant 0 : index
    %1 = vector.load %arg2[%c0_2, %c0_3, %c0_4] : memref<1x1x128xf32, #tpu.memory_space<vmem>>, vector<1x1x128xf32>
    %2 = vector.broadcast %1 : vector<1x1x128xf32> to vector<1x5x128xf32>
    %3 = arith.mulf %0, %2 : vector<1x5x128xf32>
    %c0_5 = arith.constant 0 : index
    %c0_6 = arith.constant 0 : index
    %c0_7 = arith.constant 0 : index
    %4 = vector.load %arg3[%c0_5, %c0_6, %c0_7] : memref<1x1x128xf32, #tpu.memory_space<vmem>>, vector<1x1x128xf32>
    %5 = vector.broadcast %4 : vector<1x1x128xf32> to vector<1x5x128xf32>
    %6 = arith.addf %3, %5 : vector<1x5x128xf32>
    %cst = arith.constant 0.000000e+00 : f32
    %7 = vector.broadcast %cst : f32 to vector<1x5x128xf32>
    %8 = arith.cmpf oge, %6, %7 : vector<1x5x128xf32>
    %cst_8 = arith.constant 0.00999999977 : f32
    %9 = vector.broadcast %cst_8 : f32 to vector<1x5x128xf32>
    %10 = arith.mulf %9, %6 : vector<1x5x128xf32>
    %11 = arith.select %8, %6, %10 : vector<1x5x128xi1>, vector<1x5x128xf32>
    %12 = arith.truncf %11 : vector<1x5x128xf32> to vector<1x5x128xbf16>
    %c0_9 = arith.constant 0 : index
    %c0_10 = arith.constant 0 : index
    %c0_11 = arith.constant 0 : index
    %13 = vector.load %arg4[%c0_9, %c0_10, %c0_11] : memref<1x5x128xbf16, #tpu.memory_space<vmem>>, vector<1x5x128xbf16>
    tpu.vector_store %arg4[%c0_9, %c0_10, %c0_11], %12 {strides = array<i32>} : memref<1x5x128xbf16, #tpu.memory_space<vmem>>, vector<1x5x128xbf16>,
    return
  }
  func.func @transform_0(%arg0: i32) -> (i32, i32, i32) {
    %c0_i32 = arith.constant 0 : i32
    %c0_i32_0 = arith.constant 0 : i32
    %c0_i32_1 = arith.constant 0 : i32
    return %arg0, %c0_i32, %c0_i32_0 : i32, i32, i32
  }
  func.func @transform_1(%arg0: i32) -> (i32, i32, i32) {
    %c0_i32 = arith.constant 0 : i32
    %c0_i32_0 = arith.constant 0 : i32
    %c0_i32_1 = arith.constant 0 : i32
    %c0_i32_2 = arith.constant 0 : i32
    return %c0_i32, %c0_i32_0, %c0_i32_1 : i32, i32, i32
  }
  func.func @transform_2(%arg0: i32) -> (i32, i32, i32) {
    %c0_i32 = arith.constant 0 : i32
    %c0_i32_0 = arith.constant 0 : i32
    %c0_i32_1 = arith.constant 0 : i32
    %c0_i32_2 = arith.constant 0 : i32
    return %c0_i32, %c0_i32_0, %c0_i32_1 : i32, i32, i32
  }
  func.func @transform_3(%arg0: i32) -> (i32, i32, i32) {
    %c0_i32 = arith.constant 0 : i32
    %c0_i32_0 = arith.constant 0 : i32
    %c0_i32_1 = arith.constant 0 : i32
    return %arg0, %c0_i32, %c0_i32_0 : i32, i32, i32
  }
}

module attributes {stable_mosaic.version = 11 : i64} {
  func.func @_conv_stats_kernel(%arg0: i32, %arg1: memref<4x9x128xbf16, #tpu.memory_space<vmem>>, %arg2: memref<9x128x128xbf16, #tpu.memory_space<vmem>>, %arg3: memref<5x1xf32, #tpu.memory_space<vmem>>, %arg4: memref<1x5x128xf32, #tpu.memory_space<vmem>>, %arg5: memref<1x2x128xf32, #tpu.memory_space<vmem>>) attributes {dimension_semantics = [#tpu.dimension_semantics<parallel>], iteration_bounds = array<i64: 2>, scalar_prefetch = 0 : i64, scratch_operands = 0 : i64, tpu.core_type = #tpu.core_type<tc>, window_params = [{transform_indices = @transform_0, window_bounds = array<i64: 4, 9, 128>}, {pipeline_mode = #tpu.pipeline_mode<synchronous>, transform_indices = @transform_1, window_bounds = array<i64: 9, 128, 128>}, {pipeline_mode = #tpu.pipeline_mode<synchronous>, transform_indices = @transform_2, window_bounds = array<i64: 5, 1>}, {transform_indices = @transform_3, window_bounds = array<i64: 1, 5, 128>}, {transform_indices = @transform_4, window_bounds = array<i64: 1, 2, 128>}]} {
    %cst = arith.constant 0.000000e+00 : f32
    %0 = vector.broadcast %cst : f32 to vector<5x128xf32>
    %c0 = arith.constant 0 : index
    %c0_0 = arith.constant 0 : index
    %c0_1 = arith.constant 0 : index
    %1 = vector.load %arg1[%c0, %c0_0, %c0_1] : memref<4x9x128xbf16, #tpu.memory_space<vmem>>, vector<1x5x128xbf16>
    %2 = vector.shape_cast %1 : vector<1x5x128xbf16> to vector<5x128xbf16>
    %c0_2 = arith.constant 0 : index
    %c0_3 = arith.constant 0 : index
    %c0_4 = arith.constant 0 : index
    %3 = vector.load %arg2[%c0_2, %c0_3, %c0_4] : memref<9x128x128xbf16, #tpu.memory_space<vmem>>, vector<1x128x128xbf16>
    %4 = vector.shape_cast %3 : vector<1x128x128xbf16> to vector<128x128xbf16>
    %cst_5 = arith.constant dense<0.000000e+00> : vector<5x128xf32>
    %5 = tpu.matmul %2, %4, %cst_5 {dimension_numbers = #tpu.dot_dimension_numbers<[1], [0], [0], [1], [0, 0, 1, 1], [], []>} : vector<5x128xbf16>, vector<128x128xbf16>, vector<5x128xf32> -> vector<5x128xf32>
    %6 = arith.addf %0, %5 : vector<5x128xf32>
    %c1 = arith.constant 1 : index
    %c0_6 = arith.constant 0 : index
    %c0_7 = arith.constant 0 : index
    %7 = vector.load %arg1[%c1, %c0_6, %c0_7] : memref<4x9x128xbf16, #tpu.memory_space<vmem>>, vector<1x5x128xbf16>
    %8 = vector.shape_cast %7 : vector<1x5x128xbf16> to vector<5x128xbf16>
    %c1_8 = arith.constant 1 : index
    %c0_9 = arith.constant 0 : index
    %c0_10 = arith.constant 0 : index
    %9 = vector.load %arg2[%c1_8, %c0_9, %c0_10] : memref<9x128x128xbf16, #tpu.memory_space<vmem>>, vector<1x128x128xbf16>
    %10 = vector.shape_cast %9 : vector<1x128x128xbf16> to vector<128x128xbf16>
    %cst_11 = arith.constant dense<0.000000e+00> : vector<5x128xf32>
    %11 = tpu.matmul %8, %10, %cst_11 {dimension_numbers = #tpu.dot_dimension_numbers<[1], [0], [0], [1], [0, 0, 1, 1], [], []>} : vector<5x128xbf16>, vector<128x128xbf16>, vector<5x128xf32> -> vector<5x128xf32>
    %12 = arith.addf %6, %11 : vector<5x128xf32>
    %c0_12 = arith.constant 0 : index
    %c1_13 = arith.constant 1 : index
    %c0_14 = arith.constant 0 : index
    %13 = vector.load %arg1[%c0_12, %c1_13, %c0_14] : memref<4x9x128xbf16, #tpu.memory_space<vmem>>, vector<1x5x128xbf16>
    %14 = vector.shape_cast %13 : vector<1x5x128xbf16> to vector<5x128xbf16>
    %c2 = arith.constant 2 : index
    %c0_15 = arith.constant 0 : index
    %c0_16 = arith.constant 0 : index
    %15 = vector.load %arg2[%c2, %c0_15, %c0_16] : memref<9x128x128xbf16, #tpu.memory_space<vmem>>, vector<1x128x128xbf16>
    %16 = vector.shape_cast %15 : vector<1x128x128xbf16> to vector<128x128xbf16>
    %cst_17 = arith.constant dense<0.000000e+00> : vector<5x128xf32>
    %17 = tpu.matmul %14, %16, %cst_17 {dimension_numbers = #tpu.dot_dimension_numbers<[1], [0], [0], [1], [0, 0, 1, 1], [], []>} : vector<5x128xbf16>, vector<128x128xbf16>, vector<5x128xf32> -> vector<5x128xf32>
    %18 = arith.addf %12, %17 : vector<5x128xf32>
    %c2_18 = arith.constant 2 : index
    %c0_19 = arith.constant 0 : index
    %c0_20 = arith.constant 0 : index
    %19 = vector.load %arg1[%c2_18, %c0_19, %c0_20] : memref<4x9x128xbf16, #tpu.memory_space<vmem>>, vector<1x5x128xbf16>
    %20 = vector.shape_cast %19 : vector<1x5x128xbf16> to vector<5x128xbf16>
    %c3 = arith.constant 3 : index
    %c0_21 = arith.constant 0 : index
    %c0_22 = arith.constant 0 : index
    %21 = vector.load %arg2[%c3, %c0_21, %c0_22] : memref<9x128x128xbf16, #tpu.memory_space<vmem>>, vector<1x128x128xbf16>
    %22 = vector.shape_cast %21 : vector<1x128x128xbf16> to vector<128x128xbf16>
    %cst_23 = arith.constant dense<0.000000e+00> : vector<5x128xf32>
    %23 = tpu.matmul %20, %22, %cst_23 {dimension_numbers = #tpu.dot_dimension_numbers<[1], [0], [0], [1], [0, 0, 1, 1], [], []>} : vector<5x128xbf16>, vector<128x128xbf16>, vector<5x128xf32> -> vector<5x128xf32>
    %24 = arith.addf %18, %23 : vector<5x128xf32>
    %c3_24 = arith.constant 3 : index
    %c0_25 = arith.constant 0 : index
    %c0_26 = arith.constant 0 : index
    %25 = vector.load %arg1[%c3_24, %c0_25, %c0_26] : memref<4x9x128xbf16, #tpu.memory_space<vmem>>, vector<1x5x128xbf16>
    %26 = vector.shape_cast %25 : vector<1x5x128xbf16> to vector<5x128xbf16>
    %c4 = arith.constant 4 : index
    %c0_27 = arith.constant 0 : index
    %c0_28 = arith.constant 0 : index
    %27 = vector.load %arg2[%c4, %c0_27, %c0_28] : memref<9x128x128xbf16, #tpu.memory_space<vmem>>, vector<1x128x128xbf16>
    %28 = vector.shape_cast %27 : vector<1x128x128xbf16> to vector<128x128xbf16>
    %cst_29 = arith.constant dense<0.000000e+00> : vector<5x128xf32>
    %29 = tpu.matmul %26, %28, %cst_29 {dimension_numbers = #tpu.dot_dimension_numbers<[1], [0], [0], [1], [0, 0, 1, 1], [], []>} : vector<5x128xbf16>, vector<128x128xbf16>, vector<5x128xf32> -> vector<5x128xf32>
    %30 = arith.addf %24, %29 : vector<5x128xf32>
    %c2_30 = arith.constant 2 : index
    %c1_31 = arith.constant 1 : index
    %c0_32 = arith.constant 0 : index
    %31 = vector.load %arg1[%c2_30, %c1_31, %c0_32] : memref<4x9x128xbf16, #tpu.memory_space<vmem>>, vector<1x5x128xbf16>
    %32 = vector.shape_cast %31 : vector<1x5x128xbf16> to vector<5x128xbf16>
    %c5 = arith.constant 5 : index
    %c0_33 = arith.constant 0 : index
    %c0_34 = arith.constant 0 : index
    %33 = vector.load %arg2[%c5, %c0_33, %c0_34] : memref<9x128x128xbf16, #tpu.memory_space<vmem>>, vector<1x128x128xbf16>
    %34 = vector.shape_cast %33 : vector<1x128x128xbf16> to vector<128x128xbf16>
    %cst_35 = arith.constant dense<0.000000e+00> : vector<5x128xf32>
    %35 = tpu.matmul %32, %34, %cst_35 {dimension_numbers = #tpu.dot_dimension_numbers<[1], [0], [0], [1], [0, 0, 1, 1], [], []>} : vector<5x128xbf16>, vector<128x128xbf16>, vector<5x128xf32> -> vector<5x128xf32>
    %36 = arith.addf %30, %35 : vector<5x128xf32>
    %c0_36 = arith.constant 0 : index
    %c3_37 = arith.constant 3 : index
    %c0_38 = arith.constant 0 : index
    %37 = vector.load %arg1[%c0_36, %c3_37, %c0_38] : memref<4x9x128xbf16, #tpu.memory_space<vmem>>, vector<1x5x128xbf16>
    %38 = vector.shape_cast %37 : vector<1x5x128xbf16> to vector<5x128xbf16>
    %c6 = arith.constant 6 : index
    %c0_39 = arith.constant 0 : index
    %c0_40 = arith.constant 0 : index
    %39 = vector.load %arg2[%c6, %c0_39, %c0_40] : memref<9x128x128xbf16, #tpu.memory_space<vmem>>, vector<1x128x128xbf16>
    %40 = vector.shape_cast %39 : vector<1x128x128xbf16> to vector<128x128xbf16>
    %cst_41 = arith.constant dense<0.000000e+00> : vector<5x128xf32>
    %41 = tpu.matmul %38, %40, %cst_41 {dimension_numbers = #tpu.dot_dimension_numbers<[1], [0], [0], [1], [0, 0, 1, 1], [], []>} : vector<5x128xbf16>, vector<128x128xbf16>, vector<5x128xf32> -> vector<5x128xf32>
    %42 = arith.addf %36, %41 : vector<5x128xf32>
    %c1_42 = arith.constant 1 : index
    %c3_43 = arith.constant 3 : index
    %c0_44 = arith.constant 0 : index
    %43 = vector.load %arg1[%c1_42, %c3_43, %c0_44] : memref<4x9x128xbf16, #tpu.memory_space<vmem>>, vector<1x5x128xbf16>
    %44 = vector.shape_cast %43 : vector<1x5x128xbf16> to vector<5x128xbf16>
    %c7 = arith.constant 7 : index
    %c0_45 = arith.constant 0 : index
    %c0_46 = arith.constant 0 : index
    %45 = vector.load %arg2[%c7, %c0_45, %c0_46] : memref<9x128x128xbf16, #tpu.memory_space<vmem>>, vector<1x128x128xbf16>
    %46 = vector.shape_cast %45 : vector<1x128x128xbf16> to vector<128x128xbf16>
    %cst_47 = arith.constant dense<0.000000e+00> : vector<5x128xf32>
    %47 = tpu.matmul %44, %46, %cst_47 {dimension_numbers = #tpu.dot_dimension_numbers<[1], [0], [0], [1], [0, 0, 1, 1], [], []>} : vector<5x128xbf16>, vector<128x128xbf16>, vector<5x128xf32> -> vector<5x128xf32>
    %48 = arith.addf %42, %47 : vector<5x128xf32>
    %c0_48 = arith.constant 0 : index
    %c4_49 = arith.constant 4 : index
    %c0_50 = arith.constant 0 : index
    %49 = vector.load %arg1[%c0_48, %c4_49, %c0_50] : memref<4x9x128xbf16, #tpu.memory_space<vmem>>, vector<1x5x128xbf16>
    %50 = vector.shape_cast %49 : vector<1x5x128xbf16> to vector<5x128xbf16>
    %c8 = arith.constant 8 : index
    %c0_51 = arith.constant 0 : index
    %c0_52 = arith.constant 0 : index
    %51 = vector.load %arg2[%c8, %c0_51, %c0_52] : memref<9x128x128xbf16, #tpu.memory_space<vmem>>, vector<1x128x128xbf16>
    %52 = vector.shape_cast %51 : vector<1x128x128xbf16> to vector<128x128xbf16>
    %cst_53 = arith.constant dense<0.000000e+00> : vector<5x128xf32>
    %53 = tpu.matmul %50, %52, %cst_53 {dimension_numbers = #tpu.dot_dimension_numbers<[1], [0], [0], [1], [0, 0, 1, 1], [], []>} : vector<5x128xbf16>, vector<128x128xbf16>, vector<5x128xf32> -> vector<5x128xf32>
    %54 = arith.addf %48, %53 : vector<5x128xf32>
    %c0_54 = arith.constant 0 : index
    %c0_55 = arith.constant 0 : index
    %c0_56 = arith.constant 0 : index
    %55 = vector.load %arg4[%c0_54, %c0_55, %c0_56] : memref<1x5x128xf32, #tpu.memory_space<vmem>>, vector<1x5x128xf32>
    %56 = vector.shape_cast %55 : vector<1x5x128xf32> to vector<5x128xf32>
    %57 = vector.shape_cast %54 : vector<5x128xf32> to vector<1x5x128xf32>
    tpu.vector_store %arg4[%c0_54, %c0_55, %c0_56], %57 {strides = array<i32>} : memref<1x5x128xf32, #tpu.memory_space<vmem>>, vector<1x5x128xf32>,
    %c0_57 = arith.constant 0 : index
    %c0_58 = arith.constant 0 : index
    %58 = vector.load %arg3[%c0_57, %c0_58] : memref<5x1xf32, #tpu.memory_space<vmem>>, vector<5x1xf32>
    %59 = vector.broadcast %58 : vector<5x1xf32> to vector<5x128xf32>
    %60 = arith.mulf %54, %59 : vector<5x128xf32>
    %cst_59 = arith.constant dense<0.000000e+00> : vector<128xf32>
    %61 = vector.multi_reduction <add>, %60, %cst_59 [0] : vector<5x128xf32> to vector<128xf32>
    %62 = vector.shape_cast %61 : vector<128xf32> to vector<1x128xf32>
    %63 = arith.mulf %54, %60 : vector<5x128xf32>
    %cst_60 = arith.constant dense<0.000000e+00> : vector<128xf32>
    %64 = vector.multi_reduction <add>, %63, %cst_60 [0] : vector<5x128xf32> to vector<128xf32>
    %65 = vector.shape_cast %64 : vector<128xf32> to vector<1x128xf32>
    %66 = tpu.concatenate %62, %65 in 0 : vector<1x128xf32>, vector<1x128xf32> -> vector<2x128xf32>
    %c0_61 = arith.constant 0 : index
    %c0_62 = arith.constant 0 : index
    %c0_63 = arith.constant 0 : index
    %67 = vector.load %arg5[%c0_61, %c0_62, %c0_63] : memref<1x2x128xf32, #tpu.memory_space<vmem>>, vector<1x2x128xf32>
    %68 = vector.shape_cast %67 : vector<1x2x128xf32> to vector<2x128xf32>
    %69 = vector.shape_cast %66 : vector<2x128xf32> to vector<1x2x128xf32>
    tpu.vector_store %arg5[%c0_61, %c0_62, %c0_63], %69 {strides = array<i32>} : memref<1x2x128xf32, #tpu.memory_space<vmem>>, vector<1x2x128xf32>,
    return
  }
  func.func @transform_0(%arg0: i32) -> (i32, i32, i32) {
    %c0_i32 = arith.constant 0 : i32
    %c0_i32_0 = arith.constant 0 : i32
    %c0_i32_1 = arith.constant 0 : i32
    return %arg0, %c0_i32, %c0_i32_0 : i32, i32, i32
  }
  func.func @transform_1(%arg0: i32) -> (i32, i32, i32) {
    %c0_i32 = arith.constant 0 : i32
    %c0_i32_0 = arith.constant 0 : i32
    %c0_i32_1 = arith.constant 0 : i32
    %c0_i32_2 = arith.constant 0 : i32
    return %c0_i32, %c0_i32_0, %c0_i32_1 : i32, i32, i32
  }
  func.func @transform_2(%arg0: i32) -> (i32, i32) {
    %c0_i32 = arith.constant 0 : i32
    %c0_i32_0 = arith.constant 0 : i32
    %c0_i32_1 = arith.constant 0 : i32
    return %c0_i32, %c0_i32_0 : i32, i32
  }
  func.func @transform_3(%arg0: i32) -> (i32, i32, i32) {
    %c0_i32 = arith.constant 0 : i32
    %c0_i32_0 = arith.constant 0 : i32
    %c0_i32_1 = arith.constant 0 : i32
    return %arg0, %c0_i32, %c0_i32_0 : i32, i32, i32
  }
  func.func @transform_4(%arg0: i32) -> (i32, i32, i32) {
    %c0_i32 = arith.constant 0 : i32
    %c0_i32_0 = arith.constant 0 : i32
    %c0_i32_1 = arith.constant 0 : i32
    return %arg0, %c0_i32, %c0_i32_0 : i32, i32, i32
  }
}

</mosaic_0001>

<bundles_post_ra>
// kernel: encoder_v1.7
= control target key start
LH: loop header
LB: loop body
LE: loop exit
PB: predicated region body
PF: predicated region fallthrough
CT: control target
= control target key end

     0   :  { %s435_s12 = smov 0   ;;  %s473_s0 = inlined_call_operand.vmem [shape: f32[2,71,128], index: 0, kind: input, shape index: {}]   ;;  %s474_s1 = inlined_call_operand.vmem [shape: f32[1,1,128], index: 1, kind: input, shape index: {}]   ;;  %s475_s2 = inlined_call_operand.vmem [shape: f32[1,1,128], index: 2, kind: input, shape index: {}]   ;;  %s476_s3 = inlined_call_operand.vmem [shape: bf16[2,71,128], index: 3, kind: output, shape index: {}]  }
   0x1 LB: > { %s345_s13 = sadd.s32 4294967295, %s413_s12   ;;  %p349_p0 = scmp.ge.s32.totalorder %s413_s12, 1  ;;  %s413_s12 = sphi %s435_s12, %s13_s12  }
   0x2   : > { %p137_p1 = scmp.lt.s32.totalorder %s413_s12, 3 }
   0x4   : > { %p138_p2 = pnand %p349_p0, %p137_p1 }
   0x5   : > { %p161_p3 = scmp.lt.s32.totalorder (!%p138_p2), %s345_s13, 1  ;;  %v352_v0 = vld [vmem:[%s474_s1] ss:$0 sm:$0xff] (!%p138_p2)  ;;  %vm284_vm8 = vcmask (!%p138_p2), 1043456   ;;  %vm285_vm9 = vsmask.f32 (!%p138_p2), 3328 }
   0x6   : > { %141 = sbr.rel (%p138_p2) target bundleno = 38 (0x26), region = 32  ;;  %v353_v1 = vld [vmem:[%s475_s2] ss:$0 sm:$0xff] (!%p138_p2)  ;;  %vm286_vm11 = vmand (!%p138_p2), %vm284_vm8, %vm285_vm9 }
   0xd   : > { %s478_s13 = smov (!%p161_p3, %s345_s13), 1 }
   0xe   : > { %s397_s14 = smul.u32 72, %s478_s13 }
   0xf   : > { %s398_s22 = smul.u32 36, %s478_s13 }
  0x10   : > { %s452_s19 = scalar_lea.vmem %s473_s0, %s397_s14 }
  0x11   : > { %v171_v2 = vld [vmem:[%s452_s19] sm:$0xff]  ;;  %v172_v3 = vld [vmem:[%s452_s19 + $0x8] sm:$0xff]  ;;  %v173_v4 = vld [vmem:[%s452_s19 + $0x10] sm:$0xff]  ;;  %s170_s25 = scalar_lea.vmem %s476_s3, %s398_s22 }
  0x12   : > { %v187_v5 = vmul.f32 %v352_v0, %v171_v2  ;;  %v188_v6 = vmul.f32 %v352_v0, %v172_v3  ;;  %v174_v7 = vld [vmem:[%s452_s19 + $0x18] sm:$0xff]  ;;  %v189_v8 = vmul.f32 %v352_v0, %v173_v4  ;;  %v175_v9 = vld [vmem:[%s452_s19 + $0x20] sm:$0xff]  ;;  %v176_v10 = vld [vmem:[%s452_s19 + $0x28] sm:$0xff] }
  0x13   : > { %v190_v11 = vmul.f32 %v352_v0, %v174_v7  ;;  %v191_v12 = vmul.f32 %v352_v0, %v175_v9  ;;  %v192_v13 = vmul.f32 %v352_v0, %v176_v10  ;;  %v177_v14 = vld [vmem:[%s452_s19 + $0x30] sm:$0xff]  ;;  %v178_v15 = vld [vmem:[%s452_s19 + $0x38] sm:$0xff]  ;;  %v179_v30 = vld [vmem:[%s452_s19 + $0x40] sm:$0x7f] }
  0x14   : > { %v203_v16 = vadd.f32 %v353_v1, %v187_v5  ;;  %v204_v17 = vadd.f32 %v353_v1, %v188_v6  ;;  %v205_v18 = vadd.f32 %v353_v1, %v189_v8  ;;  %v193_v19 = vmul.f32 %v352_v0, %v177_v14  ;;  %v287_v51 = vld [vmem:[%s170_s25 + $0x20] sm:$0xf] }
  0x15   : > { %v206_v20 = vadd.f32 %v353_v1, %v190_v11  ;;  %v207_v21 = vadd.f32 %v353_v1, %v191_v12  ;;  %v208_v22 = vadd.f32 %v353_v1, %v192_v13  ;;  %v194_v23 = vmul.f32 %v352_v0, %v178_v15 }
  0x16   : > { %vm212_vm0 = vcmp.ge.f32.partialorder %v203_v16, 0.0  ;;  %vm213_vm1 = vcmp.ge.f32.partialorder %v204_v17, 0.0  ;;  %v221_v24 = vmul.f32 0.01, %v203_v16  ;;  %v222_v25 = vmul.f32 0.01, %v204_v17 }
  0x17   : > { %vm214_vm2 = vcmp.ge.f32.partialorder %v205_v18, 0.0  ;;  %vm215_vm3 = vcmp.ge.f32.partialorder %v206_v20, 0.0  ;;  %v223_v26 = vmul.f32 0.01, %v205_v18  ;;  %v224_v27 = vmul.f32 0.01, %v206_v20 }
  0x18   : > { %v230_v28 = vsel %vm212_vm0, %v203_v16, %v221_v24  ;;  %v231_v29 = vsel %vm213_vm1, %v204_v17, %v222_v25  ;;  %vm216_vm4 = vcmp.ge.f32.partialorder %v207_v21, 0.0  ;;  %vm217_vm5 = vcmp.ge.f32.partialorder %v208_v22, 0.0 }
  0x19   : > { %v377_v31 = vpack.c.bf16 %v231_v29, %v230_v28  ;;  %v232_v32 = vsel %vm214_vm2, %v205_v18, %v223_v26  ;;  %v233_v33 = vsel %vm215_vm3, %v206_v20, %v224_v27  ;;  %v225_v34 = vmul.f32 0.01, %v207_v21 }
  0x1a   : > { %v382_v35 = vpack.c.bf16 %v233_v33, %v232_v32  ;;  %v226_v36 = vmul.f32 0.01, %v208_v22  ;;  %v209_v37 = vadd.f32 %v353_v1, %v193_v19  ;;  %v210_v38 = vadd.f32 %v353_v1, %v194_v23 }
  0x1b   : > { %378 = vst [vmem:[%s170_s25] sm:$0xff] %v377_v31   ;;  %v234_v39 = vsel %vm216_vm4, %v207_v21, %v225_v34  ;;  %v195_v40 = vmul.f32 %v352_v0, %v179_v30 }
  0x1c   : > { %394 = vst [vmem:[%s170_s25 + $0x8] sm:$0xff] %v382_v35   ;;  %v235_v41 = vsel %vm217_vm5, %v208_v22, %v226_v36  ;;  %vm218_vm6 = vcmp.ge.f32.partialorder %v209_v37, 0.0  ;;  %vm219_vm7 = vcmp.ge.f32.partialorder %v210_v38, 0.0  ;;  %v227_v42 = vmul.f32 0.01, %v209_v37 }
  0x1d   : > { %v387_v43 = vpack.c.bf16 %v235_v41, %v234_v39  ;;  %v228_v44 = vmul.f32 0.01, %v210_v38  ;;  %v211_v45 = vadd.f32 %v353_v1, %v195_v40 }
  0x1e   : > { %v236_v46 = vsel %vm218_vm6, %v209_v37, %v227_v42 }
  0x1f   : > { %395 = vst [vmem:[%s170_s25 + $0x10] sm:$0xff] %v387_v43   ;;  %v237_v47 = vsel %vm219_vm7, %v210_v38, %v228_v44  ;;  %vm220_vm10 = vcmp.ge.f32.partialorder %v211_v45, 0.0  ;;  %v229_v48 = vmul.f32 0.01, %v211_v45 }
  0x20   : > { %v392_v49 = vpack.c.bf16 %v237_v47, %v236_v46 }
  0x21   : > { %v238_v50 = vsel %vm220_vm10, %v211_v45, %v229_v48 }
  0x22   : > { %396 = vst [vmem:[%s170_s25 + $0x18] sm:$0xff] %v392_v49   ;;  %v373_v52 = vpack.c.bf16 %v238_v50, %v238_v50 }
  0x24   : > { %v288_v53 = vsel %vm286_vm11, %v373_v52, %v287_v51 }
  0x25   : > { %289 = vst [vmem:[%s170_s25 + $0x20] sm:$0xf] %v288_v53 }
  0x26 PF: > { %s13_s12 = sadd.s32 1, %s413_s12  }
  0x27   : > { %p10_p4 = scmp.ge.s32.totalorder %s13_s12, 4  }
  0x29   :  { %12 = sbr.rel (!%p10_p4) target bundleno = 1 (0x1), region = 62 }

// kernel: encoder_v1.6
= control target key start
LH: loop header
LB: loop body
LE: loop exit
PB: predicated region body
PF: predicated region fallthrough
CT: control target
= control target key end

     0   :  { %s2319_s15 = smov 0   ;;  %s2729_s0 = inlined_call_operand.vmem [shape: bf16[8,81,4], index: 0, kind: input, shape index: {}]   ;;  %s2730_s1 = inlined_call_operand.vmem [shape: bf16[9,4,128], index: 1, kind: input, shape index: {}]   ;;  %s2731_s2 = inlined_call_operand.vmem [shape: f32[71,1], index: 2, kind: input, shape index: {}]   ;;  %s2732_s3 = inlined_call_operand.vmem [shape: f32[2,71,128], index: 3, kind: output, shape index: {0}]   ;;  %s2733_s4 = inlined_call_operand.vmem [shape: f32[2,2,128], index: 4, kind: output, shape index: {1}]  }
   0x1 LB: > { %s2325_s16 = sadd.s32 4294967295, %s2289_s15   ;;  %p1699_p0 = scmp.ge.s32.totalorder %s2289_s15, 1  ;;  %s2289_s15 = sphi %s2319_s15, %s15_s15  }
   0x2   : > { %p167_p1 = scmp.lt.s32.totalorder %s2289_s15, 3 }
   0x4   : > { %p168_p2 = pnand %p1699_p0, %p167_p1 }
   0x5   : > { %vm276_vm0 = vcmask (!%p168_p2), 1041408   ;;  %v1769_v0 = vld [vmem:[%s2730_s1 + $0x8] sm:$0x3] (!%p168_p2)  ;;  %v1713_v1 = vld [vmem:[%s2730_s1 + $0x2] sm:$0x3] (!%p168_p2)  ;;  %v2291_v2 = vmov (!%p168_p2), 0.0  }
   0x6   : > { %171 = sbr.rel (%p168_p2) target bundleno = 429 (0x1ad), region = 32  ;;  %1972 = vmatprep.subr.bf16.mxu0 (!%p168_p2), %v2291_v2  ;;  %1884 = vmatprep.subr.bf16.mxu1 (!%p168_p2), %v2291_v2  ;;  %v2338_v3 = vsel (!%p168_p2), %vm276_vm0, %v1769_v0, 0  ;;  %v278_v4 = vsel (!%p168_p2), %vm276_vm0, %v1713_v1, 0  ;;  %s1700_s21 = sshll.u32 (!%p168_p2), %s2325_s16, 2  ;;  %vm2292_vm1 = vmmov (!%p168_p2), 0   ;;  %vm260_vm2 = vcmask (!%p168_p2), 31744  }
   0x7   : > { %1973 = vmatpush3.bf16.msra.mxu0 (!%p168_p2), %v2338_v3  ;;  %1885 = vmatpush3.bf16.msra.mxu1 (!%p168_p2), %v278_v4  ;;  %p199_p3 = scmp.lt.s32.totalorder (!%p168_p2), %s1700_s21, 7  ;;  %v1780_v5 = vld [vmem:[%s2730_s1 + $0xa] sm:$0x3] (!%p168_p2)  ;;  %v224_v6 = vld [vmem:[%s2730_s1] sm:$0x3] (!%p168_p2)  ;;  %vm1385_vm4 = vcmask (!%p168_p2), 1046528  }
   0x8   : > { %1886 = vmatprep.mubr.msk.bf16.mxu1 (!%p168_p2), %vm2292_vm1, %v2291_v2  ;;  %1974 = vmatprep.mubr.msk.bf16.mxu0 (!%p168_p2), %vm2292_vm1, %v2291_v2  ;;  %v921_v9 = vsel (!%p168_p2), %vm276_vm0, %v1780_v5, 0  ;;  %v391_v10 = vsel (!%p168_p2), %vm276_vm0, %v224_v6, 0  ;;  %v1786_v23 = vld [vmem:[%s2730_s1 + $0xc] sm:$0x3] (!%p168_p2)  ;;  %vm467_vm3 = vsmask.f32 (!%p168_p2), 7424 }
   0x9   : > { %1994 = vmatprep.subr.bf16.mxu0 (!%p168_p2), %v2291_v2  ;;  %1906 = vmatprep.subr.bf16.mxu1 (!%p168_p2), %v2291_v2  ;;  %v1093_v30 = vsel (!%p168_p2), %vm276_vm0, %v1786_v23, 0  ;;  %p205_p4 = scmp.lt.s32.totalorder (!%p168_p2), %s2325_s16, 1  ;;  %vm1606_vm5 = vcmask (!%p168_p2), 1040384  }
   0xd   : > { %s2735_s21 = smov (!%p199_p3, %s1700_s21), 7  ;;  %s2737_s16 = smov (!%p205_p4, %s2325_s16), 1 }
   0xe   : > { %s2233_s22 = smul.u32 44, %s2735_s21  ;;  %s1703_s12 = sshll.u32 %s2737_s16, 1 }
   0xf   : > { %s213_s17 = scalar_lea.vmem %s2733_s4, %s1703_s12 }
  0x10   : > { %s2355_s27 = scalar_lea.vmem %s2729_s0, %s2233_s22 }
  0x11   : > { %v2248_v7 = vld [vmem:[%s2355_s27 + $0x2c] sm:$0xff]   ;;  %v2249_v8 = vld [vmem:[%s2355_s27 + $0x84] sm:$0xff]   ;;  %v2250_v11 = vld [vmem:[%s2355_s27 + $0x34] sm:$0xff]  }
  0x12   : > { %1887 = vmatmul.mubr.msk.bf16.vlgmr.msra.gmra.mrb[0].mxu1 %vm260_vm2, %v2248_v7  ;;  %1975 = vmatmul.mubr.msk.bf16.vlgmr.msra.gmra.mrb[0].mxu0 %vm260_vm2, %v2249_v8  ;;  %v2251_v12 = vld [vmem:[%s2355_s27 + $0x8c] sm:$0xff]   ;;  %v2375_v13 = vld [vmem:[%s2355_s27 + $0x58] sm:$0xff]   ;;  %v2382_v14 = vld [vmem:[%s2355_s27 + $0x60] sm:$0xff]  }
  0x13   : > { %1890 = vmatprep.mubr.msk.bf16.mxu1 %vm2292_vm1, %v2291_v2  ;;  %1995 = vmatpush3.bf16.msra.mxu0 %v921_v9  ;;  %v873_v15 = vshll.u32 %v2375_v13, 16  ;;  %v2252_v16 = vld [vmem:[%s2355_s27 + $0x3c] sm:$0xff]   ;;  %v2253_v17 = vld [vmem:[%s2355_s27 + $0x94] sm:$0xff]   ;;  %v871_v18 = vshrl.u32 %v2375_v13, 16  ;;  %v877_v19 = vshll.u32 %v2382_v14, 16  ;;  %v2392_v21 = vld [vmem:[%s2355_s27 + $0x68] sm:$0xff]  }
  0x14   : > { %1978 = vmatprep.mubr.msk.bf16.mxu0 %vm2292_vm1, %v2291_v2  ;;  %1907 = vmatpush3.bf16.msra.mxu1 %v391_v10  ;;  %v884_v25 = vshll.u32 %v2392_v21, 16  ;;  %v2405_v26 = vld [vmem:[%s2355_s27 + $0x70] sm:$0xff]   ;;  %v2269_v27 = vld [vmem:[%s2355_s27 + $0x1c] sm:$0xff]   ;;  %v2254_v28 = vld [vmem:[%s2355_s27 + $0x44] sm:$0xff]   ;;  %v881_v31 = vshrl.u32 %v2382_v14, 16  ;;  %v888_v32 = vshrl.u32 %v2392_v21, 16 }
  0x15   : > { %2016 = vmatprep.subr.bf16.mxu0 %v2291_v2  ;;  %1928 = vmatprep.subr.bf16.mxu1 %v2291_v2  ;;  %v875_v20 = vrot.slane %v873_v15, 1  ;;  %v879_v22 = vrot.slane %v877_v19, 1  ;;  %v2410_v29 = vld [vmem:[%s2355_s27 + $0x10] sm:$0xff]   ;;  %v1062_v33 = vshll.u32 %v2269_v27, 16  ;;  %v891_v36 = vshll.u32 %v2405_v26, 16  ;;  %v2419_v38 = vld [vmem:[%s2355_s27 + $0x18] sm:$0xff]  }
  0x16   : > { %v886_v35 = vrot.slane %v884_v25, 1  ;;  %v481_v37 = vshll.u32 %v2410_v29, 16  ;;  %v2424_v40 = vld [vmem:[%s2355_s27 + $0x24] ss:$0 sps:$4 sm:$0xff]   ;;  %v1066_v41 = vshrl.u32 %v2269_v27, 16  ;;  %v2271_v42 = vld [vmem:[%s2355_s27 + $0x30] sm:$0xff]  }
  0x17   : > { %v876_v24 = vor.u32 %v875_v20, %v871_v18  ;;  %v2421_v39 = vrot.slane %v1062_v33, 1  ;;  %v2429_v43 = vld [vmem:[%s2355_s27 + $0x20] ss:$0 sps:$4 sm:$0xff]   ;;  %v485_v44 = vshrl.u32 %v2410_v29, 16  ;;  %v2272_v45 = vld [vmem:[%s2355_s27 + $0x38] sm:$0xff]   ;;  %v1070_v48 = vshll.u32 %v2424_v40, 16 }
  0x18   : > { %v2436_v46 = vrot.slane %v481_v37, 1  ;;  %v2257_v49 = vld [vmem:[%s2355_s27 + $0x4c] ss:$0 sps:$4 sm:$0xff]   ;;  %v883_v50 = vor.u32 %v881_v31, %v879_v22  ;;  %v488_v51 = vshll.u32 %v2419_v38, 16  ;;  %v2273_v52 = vld [vmem:[%s2355_s27 + $0x40] sm:$0xff]   ;;  %v492_v57 = vshrl.u32 %v2419_v38, 16 }
  0x19   : > { %v880_v34 = vsel %vm467_vm3, %v876_v24, %v879_v22  ;;  %v1068_v47 = vor.u32 %v1066_v41, %v2421_v39  ;;  %v2446_v53 = vrot.slane %v1070_v48, 1  ;;  %v2274_v55 = vld [vmem:[%s2355_s27 + $0x48] sm:$0xff]   ;;  %v495_v58 = vshll.u32 %v2429_v43, 16  ;;  %v2457_v63 = vld [vmem:[%s2355_s27 + $0x50] ss:$0 sps:$4 sm:$0xff]  }
  0x1a   : > { %1891 = vmatmul.mubr.msk.bf16.gmra.mrb[4].mxu1 %vm260_vm2, %v2250_v11  ;;  %1979 = vmatmul.mubr.msk.bf16.gmra.mrb[4].mxu0 %vm260_vm2, %v2251_v12  ;;  %v487_v54 = vor.u32 %v485_v44, %v2436_v46  ;;  %v490_v56 = vrot.slane %v488_v51, 1  ;;  %v1211_v59 = vshrl.u32 %v2271_v42, 16  ;;  %v1213_v61 = vshll.u32 %v2271_v42, 16  ;;  %v2467_v10 = vld [vmem:[%s2355_s27 + $0x78] ss:$0 sps:$4 sm:$0xff]   ;;  %v1503_v51 = vld [vmem:[%s2731_s2] sm:$0xff] }
  0x1b   : > { %1894 = vmatprep.mubr.msk.bf16.mxu1 %vm2292_vm1, %v2291_v2  ;;  %1982 = vmatprep.mubr.msk.bf16.mxu0 %vm2292_vm1, %v2291_v2  ;;  %v2454_v60 = vsel %vm467_vm3, %v1068_v47, %v2446_v53  ;;  %v1218_v62 = vshll.u32 %v2272_v45, 16  ;;  %v887_v0 = vsel %vm467_vm3, %v883_v50, %v886_v35  ;;  %v2463_v5 = vrot.slane %v495_v58, 1  ;;  %v1734_v31 = vld [vmem:[%s2730_s1 + $0x4] sm:$0x3]  ;;  %v2513_v47 = vld [vmem:[%s2355_s27 + $0x8] sm:$0xff]  }
  0x1c   : > { %v2461_v1 = vsel %vm467_vm3, %v487_v54, %v490_v56  ;;  %v494_v4 = vor.u32 %v492_v57, %v490_v56  ;;  %v1215_v6 = vrot.slane %v1213_v61, 1  ;;  %v1222_v8 = vshrl.u32 %v2272_v45, 16  ;;  %v2266_v54 = vld [vmem:[%s2355_s27 + $0xc] sm:$0xff]  }
  0x1d   : > { %v1220_v7 = vrot.slane %v1218_v62, 1  ;;  %v1226_v9 = vshll.u32 %v2273_v52, 16  ;;  %v1230_v12 = vshrl.u32 %v2273_v52, 16  ;;  %v1234_v15 = vshll.u32 %v2274_v55, 16  ;;  %v1505_v52 = vld [vmem:[%s2731_s2 + $0x10] sm:$0xff]  ;;  %v1504_v57 = vld [vmem:[%s2731_s2 + $0x8] sm:$0xff] }
  0x1e   : > { %v2471_v11 = vsel %vm467_vm3, %v494_v4, %v2463_v5  ;;  %v1238_v19 = vshrl.u32 %v2274_v55, 16  ;;  %v890_v20 = vor.u32 %v888_v32, %v886_v35  ;;  %v893_v22 = vrot.slane %v891_v36, 1  ;;  %v1507_v4 = vld [vmem:[%s2731_s2 + $0x20] sm:$0xff] }
  0x1f   : > { %v1228_v18 = vrot.slane %v1226_v9, 1  ;;  %v1236_v23 = vrot.slane %v1234_v15, 1  ;;  %v1242_v24 = vshll.u32 %v2457_v63, 16  ;;  %v895_v36 = vshrl.u32 %v2405_v26, 16  ;;  %v1806_v9 = vld [vmem:[%s2730_s1 + $0xe] sm:$0x3] }
  0x20   : > { %v894_v35 = vsel %vm467_vm3, %v890_v20, %v893_v22  ;;  %v898_v37 = vshll.u32 %v2467_v10, 16  ;;  %v518_v42 = vsel %vm276_vm0, %v1734_v31, 0  ;;  %v902_v50 = vshrl.u32 %v2467_v10, 16  ;;  %v1510_v15 = vld [vmem:[%s2731_s2 + $0x38] sm:$0xff]  ;;  %v1511_v20 = vld [vmem:[%s2731_s2 + $0x40] sm:$0x7f] }
  0x21   : > { %v1240_v33 = vor.u32 %v1238_v19, %v1236_v23  ;;  %v2491_v32 = vrot.slane %v1242_v24, 1  ;;  %v897_v44 = vor.u32 %v895_v36, %v893_v22  ;;  %v2293_v56 = vmov 0  }
  0x22   : > { %1895 = vmatmul.mubr.msk.bf16.gmra.mrb[8].mxu1 %vm260_vm2, %v2252_v16  ;;  %1983 = vmatmul.mubr.msk.bf16.gmra.mrb[8].mxu0 %vm260_vm2, %v2253_v17  ;;  %v1216_v16 = vor.u32 %v1215_v6, %v1211_v59  ;;  %v1224_v17 = vor.u32 %v1222_v8, %v1220_v7  ;;  %v900_v45 = vrot.slane %v898_v37, 1  ;;  %v1506_v59 = vld [vmem:[%s2731_s2 + $0x18] sm:$0xff]  ;;  %v1508_v6 = vld [vmem:[%s2731_s2 + $0x28] sm:$0xff]  ;;  %v1265_v19 = vsel %vm276_vm0, %v1806_v9, 0 }
  0x23   : > { %1898 = vmatprep.mubr.msk.bf16.mxu1 %vm2292_vm1, %v2291_v2  ;;  %1996 = vmatprep.mubr.msk.bf16.mxu0 %vm2292_vm1, %v2291_v2  ;;  %v2501_v41 = vsel %vm467_vm3, %v1240_v33, %v2491_v32 }
  0x24   : > { %v2480_v25 = vsel %vm467_vm3, %v1216_v16, %v1220_v7  ;;  %v2483_v27 = vsel %vm467_vm3, %v1224_v17, %v1228_v18  ;;  %v901_v48 = vsel %vm467_vm3, %v897_v44, %v900_v45  ;;  %2246 = vset.pattern.permute.xlu0 %v2293_v56  ;;  %2247 = vset.pattern.permute.xlu1 %v2293_v56  ;;  %v1050_v17 = vshrl.u32 %v2266_v54, 16 }
  0x25   : > { %1514 = vperm.xlu0 %2246, %v1503_v51   ;;  %1524 = vperm.xlu1 %2247, %v1505_v52   ;;  %v904_v58 = vor.u32 %v902_v50, %v900_v45  ;;  %v478_v45 = vshrl.u32 %v2513_v47, 16  ;;  %v2281_v52 = vld [vmem:[%s2355_s27 + $0xa4] ss:$0 sps:$4 sm:$0xff]  }
  0x29   : > { %1519 = vperm.xlu0 %2246, %v1504_v57   ;;  %1529 = vperm.xlu1 %2247, %v1506_v59  }
  0x2a   : > { %1899 = vmatmul.mubr.msk.bf16.gmra.mrb[12].mxu1 %vm260_vm2, %v2254_v28  ;;  %1997 = vmatmul.mubr.msk.bf16.vlgmr.msra.gmra.mrb[0].mxu0 %vm260_vm2, %v880_v34  ;;  %v1232_v28 = vor.u32 %v1230_v12, %v1228_v18  ;;  %v1509_v12 = vld [vmem:[%s2731_s2 + $0x30] sm:$0xff] }
  0x2b   : > { %1902 = vmatprep.mubr.msk.bf16.mxu1 %vm2292_vm1, %v2291_v2  ;;  %2017 = vmatpush3.bf16.msra.mxu0 %v1093_v30  ;;  %v2486_v30 = vld [vmem:[%s2355_s27] sm:$0xff]  }
  0x2c   : > { %2000 = vmatprep.mubr.msk.bf16.mxu0 %vm2292_vm1, %v2291_v2  ;;  %2038 = vmatprep.subr.bf16.mxu0 %v2291_v2  ;;  %v2494_v34 = vsel %vm467_vm3, %v1232_v28, %v1236_v23  ;;  %v470_v22 = vshll.u32 %v2486_v30, 16  ;;  %v468_v28 = vshrl.u32 %v2486_v30, 16 }
  0x2d   : > { %1534 = vperm.xlu0 %2246, %v1507_v4   ;;  %1539 = vperm.xlu1 %2247, %v1508_v6  }
  0x2e   : > { %v472_v31 = vrot.slane %v470_v22, 1 }
  0x30   : > { %v473_v37 = vor.u32 %v472_v31, %v468_v28 }
  0x31   : > { %1544 = vperm.xlu0 %2246, %v1509_v12   ;;  %1549 = vperm.xlu1 %2247, %v1510_v15  }
  0x32   : > { %1903 = vmatmul.mubr.msk.bf16.gmra.mrb[16].mxu1 %vm260_vm2, %v2257_v49  ;;  %2001 = vmatmul.mubr.msk.bf16.gmra.mrb[4].mxu0 %vm260_vm2, %v887_v0  ;;  %v2265_v49 = vld [vmem:[%s2355_s27 + $0x4] sm:$0xff]   ;;  %v1046_v0 = vshll.u32 %v2266_v54, 16 }
  0x33   : > { %1908 = vmatprep.mubr.msk.bf16.mxu1 %vm2292_vm1, %v2291_v2  ;;  %2004 = vmatprep.mubr.msk.bf16.mxu0 %vm2292_vm1, %v2291_v2  ;;  %v1041_v55 = vshll.u32 %v2265_v49, 16  ;;  %v1039_v61 = vshrl.u32 %v2265_v49, 16 }
  0x34   : > { %v1048_v8 = vrot.slane %v1046_v0, 1 }
  0x35   : > { %v1043_v62 = vrot.slane %v1041_v55, 1  ;;  %1554 = vperm.xlu0 %2246, %v1511_v20  }
  0x36   : > { %v1052_v23 = vor.u32 %v1050_v17, %v1048_v8 }
  0x37   : > { %v1044_v7 = vor.u32 %v1043_v62, %v1039_v61 }
  0x39   : > { %v1049_v16 = vsel %vm467_vm3, %v1044_v7, %v1048_v8 }
  0x3a   : > { %1909 = vmatmul.mubr.msk.bf16.vlgmr.msra.gmra.mrb[0].mxu1 %vm260_vm2, %v2486_v30  ;;  %2005 = vmatmul.mubr.msk.bf16.gmra.mrb[8].mxu0 %vm260_vm2, %v894_v35  ;;  %v1749_v30 = vld [vmem:[%s2730_s1 + $0x6] sm:$0x3] }
  0x3b   : > { %1912 = vmatprep.mubr.msk.bf16.mxu1 %vm2292_vm1, %v2291_v2  ;;  %2008 = vmatprep.mubr.msk.bf16.mxu0 %vm2292_vm1, %v2291_v2  ;;  %v652_v49 = vsel %vm276_vm0, %v1749_v30, 0 }
  0x3c   : > { %1929 = vmatpush3.bf16.msra.mxu1 %v518_v42 }
  0x3d   : > { %1950 = vmatprep.subr.bf16.mxu1 %v2291_v2 }
  0x42   : > { %1913 = vmatmul.mubr.msk.bf16.gmra.mrb[4].mxu1 %vm260_vm2, %v2513_v47  ;;  %2009 = vmatmul.mubr.msk.bf16.gmra.mrb[12].mxu0 %vm260_vm2, %v901_v48 }
  0x43   : > { %1916 = vmatprep.mubr.msk.bf16.mxu1 %vm2292_vm1, %v2291_v2  ;;  %2012 = vmatprep.mubr.msk.bf16.mxu0 %vm2292_vm1, %v2291_v2 }
  0x4a   : > { %1917 = vmatmul.mubr.msk.bf16.gmra.mrb[8].mxu1 %vm260_vm2, %v2410_v29  ;;  %2013 = vmatmul.mubr.msk.bf16.gmra.mrb[16].mxu0 %vm260_vm2, %v904_v58  ;;  %v2268_v29 = vld [vmem:[%s2355_s27 + $0x14] sm:$0xff]  }
  0x4b   : > { %1920 = vmatprep.mubr.msk.bf16.mxu1 %vm2292_vm1, %v2291_v2  ;;  %2018 = vmatprep.mubr.msk.bf16.mxu0 %vm2292_vm1, %v2291_v2  ;;  %v1054_v18 = vshll.u32 %v2268_v29, 16  ;;  %v1058_v35 = vshrl.u32 %v2268_v29, 16 }
  0x4d   : > { %v1056_v24 = vrot.slane %v1054_v18, 1 }
  0x4f   : > { %v1057_v33 = vsel %vm467_vm3, %v1052_v23, %v1056_v24  ;;  %v1060_v42 = vor.u32 %v1058_v35, %v1056_v24 }
  0x51   : > { %v1065_v48 = vsel %vm467_vm3, %v1060_v42, %v2421_v39  ;;  %v1074_v39 = vshrl.u32 %v2424_v40, 16  ;;  %v1817_v40 = vld [vmem:[%s2730_s1 + $0x10] sm:$0x3] }
  0x52   : > { %1921 = vmatmul.mubr.msk.bf16.gmra.mrb[12].mxu1 %vm260_vm2, %v2419_v38  ;;  %2019 = vmatmul.mubr.msk.bf16.vlgmr.msra.gmra.mrb[0].mxu0 %vm260_vm2, %v1049_v16  ;;  %v474_v38 = vshll.u32 %v2513_v47, 16 }
  0x53   : > { %1924 = vmatprep.mubr.msk.bf16.mxu1 %vm2292_vm1, %v2291_v2  ;;  %2039 = vmatpush3.bf16.msra.mxu0 %v1265_v19  ;;  %v1076_v51 = vor.u32 %v1074_v39, %v2446_v53  ;;  %v499_v53 = vshrl.u32 %v2429_v43, 16 }
  0x54   : > { %2022 = vmatprep.mubr.msk.bf16.mxu0 %vm2292_vm1, %v2291_v2  ;;  %2060 = vmatprep.subr.bf16.mxu0 %v2291_v2  ;;  %v476_v36 = vrot.slane %v474_v38, 1 }
  0x56   : > { %v477_v44 = vsel %vm467_vm3, %v473_v37, %v476_v36  ;;  %v480_v50 = vor.u32 %v478_v45, %v476_v36 }
  0x58   : > { %v484_v47 = vsel %vm467_vm3, %v480_v50, %v2436_v46  ;;  %v1411_v46 = vsel %vm276_vm0, %v1817_v40, 0 }
  0x5a   : > { %1925 = vmatmul.mubr.msk.bf16.gmra.mrb[16].mxu1 %vm260_vm2, %v2429_v43  ;;  %2023 = vmatmul.mubr.msk.bf16.gmra.mrb[4].mxu0 %vm260_vm2, %v1057_v33 }
  0x5b   : > { %1930 = vmatprep.mubr.msk.bf16.mxu1 %vm2292_vm1, %v2291_v2  ;;  %2026 = vmatprep.mubr.msk.bf16.mxu0 %vm2292_vm1, %v2291_v2 }
  0x62   : > { %1931 = vmatmul.mubr.msk.bf16.vlgmr.msra.gmra.mrb[0].mxu1 %vm260_vm2, %v477_v44  ;;  %2027 = vmatmul.mubr.msk.bf16.gmra.mrb[8].mxu0 %vm260_vm2, %v1065_v48 }
  0x63   : > { %1934 = vmatprep.mubr.msk.bf16.mxu1 %vm2292_vm1, %v2291_v2  ;;  %2030 = vmatprep.mubr.msk.bf16.mxu0 %vm2292_vm1, %v2291_v2 }
  0x64   : > { %1951 = vmatpush3.bf16.msra.mxu1 %v652_v49 }
  0x65   : > { %2082 = vmatprep.subr.bf16.mxu1 %v2291_v2 }
  0x6a   : > { %1935 = vmatmul.mubr.msk.bf16.gmra.mrb[4].mxu1 %vm260_vm2, %v484_v47  ;;  %2031 = vmatmul.mubr.msk.bf16.gmra.mrb[12].mxu0 %vm260_vm2, %v2454_v60  ;;  %v501_v60 = vor.u32 %v499_v53, %v2463_v5  ;;  %v2277_v5 = vld [vmem:[%s2355_s27 + $0xc] sm:$0xff]  }
  0x6b   : > { %1938 = vmatprep.mubr.msk.bf16.mxu1 %vm2292_vm1, %v2291_v2  ;;  %2034 = vmatprep.mubr.msk.bf16.mxu0 %vm2292_vm1, %v2291_v2 }
  0x72   : > { %1939 = vmatmul.mubr.msk.bf16.gmra.mrb[8].mxu1 %vm260_vm2, %v2461_v1  ;;  %2035 = vmatmul.mubr.msk.bf16.gmra.mrb[16].mxu0 %vm260_vm2, %v1076_v51  ;;  %v2276_v1 = vld [vmem:[%s2355_s27 + $0x4] sm:$0xfe]  }
  0x73   : > { %1942 = vmatprep.mubr.msk.bf16.mxu1 %vm2292_vm1, %v2291_v2  ;;  %2040 = vmatprep.mubr.msk.bf16.mxu0 %vm2292_vm1, %v2291_v2 }
  0x7a   : > { %1943 = vmatmul.mubr.msk.bf16.gmra.mrb[12].mxu1 %vm260_vm2, %v2471_v11  ;;  %2041 = vmatmul.mubr.msk.bf16.vlgmr.msra.gmra.mrb[0].mxu0 %vm260_vm2, %v2480_v25  ;;  %v2278_v11 = vld [vmem:[%s2355_s27 + $0x14] sm:$0xff]  }
  0x7b   : > { %1946 = vmatprep.mubr.msk.bf16.mxu1 %vm2292_vm1, %v2291_v2  ;;  %2061 = vmatpush3.bf16.msra.mxu0 %v1411_v46 }
  0x7c   : > { %2044 = vmatprep.mubr.msk.bf16.mxu0 %vm2292_vm1, %v2291_v2 }
  0x82   : > { %1947 = vmatmul.mubr.msk.bf16.gmra.mrb[16].mxu1 %vm260_vm2, %v501_v60  ;;  %2045 = vmatmul.mubr.msk.bf16.gmra.mrb[4].mxu0 %vm260_vm2, %v2483_v27  ;;  %v2280_v27 = vld [vmem:[%s2355_s27 + $0x1c] sm:$0xff]  }
  0x83   : > { %1952 = vmatprep.mubr.msk.bf16.mxu1 %vm2292_vm1, %v2291_v2  ;;  %2048 = vmatprep.mubr.msk.bf16.mxu0 %vm2292_vm1, %v2291_v2 }
  0x8a   : > { %1953 = vmatmul.mubr.msk.bf16.vlgmr.msra.gmra.mrb[0].mxu1 %vm260_vm2, %v2375_v13  ;;  %2049 = vmatmul.mubr.msk.bf16.gmra.mrb[8].mxu0 %vm260_vm2, %v2494_v34  ;;  %v1246_v13 = vshrl.u32 %v2457_v63, 16 }
  0x8b   : > { %1956 = vmatprep.mubr.msk.bf16.mxu1 %vm2292_vm1, %v2291_v2  ;;  %2052 = vmatprep.mubr.msk.bf16.mxu0 %vm2292_vm1, %v2291_v2 }
  0x8c   : > { %2083 = vmatpush3.bf16.msra.mxu1 %v2338_v3  ;;  %v1248_v43 = vor.u32 %v1246_v13, %v2491_v32  ;;  %v1386_v3 = vrot.slane %v2276_v1, 1  ;;  %v2279_v32 = vld [vmem:[%s2355_s27 + $0x9c] sm:$0xff]  }
  0x92   : > { %1957 = vmatmul.mubr.msk.bf16.gmra.mrb[4].mxu1 %vm260_vm2, %v2382_v14  ;;  %2053 = vmatmul.mubr.msk.bf16.gmra.mrb[12].mxu0 %vm260_vm2, %v2501_v41  ;;  %v1387_v14 = vrot.slane %v2277_v5, 1  ;;  %v2282_v41 = vld [vmem:[%s2355_s27 + $0x24] sm:$0x1f]   ;;  %s2234_s27 = smul.u32 72, %s2737_s16 }
  0x93   : > { %1960 = vmatprep.mubr.msk.bf16.mxu1 %vm2292_vm1, %v2291_v2  ;;  %2056 = vmatprep.mubr.msk.bf16.mxu0 %vm2292_vm1, %v2291_v2 }
  0x94   : > { %v1388_v63 = vsel %vm1385_vm4, %v1386_v3, %v1387_v14  ;;  %s2709_s11 = scalar_lea.vmem %s2732_s3, %s2234_s27 }
  0x9a   : > { %1961 = vmatmul.mubr.msk.bf16.gmra.mrb[8].mxu1 %vm260_vm2, %v2392_v21  ;;  %2057 = vmatmul.mubr.msk.bf16.gmra.mrb[16].mxu0 %vm260_vm2, %v1248_v43  ;;  %v1389_v21 = vrot.slane %v2278_v11, 1 }
  0x9b   : > { %1964 = vmatprep.mubr.msk.bf16.mxu1 %vm2292_vm1, %v2291_v2  ;;  %2062 = vmatprep.mubr.msk.bf16.mxu0 %vm2292_vm1, %v2291_v2 }
  0x9c   : > { %v1390_v25 = vsel %vm1385_vm4, %v1387_v14, %v1389_v21 }
  0xa2   : > { %1965 = vmatmul.mubr.msk.bf16.gmra.mrb[12].mxu1 %vm260_vm2, %v2405_v26  ;;  %2063 = vmatmul.mubr.msk.bf16.vlgmr.msra.gmra.mrb[0].mxu0 %vm260_vm2, %v1388_v63  ;;  %v1391_v26 = vrot.slane %v2280_v27, 1 }
  0xa3   : > { %1968 = vmatprep.mubr.msk.bf16.mxu1 %vm2292_vm1, %v2291_v2  ;;  %2066 = vmatprep.mubr.msk.bf16.mxu0 %vm2292_vm1, %v2291_v2 }
  0xa4   : > { %v1392_v34 = vsel %vm1385_vm4, %v1389_v21, %v1391_v26  ;;  %v1515_v29 = vpop.permute.xlu0 %1514  ;;  %v1525_v20 = vpop.permute.xlu1 %1524 }
  0xa8   : > { %v1520_v16 = vpop.permute.xlu0 %1519  ;;  %v1530_v37 = vpop.permute.xlu1 %1529 }
  0xaa   : > { %1969 = vmatmul.mubr.msk.bf16.gmra.mrb[16].mxu1 %vm260_vm2, %v2467_v10  ;;  %2067 = vmatmul.mubr.msk.bf16.gmra.mrb[4].mxu0 %vm260_vm2, %v1390_v25  ;;  %v1393_v10 = vrot.slane %v2282_v41, 1 }
  0xab   : > { %1986 = vmatprep.mubr.msk.bf16.mxu1 %vm2292_vm1, %v2291_v2  ;;  %2070 = vmatprep.mubr.msk.bf16.mxu0 %vm2292_vm1, %v2291_v2 }
  0xac   : > { %v1394_v54 = vsel %vm1385_vm4, %v1391_v26, %v1393_v10  ;;  %v1535_v50 = vpop.permute.xlu0 %1534  ;;  %v1540_v21 = vpop.permute.xlu1 %1539 }
  0xb2   : > { %1987 = vmatmul.mubr.msk.bf16.vlgmr.msra.gmra.mrb[12].mxu1 %vm260_vm2, %v2279_v32  ;;  %2071 = vmatmul.mubr.msk.bf16.gmra.mrb[8].mxu0 %vm260_vm2, %v1392_v34  ;;  %v1545_v32 = vpop.permute.xlu0 %1544 }
  0xb3   : > { %1990 = vmatprep.mubr.msk.bf16.mxu1 %vm2292_vm1, %v2291_v2  ;;  %2074 = vmatprep.mubr.msk.bf16.mxu0 %vm2292_vm1, %v2291_v2 }
  0xba   : > { %1991 = vmatmul.mubr.msk.bf16.gmra.mrb[16].mxu1 %vm260_vm2, %v2281_v52  ;;  %2075 = vmatmul.mubr.msk.bf16.gmra.mrb[12].mxu0 %vm260_vm2, %v1394_v54 }
  0xbb   : > { %2078 = vmatprep.mubr.msk.bf16.mxu0 %vm2292_vm1, %v2291_v2 }
  0xc2   : > { %2079 = vmatmul.mubr.msk.bf16.gmra.mrb[16].mxu0 %vm260_vm2, %v1393_v10 }
 0x15d   : > { %v688_v55 = vpop.f32.mrb[0].mxu1 }
 0x15e   : > { %v1954_v56 = vpop.f32.mrb[1].mxu1 }
 0x15f   : > { %v691_v57 = vpop.f32.mrb[2].mxu1 }
 0x160   : > { %v1955_v58 = vpop.f32.mrb[3].mxu1 }
 0x165   : > { %v696_v59 = vpop.f32.mrb[4].mxu1 }
 0x166   : > { %v1958_v61 = vpop.f32.mrb[5].mxu1 }
 0x167   : > { %v699_v62 = vpop.f32.mrb[6].mxu1 }
 0x168   : > { %v1959_v0 = vpop.f32.mrb[7].mxu1 }
 0x16d   : > { %v704_v4 = vpop.f32.mrb[8].mxu1 }
 0x16e   : > { %v1962_v6 = vpop.f32.mrb[9].mxu1 }
 0x16f   : > { %v707_v7 = vpop.f32.mrb[10].mxu1 }
 0x170   : > { %v1963_v8 = vpop.f32.mrb[11].mxu1 }
 0x175   : > { %v1447_v2 = vpop.f32.mrb[0].mxu0 }
 0x176   : > { %v2084_v9 = vadd.f32 %v1447_v2, %v688_v55  ;;  %v2064_v12 = vpop.f32.mrb[1].mxu0 }
 0x177   : > { %v1450_v15 = vpop.f32.mrb[2].mxu0 }
 0x178   : > { %1494 = vst [vmem:[%s2709_s11] sm:$0xff] %v2084_v9  ;;  %v2085_v17 = vadd.f32 %v1450_v15, %v691_v57  ;;  %v2065_v18 = vpop.f32.mrb[3].mxu0  ;;  %v1557_v19 = vmul.f32 %v2084_v9, %v1515_v29 }
 0x17a   : > { %1495 = vst [vmem:[%s2709_s11 + $0x8] sm:$0xff] %v2085_v17  ;;  %v1558_v22 = vmul.f32 %v2085_v17, %v1520_v16  ;;  %v1582_v24 = vmul.f32 %v2084_v9, %v1557_v19 }
 0x17c   : > { %v1566_v23 = vadd.f32 %v1558_v22, %v1557_v19  ;;  %v1583_v38 = vmul.f32 %v2085_v17, %v1558_v22 }
 0x17d   : > { %v1455_v28 = vpop.f32.mrb[4].mxu0 }
 0x17e   : > { %v1591_v31 = vadd.f32 %v1583_v38, %v1582_v24  ;;  %v2086_v33 = vadd.f32 %v1455_v28, %v696_v59  ;;  %v2068_v35 = vpop.f32.mrb[5].mxu0 }
 0x17f   : > { %v1458_v36 = vpop.f32.mrb[6].mxu0 }
 0x180   : > { %1496 = vst [vmem:[%s2709_s11 + $0x10] sm:$0xff] %v2086_v33  ;;  %v1559_v42 = vmul.f32 %v2086_v33, %v1525_v20  ;;  %v2087_v30 = vadd.f32 %v1458_v36, %v699_v62  ;;  %v2069_v44 = vpop.f32.mrb[7].mxu0  ;;  %v1555_v20 = vpop.permute.xlu0 %1554 }
 0x182   : > { %v1584_v45 = vmul.f32 %v2086_v33, %v1559_v42  ;;  %1497 = vst [vmem:[%s2709_s11 + $0x18] sm:$0xff] %v2087_v30  ;;  %v1560_v48 = vmul.f32 %v2087_v30, %v1530_v37  ;;  %v1567_v49 = vadd.f32 %v1566_v23, %v1559_v42 }
 0x184   : > { %v1568_v47 = vadd.f32 %v1567_v49, %v1560_v48  ;;  %v1585_v39 = vmul.f32 %v2087_v30, %v1560_v48  ;;  %v1592_v51 = vadd.f32 %v1591_v31, %v1584_v45 }
 0x185   : > { %v846_v40 = vpop.f32.mrb[12].mxu1  ;;  %v1463_v46 = vpop.f32.mrb[8].mxu0 }
 0x186   : > { %v1988_v53 = vpop.f32.mrb[13].mxu1  ;;  %v1593_v60 = vadd.f32 %v1592_v51, %v1585_v39  ;;  %v2088_v13 = vadd.f32 %v1463_v46, %v704_v4  ;;  %v2072_v43 = vpop.f32.mrb[9].mxu0 }
 0x187   : > { %v849_v1 = vpop.f32.mrb[14].mxu1  ;;  %v1466_v5 = vpop.f32.mrb[10].mxu0 }
 0x188   : > { %v1989_v3 = vpop.f32.mrb[15].mxu1  ;;  %1498 = vst [vmem:[%s2709_s11 + $0x20] sm:$0xff] %v2088_v13  ;;  %v1561_v14 = vmul.f32 %v2088_v13, %v1535_v50  ;;  %v2089_v63 = vadd.f32 %v1466_v5, %v707_v7  ;;  %v2073_v11 = vpop.f32.mrb[11].mxu0 }
 0x189   : > { %v1550_v7 = vpop.permute.xlu1 %1549 }
 0x18a   : > { %v1569_v25 = vadd.f32 %v1568_v47, %v1561_v14  ;;  %v1586_v27 = vmul.f32 %v2088_v13, %v1561_v14  ;;  %1499 = vst [vmem:[%s2709_s11 + $0x28] sm:$0xff] %v2089_v63  ;;  %v1562_v26 = vmul.f32 %v2089_v63, %v1540_v21 }
 0x18c   : > { %v1594_v34 = vadd.f32 %v1593_v60, %v1586_v27  ;;  %v1570_v41 = vadd.f32 %v1569_v25, %v1562_v26  ;;  %v1587_v10 = vmul.f32 %v2089_v63, %v1562_v26 }
 0x18d   : > { %v854_v52 = vpop.f32.mrb[16].mxu1  ;;  %v1471_v54 = vpop.f32.mrb[12].mxu0 }
 0x18e   : > { %v1992_v55 = vpop.f32.mrb[17].mxu1  ;;  %v1595_v56 = vadd.f32 %v1594_v34, %v1587_v10  ;;  %v2090_v57 = vadd.f32 %v1471_v54, %v846_v40  ;;  %v2076_v58 = vpop.f32.mrb[13].mxu0 }
 0x18f   : > { %v857_v59 = vpop.f32.mrb[18].mxu1  ;;  %v1474_v61 = vpop.f32.mrb[14].mxu0 }
 0x190   : > { %v1993_v62 = vpop.f32.mrb[19].mxu1  ;;  %1500 = vst [vmem:[%s2709_s11 + $0x30] sm:$0xff] %v2090_v57  ;;  %v1563_v0 = vmul.f32 %v2090_v57, %v1545_v32  ;;  %v2091_v4 = vadd.f32 %v1474_v61, %v849_v1  ;;  %v2077_v6 = vpop.f32.mrb[15].mxu0 }
 0x192   : > { %v1571_v8 = vadd.f32 %v1570_v41, %v1563_v0  ;;  %v1588_v29 = vmul.f32 %v2090_v57, %v1563_v0  ;;  %1501 = vst [vmem:[%s2709_s11 + $0x38] sm:$0xff] %v2091_v4  ;;  %v1564_v2 = vmul.f32 %v2091_v4, %v1550_v7 }
 0x194   : > { %v1596_v9 = vadd.f32 %v1595_v56, %v1588_v29  ;;  %v1572_v12 = vadd.f32 %v1571_v8, %v1564_v2  ;;  %v1589_v15 = vmul.f32 %v2091_v4, %v1564_v2 }
 0x195   : > { %v1479_v16 = vpop.f32.mrb[16].mxu0 }
 0x196   : > { %v1597_v17 = vadd.f32 %v1596_v9, %v1589_v15  ;;  %v2092_v18 = vadd.f32 %v1479_v16, %v854_v52  ;;  %v2080_v19 = vpop.f32.mrb[17].mxu0 }
 0x197   : > { %v1482_v22 = vpop.f32.mrb[18].mxu0 }
 0x198   : > { %1502 = vst [vmem:[%s2709_s11 + $0x40] sm:$0x7f] %v2092_v18  ;;  %v1565_v23 = vmul.f32 %v2092_v18, %v1555_v20  ;;  %v2081_v24 = vpop.f32.mrb[19].mxu0 }
 0x19a   : > { %v1574_v38 = vsel %vm1385_vm4, %v1565_v23, 0.0  ;;  %v1590_v28 = vmul.f32 %v2092_v18, %v1565_v23 }
 0x19b   : > { %v1575_v31 = vadd.f32 %v1574_v38, %v1572_v12 }
 0x19c   : > { %v1598_v33 = vsel %vm1385_vm4, %v1590_v28, 0.0 }
 0x19d   : > { %v1576_v35 = vrot.slane %v1575_v31, 4  ;;  %v1599_v36 = vadd.f32 %v1598_v33, %v1597_v17 }
 0x19f   : > { %v1577_v37 = vadd.f32 %v1576_v35, %v1575_v31  ;;  %v1600_v42 = vrot.slane %v1599_v36, 4 }
 0x1a1   : > { %v1578_v30 = vrot.slane %v1577_v37, 2  ;;  %v1601_v44 = vadd.f32 %v1600_v42, %v1599_v36 }
 0x1a3   : > { %v1579_v45 = vadd.f32 %v1578_v30, %v1577_v37  ;;  %v1602_v48 = vrot.slane %v1601_v44, 2 }
 0x1a5   : > { %v1580_v49 = vrot.slane %v1579_v45, 1  ;;  %v1603_v50 = vadd.f32 %v1602_v48, %v1601_v44 }
 0x1a7   : > { %v1604_v47 = vrot.slane %v1603_v50, 1  ;;  %v1581_v39 = vadd.f32 %v1580_v49, %v1579_v45 }
 0x1a9   : > { %v1605_v51 = vadd.f32 %v1604_v47, %v1603_v50 }
 0x1ab   : > { %v1607_v40 = vsel %vm1606_vm5, %v1581_v39, %v1605_v51 }
 0x1ac   : > { %1608 = vst [vmem:[%s213_s17] sm:$0x3] %v1607_v40 }
 0x1ad PF: > { %s15_s15 = sadd.s32 1, %s2289_s15  }
 0x1ae   : > { %p12_p5 = scmp.ge.s32.totalorder %s15_s15, 4  }
 0x1b0   :  { %14 = sbr.rel (!%p12_p5) target bundleno = 1 (0x1), region = 85 }

// kernel: encoder_v1.9
= control target key start
LH: loop header
LB: loop body
LE: loop exit
PB: predicated region body
PF: predicated region fallthrough
CT: control target
= control target key end

     0   :  { %s339_s12 = smov 0   ;;  %s362_s0 = inlined_call_operand.vmem [shape: f32[2,19,128], index: 0, kind: input, shape index: {}]   ;;  %s363_s1 = inlined_call_operand.vmem [shape: f32[1,1,128], index: 1, kind: input, shape index: {}]   ;;  %s364_s2 = inlined_call_operand.vmem [shape: f32[1,1,128], index: 2, kind: input, shape index: {}]   ;;  %s365_s3 = inlined_call_operand.vmem [shape: bf16[2,19,128], index: 3, kind: output, shape index: {}]  }
   0x1 LB: > { %s279_s13 = sadd.s32 4294967295, %s317_s12   ;;  %p283_p0 = scmp.ge.s32.totalorder %s317_s12, 1  ;;  %s317_s12 = sphi %s339_s12, %s13_s12  }
   0x2   : > { %p137_p1 = scmp.lt.s32.totalorder %s317_s12, 3 }
   0x4   : > { %p138_p2 = pnand %p283_p0, %p137_p1 }
   0x5   : > { %p161_p3 = scmp.lt.s32.totalorder (!%p138_p2), %s279_s13, 1  ;;  %v286_v0 = vld [vmem:[%s363_s1] ss:$0 sm:$0xff] (!%p138_p2)  ;;  %vm218_vm0 = vcmask (!%p138_p2), 1041408   ;;  %vm219_vm1 = vsmask.f32 (!%p138_p2), 1280 }
   0x6   : > { %141 = sbr.rel (%p138_p2) target bundleno = 30 (0x1e), region = 32  ;;  %v287_v1 = vld [vmem:[%s364_s2] ss:$0 sm:$0xff] (!%p138_p2)  ;;  %vm220_vm5 = vmand (!%p138_p2), %vm218_vm0, %vm219_vm1 }
   0xd   : > { %s367_s13 = smov (!%p161_p3, %s279_s13), 1 }
   0xe   : > { %s301_s14 = smul.u32 24, %s367_s13 }
   0xf   : > { %s302_s22 = smul.u32 12, %s367_s13 }
  0x10   : > { %s165_s19 = scalar_lea.vmem %s362_s0, %s301_s14 }
  0x11   : > { %v171_v2 = vld [vmem:[%s165_s19] sm:$0xff]  ;;  %v172_v3 = vld [vmem:[%s165_s19 + $0x8] sm:$0xff]  ;;  %v173_v4 = vld [vmem:[%s165_s19 + $0x10] sm:$0x7]  ;;  %s170_s25 = scalar_lea.vmem %s365_s3, %s302_s22 }
  0x12   : > { %v181_v5 = vmul.f32 %v286_v0, %v171_v2  ;;  %v182_v6 = vmul.f32 %v286_v0, %v172_v3  ;;  %v183_v7 = vmul.f32 %v286_v0, %v173_v4  ;;  %v221_v18 = vld [vmem:[%s170_s25 + $0x8] sm:$0x3] }
  0x14   : > { %v191_v8 = vadd.f32 %v287_v1, %v181_v5  ;;  %v192_v9 = vadd.f32 %v287_v1, %v182_v6  ;;  %v193_v10 = vadd.f32 %v287_v1, %v183_v7 }
  0x16   : > { %vm194_vm2 = vcmp.ge.f32.partialorder %v191_v8, 0.0  ;;  %vm195_vm3 = vcmp.ge.f32.partialorder %v192_v9, 0.0  ;;  %v197_v11 = vmul.f32 0.01, %v191_v8  ;;  %v198_v12 = vmul.f32 0.01, %v192_v9 }
  0x17   : > { %vm196_vm4 = vcmp.ge.f32.partialorder %v193_v10, 0.0  ;;  %v199_v13 = vmul.f32 0.01, %v193_v10 }
  0x18   : > { %v200_v14 = vsel %vm194_vm2, %v191_v8, %v197_v11  ;;  %v201_v15 = vsel %vm195_vm3, %v192_v9, %v198_v12 }
  0x19   : > { %v299_v16 = vpack.c.bf16 %v201_v15, %v200_v14  ;;  %v202_v17 = vsel %vm196_vm4, %v193_v10, %v199_v13 }
  0x1a   : > { %v295_v19 = vpack.c.bf16 %v202_v17, %v202_v17 }
  0x1b   : > { %300 = vst [vmem:[%s170_s25] sm:$0xff] %v299_v16  }
  0x1c   : > { %v222_v20 = vsel %vm220_vm5, %v295_v19, %v221_v18 }
  0x1d   : > { %223 = vst [vmem:[%s170_s25 + $0x8] sm:$0x3] %v222_v20 }
  0x1e PF: > { %s13_s12 = sadd.s32 1, %s317_s12  }
  0x1f   : > { %p10_p4 = scmp.ge.s32.totalorder %s13_s12, 4  }
  0x21   :  { %12 = sbr.rel (!%p10_p4) target bundleno = 1 (0x1), region = 62 }

// kernel: encoder_v1.11
= control target key start
LH: loop header
LB: loop body
LE: loop exit
PB: predicated region body
PF: predicated region fallthrough
CT: control target
= control target key end

     0   :  { %s293_s12 = smov 0   ;;  %s316_s0 = inlined_call_operand.vmem [shape: f32[2,5,128], index: 0, kind: input, shape index: {}]   ;;  %s317_s1 = inlined_call_operand.vmem [shape: f32[1,1,128], index: 1, kind: input, shape index: {}]   ;;  %s318_s2 = inlined_call_operand.vmem [shape: f32[1,1,128], index: 2, kind: input, shape index: {}]   ;;  %s319_s3 = inlined_call_operand.vmem [shape: bf16[2,5,128], index: 3, kind: output, shape index: {}]  }
   0x1 LB: > { %s246_s13 = sadd.s32 4294967295, %s271_s12   ;;  %p250_p0 = scmp.ge.s32.totalorder %s271_s12, 1  ;;  %s271_s12 = sphi %s293_s12, %s13_s12  }
   0x2   : > { %p136_p1 = scmp.lt.s32.totalorder %s271_s12, 3 }
   0x4   : > { %p137_p2 = pnand %p250_p0, %p136_p1 }
   0x5   : > { %p158_p3 = scmp.lt.s32.totalorder (!%p137_p2), %s246_s13, 1  ;;  %v253_v0 = vld [vmem:[%s317_s1] ss:$0 sm:$0xff] (!%p137_p2)  ;;  %vm187_vm0 = vcmask (!%p137_p2), 1042432   ;;  %vm188_vm1 = vsmask.f32 (!%p137_p2), 2304 }
   0x6   : > { %140 = sbr.rel (%p137_p2) target bundleno = 28 (0x1c), region = 32  ;;  %v254_v2 = vld [vmem:[%s318_s2] ss:$0 sm:$0xff] (!%p137_p2)  ;;  %vm189_vm3 = vmand (!%p137_p2), %vm187_vm0, %vm188_vm1 }
   0xd   : > { %s321_s13 = smov (!%p158_p3, %s246_s13), 1 }
   0xe   : > { %s251_s14 = sshll.u32 %s321_s13, 3  ;;  %s252_s22 = sshll.u32 %s321_s13, 2 }
   0xf   : > { %s161_s19 = scalar_lea.vmem %s316_s0, %s251_s14  ;;  %s165_s25 = scalar_lea.vmem %s319_s3, %s252_s22 }
  0x10   : > { %v166_v1 = vld [vmem:[%s161_s19] sm:$0x1f] }
  0x11   : > { %v174_v3 = vmul.f32 %v253_v0, %v166_v1  ;;  %v190_v7 = vld [vmem:[%s165_s25] sm:$0x7] }
  0x13   : > { %v182_v4 = vadd.f32 %v254_v2, %v174_v3 }
  0x15   : > { %vm183_vm2 = vcmp.ge.f32.partialorder %v182_v4, 0.0  ;;  %v184_v5 = vmul.f32 0.01, %v182_v4 }
  0x17   : > { %v185_v6 = vsel %vm183_vm2, %v182_v4, %v184_v5 }
  0x18   : > { %v186_v8 = vpack.c.bf16 %v185_v6, %v185_v6 }
  0x1a   : > { %v191_v9 = vsel %vm189_vm3, %v186_v8, %v190_v7 }
  0x1b   : > { %192 = vst [vmem:[%s165_s25] sm:$0x7] %v191_v9 }
  0x1c PF: > { %s13_s12 = sadd.s32 1, %s271_s12  }
  0x1d   : > { %p10_p4 = scmp.ge.s32.totalorder %s13_s12, 4  }
  0x1f   :  { %12 = sbr.rel (!%p10_p4) target bundleno = 1 (0x1), region = 62 }

// kernel: encoder_v1.8
= control target key start
LH: loop header
LB: loop body
LE: loop exit
PB: predicated region body
PF: predicated region fallthrough
CT: control target
= control target key end

     0   :  { %s2223_s15 = smov 0   ;;  %s2535_s0 = inlined_call_operand.vmem [shape: bf16[8,25,128], index: 0, kind: input, shape index: {}]   ;;  %s2536_s1 = inlined_call_operand.vmem [shape: bf16[9,128,128], index: 1, kind: input, shape index: {}]   ;;  %s2537_s2 = inlined_call_operand.vmem [shape: f32[19,1], index: 2, kind: input, shape index: {}]   ;;  %s2538_s3 = inlined_call_operand.vmem [shape: f32[2,19,128], index: 3, kind: output, shape index: {0}]   ;;  %s2539_s4 = inlined_call_operand.vmem [shape: f32[2,2,128], index: 4, kind: output, shape index: {1}]  }
   0x1 LB: > { %s2229_s16 = sadd.s32 4294967295, %s2195_s15   ;;  %p1556_p0 = scmp.ge.s32.totalorder %s2195_s15, 1  ;;  %s2195_s15 = sphi %s2223_s15, %s15_s15  }
   0x2   : > { %p167_p1 = scmp.lt.s32.totalorder %s2195_s15, 3 }
   0x4   : > { %p168_p2 = pnand %p1556_p0, %p167_p1 }
   0x5   : > { %v2103_v0 = vld [vmem:[%s2536_s1 + $0x40] sm:$0xff] (!%p168_p2)   ;;  %s1557_s19 = sshll.u32 (!%p168_p2), %s2229_s16, 2  ;;  %v2105_v2 = vld [vmem:[%s2536_s1 + $0x48] sm:$0xff] (!%p168_p2)   ;;  %v2107_v4 = vld [vmem:[%s2536_s1 + $0x50] sm:$0xff] (!%p168_p2)   ;;  %v2197_v31 = vmov (!%p168_p2), 0   ;;  %vm1312_vm2 = vcmask (!%p168_p2), 1044480  }
   0x6   : > { %171 = sbr.rel (%p168_p2) target bundleno = 406 (0x196), region = 32  ;;  %v2104_v1 = vld [vmem:[%s2536_s1 + $0x100] sm:$0xff] (!%p168_p2)   ;;  %1880 = vmatprep.subr.bf16.mxu1 (!%p168_p2), %v2103_v0  ;;  %p199_p3 = scmp.lt.s32.totalorder (!%p168_p2), %s1557_s19, 7  ;;  %v2106_v3 = vld [vmem:[%s2536_s1 + $0x108] sm:$0xff] (!%p168_p2)   ;;  %v2108_v5 = vld [vmem:[%s2536_s1 + $0x110] sm:$0xff] (!%p168_p2)   ;;  %2101 = vset.pattern.permute.xlu0 (!%p168_p2), %v2197_v31  ;;  %vm1442_vm3 = vcmask (!%p168_p2), 1042432  }
   0x7   : > { %1960 = vmatprep.subr.bf16.mxu0 (!%p168_p2), %v2104_v1  ;;  %1881 = vmatpush3.bf16.msra.mxu1 (!%p168_p2), %v2103_v0  ;;  %v2109_v6 = vld [vmem:[%s2536_s1 + $0x58] sm:$0xff] (!%p168_p2)   ;;  %v2111_v8 = vld [vmem:[%s2536_s1 + $0x60] sm:$0xff] (!%p168_p2)   ;;  %v2113_v10 = vld [vmem:[%s2536_s1 + $0x68] sm:$0xff] (!%p168_p2)   ;;  %vm484_vm0 = vsmask.f32 (!%p168_p2), 7424  ;;  %p205_p4 = scmp.lt.s32.totalorder (!%p168_p2), %s2229_s16, 1 }
   0x8   : > { %1961 = vmatpush3.bf16.msra.mxu0 (!%p168_p2), %v2104_v1  ;;  %1882 = vmatprep.subr.bf16.mxu1 (!%p168_p2), %v2105_v2  ;;  %v2110_v7 = vld [vmem:[%s2536_s1 + $0x118] sm:$0xff] (!%p168_p2)   ;;  %v2112_v9 = vld [vmem:[%s2536_s1 + $0x120] sm:$0xff] (!%p168_p2)   ;;  %v2114_v13 = vld [vmem:[%s2536_s1 + $0x128] sm:$0xff] (!%p168_p2)   ;;  %vm1019_vm1 = vsmask.f32 (!%p168_p2), 5376  ;;  %vm1463_vm4 = vcmask (!%p168_p2), 1040384  }
   0x9   : > { %1962 = vmatprep.subr.bf16.mxu0 (!%p168_p2), %v2106_v3  ;;  %v2115_v16 = vld [vmem:[%s2536_s1 + $0x70] sm:$0xff] (!%p168_p2)   ;;  %v2117_v18 = vld [vmem:[%s2536_s1 + $0x78] sm:$0xff] (!%p168_p2)   ;;  %v2121_v20 = vld [vmem:[%s2536_s1] sm:$0xff] (!%p168_p2)   ;;  %2102 = vset.pattern.permute.xlu1 (!%p168_p2), %v2197_v31 }
   0xa   : > { %v2116_v17 = vld [vmem:[%s2536_s1 + $0x130] sm:$0xff] (!%p168_p2)   ;;  %v2118_v19 = vld [vmem:[%s2536_s1 + $0x138] sm:$0xff] (!%p168_p2)   ;;  %v2123_v22 = vld [vmem:[%s2536_s1 + $0x140] sm:$0xff] (!%p168_p2)  }
   0xb   : > { %1883 = vmatpush3.bf16.msra.mxu1 (!%p168_p2), %v2105_v2  ;;  %v2126_v24 = vld [vmem:[%s2536_s1 + $0x8] sm:$0xff] (!%p168_p2)   ;;  %v2128_v26 = vld [vmem:[%s2536_s1 + $0x10] sm:$0xff] (!%p168_p2)   ;;  %v2130_v32 = vld [vmem:[%s2536_s1 + $0x18] sm:$0xff] (!%p168_p2)  }
   0xc   : > { %1963 = vmatpush3.bf16.msra.mxu0 (!%p168_p2), %v2106_v3  ;;  %1884 = vmatprep.subr.bf16.mxu1 (!%p168_p2), %v2107_v4  ;;  %v2127_v25 = vld [vmem:[%s2536_s1 + $0x148] sm:$0xff] (!%p168_p2)   ;;  %v2129_v29 = vld [vmem:[%s2536_s1 + $0x150] sm:$0xff] (!%p168_p2)   ;;  %v2131_v34 = vld [vmem:[%s2536_s1 + $0x158] sm:$0xff] (!%p168_p2)  }
   0xd   : > { %s2541_s19 = smov (!%p199_p3, %s1557_s19), 7  ;;  %1964 = vmatprep.subr.bf16.mxu0 %v2108_v5  ;;  %v2132_v39 = vld [vmem:[%s2536_s1 + $0x20] sm:$0xff]   ;;  %v2134_v44 = vld [vmem:[%s2536_s1 + $0x28] sm:$0xff]   ;;  %v2136_v49 = vld [vmem:[%s2536_s1 + $0x30] sm:$0xff]   ;;  %s2543_s16 = smov (!%p205_p4, %s2229_s16), 1 }
   0xe   : > { %s1789_s8 = sshll.u32 %s2541_s19, 4  ;;  %v2133_v41 = vld [vmem:[%s2536_s1 + $0x160] sm:$0xff]   ;;  %v2135_v47 = vld [vmem:[%s2536_s1 + $0x168] sm:$0xff]   ;;  %v2137_v50 = vld [vmem:[%s2536_s1 + $0x170] sm:$0xff]   ;;  %s2091_s6 = smul.u32 24, %s2543_s16 }
   0xf   : > { %1885 = vmatpush3.bf16.msra.mxu1 %v2107_v4  ;;  %s2267_s17 = scalar_lea.vmem %s2535_s0, %s1789_s8  ;;  %v2138_v51 = vld [vmem:[%s2536_s1 + $0x38] sm:$0xff]   ;;  %v2142_v0 = vld [vmem:[%s2536_s1 + $0x80] sm:$0xff]   ;;  %v2147_v4 = vld [vmem:[%s2536_s1 + $0x88] sm:$0xff]   ;;  %s1561_s10 = sshll.u32 %s2543_s16, 1 }
  0x10   : > { %1965 = vmatpush3.bf16.msra.mxu0 %v2108_v5  ;;  %1886 = vmatprep.subr.bf16.mxu1 %v2109_v6  ;;  %v1562_v11 = vld [vmem:[%s2267_s17 + $0x10] sm:$0xf]  ;;  %v2274_v12 = vld [vmem:[%s2267_s17 + $0x14] sm:$0xf]  ;;  %v215_v27 = vld [vmem:[%s2267_s17] sm:$0xf]  ;;  %s209_s9 = scalar_lea.vmem %s2538_s3, %s2091_s6  ;;  %s213_s13 = scalar_lea.vmem %s2539_s4, %s1561_s10 }
  0x11   : > { %1966 = vmatprep.subr.bf16.mxu0 %v2110_v7  ;;  %v1581_v14 = vcombine.low %v1562_v11, %v2274_v12  ;;  %v2122_v15 = vld [vmem:[%s2267_s17 + $0x30] sm:$0xff]   ;;  %v2124_v21 = vld [vmem:[%s2267_s17 + $0x18] ss:$0 sps:$4 sm:$0x33]   ;;  %v216_v28 = vld [vmem:[%s2267_s17 + $0x4] sm:$0xf] }
  0x12   : > { %1976 = vmatprep.mubr.bf16.mxu0 %v2122_v15  ;;  %v2125_v23 = vld [vmem:[%s2267_s17 + $0x38] ss:$0 sps:$4 sm:$0x33]   ;;  %v2315_v30 = vcombine.low %v215_v27, %v216_v28  ;;  %v2322_v33 = vld [vmem:[%s2267_s17 + $0x20] sm:$0xff]   ;;  %v2162_v61 = vld [vmem:[%s2267_s17 + $0x8] ss:$0 sps:$4 sm:$0xff]  }
  0x13   : > { %1887 = vmatpush3.bf16.msra.mxu1 %v2109_v6  ;;  %1896 = vmatprep.mubr.bf16.mxu1 %v1581_v14  ;;  %v2328_v35 = vld [vmem:[%s2267_s17 + $0x28] ss:$0 sps:$4 sm:$0x33]   ;;  %v879_v36 = vshrl.u32 %v2322_v33, 16  ;;  %v881_v37 = vshll.u32 %v2322_v33, 16  ;;  %v2139_v56 = vld [vmem:[%s2536_s1 + $0x178] sm:$0xff]  }
  0x14   : > { %1967 = vmatpush3.bf16.msra.mxu0 %v2110_v7  ;;  %1888 = vmatprep.subr.bf16.mxu1 %v2111_v8  ;;  %v886_v38 = vshll.u32 %v2328_v35, 16  ;;  %v994_v46 = vld [vmem:[%s2267_s17] sm:$0xc]  ;;  %v488_v52 = vshll.u32 %v2315_v30, 16  ;;  %v890_v57 = vshrl.u32 %v2328_v35, 16  ;;  %v486_v58 = vshrl.u32 %v2315_v30, 16 }
  0x15   : > { %1968 = vmatprep.subr.bf16.mxu0 %v2112_v9  ;;  %v883_v40 = vrot.slane %v881_v37, 1  ;;  %v1723_v48 = vcombine.low %v994_v46, %v216_v28  ;;  %v2358_v53 = vld [vmem:[%s2267_s17 + $0x8] ss:$0 sps:$4 sm:$0x33]   ;;  %v2145_v1 = vld [vmem:[%s2536_s1 + $0x180] sm:$0xff]   ;;  %v1029_v2 = vshrl.u32 %v2162_v61, 16 }
  0x16   : > { %v888_v42 = vrot.slane %v886_v38, 1  ;;  %v490_v59 = vrot.slane %v488_v52, 1  ;;  %v493_v60 = vshll.u32 %v2358_v53, 16  ;;  %v1032_v3 = vshll.u32 %v2162_v61, 16  ;;  %v2157_v27 = vld [vmem:[%s2536_s1 + $0xb0] sm:$0xff]   ;;  %v1420_v28 = vld [vmem:[%s2537_s2] sm:$0xff] }
  0x17   : > { %1889 = vmatpush3.bf16.msra.mxu1 %v2111_v8  ;;  %v884_v43 = vor.u32 %v883_v40, %v879_v36  ;;  %v1021_v54 = vshrl.u32 %v1723_v48, 16  ;;  %v1024_v55 = vshll.u32 %v1723_v48, 16  ;;  %v1031_v7 = vrot.slane %v1029_v2, 2  ;;  %1425 = vperm.xlu0 %2101, %v1420_v28   ;;  %v2159_v37 = vld [vmem:[%s2536_s1 + $0xb8] sm:$0xff]   ;;  %v2166_v52 = vld [vmem:[%s2536_s1 + $0xd0] sm:$0xff]  }
  0x18   : > { %1969 = vmatpush3.bf16.msra.mxu0 %v2112_v9  ;;  %1890 = vmatprep.subr.bf16.mxu1 %v2113_v10  ;;  %v491_v5 = vor.u32 %v490_v59, %v486_v58  ;;  %v2376_v6 = vrot.slane %v493_v60, 1  ;;  %v1034_v8 = vrot.slane %v1032_v3, 3  ;;  %v892_v9 = vor.u32 %v890_v57, %v888_v42  ;;  %v2160_v38 = vld [vmem:[%s2536_s1 + $0x1b8] sm:$0xff]   ;;  %v2172_v57 = vld [vmem:[%s2536_s1 + $0xe8] sm:$0xff]   ;;  %v2174_v59 = vld [vmem:[%s2536_s1 + $0xf0] sm:$0xff]  }
  0x19   : > { %1970 = vmatprep.subr.bf16.mxu0 %v2114_v13  ;;  %v889_v45 = vsel %vm484_vm0, %v884_v43, %v888_v42  ;;  %v1023_v62 = vrot.slane %v1021_v54, 2  ;;  %v1026_v63 = vrot.slane %v1024_v55, 3  ;;  %v2168_v54 = vld [vmem:[%s2536_s1 + $0xd8] sm:$0xff]   ;;  %v2173_v58 = vld [vmem:[%s2536_s1 + $0x1e8] sm:$0xff]   ;;  %v2175_v60 = vld [vmem:[%s2536_s1 + $0x1f0] sm:$0xff]  }
  0x1a   : > { %v2378_v11 = vor.u32 %v1034_v8, %v1031_v7  ;;  %v496_v14 = vsel %vm484_vm0, %v491_v5, %v2376_v6  ;;  %v2169_v55 = vld [vmem:[%s2536_s1 + $0x1d8] sm:$0xff]   ;;  %v2184_v8 = vld [vmem:[%s2536_s1 + $0x228] sm:$0xff]  }
  0x1b   : > { %1891 = vmatpush3.bf16.msra.mxu1 %v2113_v10  ;;  %v1027_v10 = vor.u32 %v1026_v63, %v1023_v62  ;;  %v2176_v61 = vld [vmem:[%s2536_s1 + $0xf8] sm:$0xff]   ;;  %v2187_v63 = vld [vmem:[%s2267_s17] sm:$0xf8]  }
  0x1c   : > { %1971 = vmatpush3.bf16.msra.mxu0 %v2114_v13  ;;  %1892 = vmatprep.subr.bf16.mxu1 %v2115_v16  ;;  %v2148_v13 = vld [vmem:[%s2536_s1 + $0x188] sm:$0xff]   ;;  %v2177_v62 = vld [vmem:[%s2536_s1 + $0x1f8] sm:$0xff]   ;;  %v1313_v2 = vrot.slane %v2187_v63, 3 }
  0x1d   : > { %1972 = vmatprep.subr.bf16.mxu0 %v2116_v17  ;;  %v1036_v15 = vsel %vm1019_vm1, %v1027_v10, %v2378_v11  ;;  %v2182_v7 = vld [vmem:[%s2536_s1 + $0x218] sm:$0xff]  }
  0x1e   : > { %v2186_v10 = vld [vmem:[%s2536_s1 + $0x238] sm:$0xff]  }
  0x1f   : > { %1893 = vmatpush3.bf16.msra.mxu1 %v2115_v16  ;;  %v2149_v16 = vld [vmem:[%s2536_s1 + $0x90] sm:$0xff]  }
  0x20   : > { %1973 = vmatpush3.bf16.msra.mxu0 %v2116_v17  ;;  %1894 = vmatprep.subr.bf16.mxu1 %v2117_v18  ;;  %v2150_v17 = vld [vmem:[%s2536_s1 + $0x190] sm:$0xff]  }
  0x21   : > { %1974 = vmatprep.subr.bf16.mxu0 %v2118_v19 }
  0x23   : > { %1895 = vmatpush3.bf16.msra.mxu1 %v2117_v18  ;;  %v2151_v18 = vld [vmem:[%s2536_s1 + $0x98] sm:$0xff]  }
  0x24   : > { %1975 = vmatpush3.bf16.msra.mxu0 %v2118_v19  ;;  %1900 = vmatprep.subr.bf16.mxu1 %v2121_v20  ;;  %v2152_v19 = vld [vmem:[%s2536_s1 + $0x198] sm:$0xff]  }
  0x25   : > { %1980 = vmatprep.subr.bf16.mxu0 %v2123_v22 }
  0x26   : > { %1897 = vmatmul.mubr.bf16.vlgmr.msra.gmra.mrb[0].mxu1 %v2124_v21  ;;  %v2154_v21 = vld [vmem:[%s2536_s1 + $0x1a0] sm:$0xff]  }
  0x27   : > { %1901 = vmatpush3.bf16.msra.mxu1 %v2121_v20  ;;  %1977 = vmatmul.mubr.bf16.vlgmr.msra.gmra.mrb[0].mxu0 %v2125_v23  ;;  %v2153_v20 = vld [vmem:[%s2536_s1 + $0xa0] sm:$0xff]   ;;  %v2155_v23 = vld [vmem:[%s2536_s1 + $0xa8] sm:$0xff]  }
  0x28   : > { %1981 = vmatpush3.bf16.msra.mxu0 %v2123_v22  ;;  %1902 = vmatprep.subr.bf16.mxu1 %v2126_v24  ;;  %v1733_v22 = vld [vmem:[%s2267_s17 + $0x10] sm:$0xc] }
  0x29   : > { %1982 = vmatprep.subr.bf16.mxu0 %v2127_v25  ;;  %1916 = vmatprep.mubr.bf16.mxu1 %v2315_v30  ;;  %v1421_v30 = vld [vmem:[%s2537_s2 + $0x8] sm:$0xff] }
  0x2a   : > { %1996 = vmatprep.mubr.bf16.mxu0 %v889_v45  ;;  %1430 = vperm.xlu0 %2101, %v1421_v30   ;;  %v2163_v45 = vld [vmem:[%s2536_s1 + $0x1c0] sm:$0xff]  }
  0x2b   : > { %1903 = vmatpush3.bf16.msra.mxu1 %v2126_v24  ;;  %v2156_v24 = vld [vmem:[%s2536_s1 + $0x1a8] sm:$0xff]  }
  0x2c   : > { %1983 = vmatpush3.bf16.msra.mxu0 %v2127_v25  ;;  %1904 = vmatprep.subr.bf16.mxu1 %v2128_v26  ;;  %v1751_v25 = vcombine.low %v1733_v22, %v2274_v12  ;;  %v1422_v12 = vld [vmem:[%s2537_s2 + $0x10] sm:$0x7] }
  0x2d   : > { %1984 = vmatprep.subr.bf16.mxu0 %v2129_v29  ;;  %1435 = vperm.xlu1 %2102, %v1422_v12  }
  0x2e   : > { %v1164_v31 = vshrl.u32 %v1751_v25, 16 }
  0x2f   : > { %1905 = vmatpush3.bf16.msra.mxu1 %v2128_v26  ;;  %v2178_v26 = vld [vmem:[%s2267_s17 + $0x18] ss:$0 sps:$4 sm:$0xff]  }
  0x30   : > { %1985 = vmatpush3.bf16.msra.mxu0 %v2129_v29  ;;  %1906 = vmatprep.subr.bf16.mxu1 %v2130_v32  ;;  %v2158_v29 = vld [vmem:[%s2536_s1 + $0x1b0] sm:$0xff]   ;;  %v1175_v36 = vshll.u32 %v2178_v26, 16  ;;  %v1166_v40 = vrot.slane %v1164_v31, 2 }
  0x31   : > { %1986 = vmatprep.subr.bf16.mxu0 %v2131_v34 }
  0x32   : > { %v1177_v43 = vrot.slane %v1175_v36, 3 }
  0x33   : > { %1907 = vmatpush3.bf16.msra.mxu1 %v2130_v32  ;;  %v1167_v32 = vshll.u32 %v1751_v25, 16 }
  0x34   : > { %1987 = vmatpush3.bf16.msra.mxu0 %v2131_v34  ;;  %1908 = vmatprep.subr.bf16.mxu1 %v2132_v39  ;;  %v1172_v34 = vshrl.u32 %v2178_v26, 16 }
  0x35   : > { %1988 = vmatprep.subr.bf16.mxu0 %v2133_v41 }
  0x36   : > { %v1174_v42 = vrot.slane %v1172_v34, 2 }
  0x37   : > { %1909 = vmatpush3.bf16.msra.mxu1 %v2132_v39  ;;  %v497_v39 = vshrl.u32 %v2358_v53, 16 }
  0x38   : > { %1989 = vmatpush3.bf16.msra.mxu0 %v2133_v41  ;;  %1910 = vmatprep.subr.bf16.mxu1 %v2134_v44  ;;  %v1169_v41 = vrot.slane %v1167_v32, 3  ;;  %v2444_v48 = vor.u32 %v1177_v43, %v1174_v42 }
  0x39   : > { %1990 = vmatprep.subr.bf16.mxu0 %v2135_v47  ;;  %v499_v46 = vor.u32 %v497_v39, %v2376_v6  ;;  %v2181_v6 = vld [vmem:[%s2536_s1 + $0x210] sm:$0xff]  }
  0x3b   : > { %1911 = vmatpush3.bf16.msra.mxu1 %v2134_v44  ;;  %v2161_v44 = vld [vmem:[%s2536_s1 + $0xc0] sm:$0xff]  }
  0x3c   : > { %1991 = vmatpush3.bf16.msra.mxu0 %v2135_v47  ;;  %1912 = vmatprep.subr.bf16.mxu1 %v2136_v49  ;;  %v1170_v47 = vor.u32 %v1169_v41, %v1166_v40 }
  0x3d   : > { %1992 = vmatprep.subr.bf16.mxu0 %v2137_v50 }
  0x3f   : > { %1913 = vmatpush3.bf16.msra.mxu1 %v2136_v49  ;;  %v2164_v49 = vld [vmem:[%s2536_s1 + $0xc8] sm:$0xff]  }
  0x40   : > { %1993 = vmatpush3.bf16.msra.mxu0 %v2137_v50  ;;  %1914 = vmatprep.subr.bf16.mxu1 %v2138_v51  ;;  %v2165_v50 = vld [vmem:[%s2536_s1 + $0x1c8] sm:$0xff]  }
  0x41   : > { %1994 = vmatprep.subr.bf16.mxu0 %v2139_v56 }
  0x43   : > { %1915 = vmatpush3.bf16.msra.mxu1 %v2138_v51  ;;  %v1179_v51 = vsel %vm1019_vm1, %v1170_v47, %v2444_v48 }
  0x44   : > { %1995 = vmatpush3.bf16.msra.mxu0 %v2139_v56  ;;  %1920 = vmatprep.subr.bf16.mxu1 %v2142_v0  ;;  %v2171_v56 = vld [vmem:[%s2536_s1 + $0x1e0] sm:$0xff]  }
  0x45   : > { %2000 = vmatprep.subr.bf16.mxu0 %v2145_v1 }
  0x46   : > { %1917 = vmatmul.mubr.bf16.vlgmr.msra.gmra.mrb[0].mxu1 %v2358_v53  ;;  %v2167_v53 = vld [vmem:[%s2536_s1 + $0x1d0] sm:$0xff]  }
  0x47   : > { %1921 = vmatpush3.bf16.msra.mxu1 %v2142_v0  ;;  %1997 = vmatmul.mubr.bf16.vlgmr.msra.gmra.mrb[0].mxu0 %v892_v9  ;;  %v2188_v0 = vld [vmem:[%s2267_s17 + $0x8] sm:$0x1f]   ;;  %v2185_v9 = vld [vmem:[%s2536_s1 + $0x230] sm:$0xff]  }
  0x48   : > { %2001 = vmatpush3.bf16.msra.mxu0 %v2145_v1  ;;  %1922 = vmatprep.subr.bf16.mxu1 %v2147_v4  ;;  %v2179_v1 = vld [vmem:[%s2536_s1 + $0x200] sm:$0xff]   ;;  %v1314_v3 = vrot.slane %v2188_v0, 3 }
  0x49   : > { %2002 = vmatprep.subr.bf16.mxu0 %v2148_v13  ;;  %1936 = vmatprep.mubr.bf16.mxu1 %v496_v14 }
  0x4a   : > { %2016 = vmatprep.mubr.bf16.mxu0 %v1036_v15  ;;  %v1315_v5 = vsel %vm1312_vm2, %v1313_v2, %v1314_v3 }
  0x4b   : > { %1923 = vmatpush3.bf16.msra.mxu1 %v2147_v4  ;;  %v2180_v4 = vld [vmem:[%s2536_s1 + $0x208] sm:$0xff]  }
  0x4c   : > { %2003 = vmatpush3.bf16.msra.mxu0 %v2148_v13  ;;  %1924 = vmatprep.subr.bf16.mxu1 %v2149_v16 }
  0x4d   : > { %2004 = vmatprep.subr.bf16.mxu0 %v2150_v17 }
  0x4f   : > { %1925 = vmatpush3.bf16.msra.mxu1 %v2149_v16 }
  0x50   : > { %2005 = vmatpush3.bf16.msra.mxu0 %v2150_v17  ;;  %1926 = vmatprep.subr.bf16.mxu1 %v2151_v18 }
  0x51   : > { %2006 = vmatprep.subr.bf16.mxu0 %v2152_v19 }
  0x53   : > { %1927 = vmatpush3.bf16.msra.mxu1 %v2151_v18 }
  0x54   : > { %2007 = vmatpush3.bf16.msra.mxu0 %v2152_v19  ;;  %1928 = vmatprep.subr.bf16.mxu1 %v2153_v20 }
  0x55   : > { %2008 = vmatprep.subr.bf16.mxu0 %v2154_v21 }
  0x57   : > { %1929 = vmatpush3.bf16.msra.mxu1 %v2153_v20 }
  0x58   : > { %2009 = vmatpush3.bf16.msra.mxu0 %v2154_v21  ;;  %1930 = vmatprep.subr.bf16.mxu1 %v2155_v23 }
  0x59   : > { %2010 = vmatprep.subr.bf16.mxu0 %v2156_v24 }
  0x5b   : > { %1931 = vmatpush3.bf16.msra.mxu1 %v2155_v23 }
  0x5c   : > { %2011 = vmatpush3.bf16.msra.mxu0 %v2156_v24  ;;  %1932 = vmatprep.subr.bf16.mxu1 %v2157_v27 }
  0x5d   : > { %2012 = vmatprep.subr.bf16.mxu0 %v2158_v29 }
  0x5f   : > { %1933 = vmatpush3.bf16.msra.mxu1 %v2157_v27 }
  0x60   : > { %2013 = vmatpush3.bf16.msra.mxu0 %v2158_v29  ;;  %1934 = vmatprep.subr.bf16.mxu1 %v2159_v37 }
  0x61   : > { %2014 = vmatprep.subr.bf16.mxu0 %v2160_v38 }
  0x63   : > { %1935 = vmatpush3.bf16.msra.mxu1 %v2159_v37 }
  0x64   : > { %2015 = vmatpush3.bf16.msra.mxu0 %v2160_v38  ;;  %1940 = vmatprep.subr.bf16.mxu1 %v2161_v44 }
  0x65   : > { %2020 = vmatprep.subr.bf16.mxu0 %v2163_v45 }
  0x66   : > { %1937 = vmatmul.mubr.bf16.vlgmr.msra.gmra.mrb[0].mxu1 %v499_v46 }
  0x67   : > { %1941 = vmatpush3.bf16.msra.mxu1 %v2161_v44  ;;  %2017 = vmatmul.mubr.bf16.vlgmr.msra.gmra.mrb[0].mxu0 %v2378_v11 }
  0x68   : > { %2021 = vmatpush3.bf16.msra.mxu0 %v2163_v45  ;;  %1942 = vmatprep.subr.bf16.mxu1 %v2164_v49 }
  0x69   : > { %2022 = vmatprep.subr.bf16.mxu0 %v2165_v50  ;;  %1956 = vmatprep.mubr.bf16.mxu1 %v2322_v33  ;;  %v2170_v33 = vld [vmem:[%s2536_s1 + $0xe0] sm:$0xff]  }
  0x6a   : > { %2036 = vmatprep.mubr.bf16.mxu0 %v1179_v51 }
  0x6b   : > { %1943 = vmatpush3.bf16.msra.mxu1 %v2164_v49 }
  0x6c   : > { %2023 = vmatpush3.bf16.msra.mxu0 %v2165_v50  ;;  %1944 = vmatprep.subr.bf16.mxu1 %v2166_v52 }
  0x6d   : > { %2024 = vmatprep.subr.bf16.mxu0 %v2167_v53 }
  0x6f   : > { %1945 = vmatpush3.bf16.msra.mxu1 %v2166_v52 }
  0x70   : > { %2025 = vmatpush3.bf16.msra.mxu0 %v2167_v53  ;;  %1946 = vmatprep.subr.bf16.mxu1 %v2168_v54 }
  0x71   : > { %2026 = vmatprep.subr.bf16.mxu0 %v2169_v55 }
  0x73   : > { %1947 = vmatpush3.bf16.msra.mxu1 %v2168_v54 }
  0x74   : > { %2027 = vmatpush3.bf16.msra.mxu0 %v2169_v55  ;;  %1948 = vmatprep.subr.bf16.mxu1 %v2170_v33 }
  0x75   : > { %2028 = vmatprep.subr.bf16.mxu0 %v2171_v56 }
  0x77   : > { %1949 = vmatpush3.bf16.msra.mxu1 %v2170_v33 }
  0x78   : > { %2029 = vmatpush3.bf16.msra.mxu0 %v2171_v56  ;;  %1950 = vmatprep.subr.bf16.mxu1 %v2172_v57 }
  0x79   : > { %2030 = vmatprep.subr.bf16.mxu0 %v2173_v58 }
  0x7b   : > { %1951 = vmatpush3.bf16.msra.mxu1 %v2172_v57 }
  0x7c   : > { %2031 = vmatpush3.bf16.msra.mxu0 %v2173_v58  ;;  %1952 = vmatprep.subr.bf16.mxu1 %v2174_v59 }
  0x7d   : > { %2032 = vmatprep.subr.bf16.mxu0 %v2175_v60 }
  0x7f   : > { %1953 = vmatpush3.bf16.msra.mxu1 %v2174_v59 }
  0x80   : > { %2033 = vmatpush3.bf16.msra.mxu0 %v2175_v60  ;;  %1954 = vmatprep.subr.bf16.mxu1 %v2176_v61 }
  0x81   : > { %2034 = vmatprep.subr.bf16.mxu0 %v2177_v62 }
  0x83   : > { %1955 = vmatpush3.bf16.msra.mxu1 %v2176_v61 }
  0x84   : > { %2035 = vmatpush3.bf16.msra.mxu0 %v2177_v62 }
  0x85   : > { %2040 = vmatprep.subr.bf16.mxu0 %v2179_v1 }
  0x86   : > { %1957 = vmatmul.mubr.bf16.vlgmr.msra.gmra.mrb[0].mxu1 %v2328_v35  ;;  %v2183_v35 = vld [vmem:[%s2536_s1 + $0x220] sm:$0xff]  }
  0x87   : > { %2037 = vmatmul.mubr.bf16.vlgmr.msra.gmra.mrb[0].mxu0 %v2444_v48 }
  0x88   : > { %2041 = vmatpush3.bf16.msra.mxu0 %v2179_v1  ;;  %2056 = vmatprep.mubr.bf16.mxu0 %v1315_v5 }
  0x89   : > { %2042 = vmatprep.subr.bf16.mxu0 %v2180_v4 }
  0x8c   : > { %2043 = vmatpush3.bf16.msra.mxu0 %v2180_v4 }
  0x8d   : > { %2044 = vmatprep.subr.bf16.mxu0 %v2181_v6 }
  0x90   : > { %2045 = vmatpush3.bf16.msra.mxu0 %v2181_v6 }
  0x91   : > { %2046 = vmatprep.subr.bf16.mxu0 %v2182_v7 }
  0x94   : > { %2047 = vmatpush3.bf16.msra.mxu0 %v2182_v7 }
  0x95   : > { %2048 = vmatprep.subr.bf16.mxu0 %v2183_v35 }
  0x96   : > { %v1426_v16 = vpop.permute.xlu0 %1425 }
  0x98   : > { %2049 = vmatpush3.bf16.msra.mxu0 %v2183_v35 }
  0x99   : > { %2050 = vmatprep.subr.bf16.mxu0 %v2184_v8 }
  0x9c   : > { %2051 = vmatpush3.bf16.msra.mxu0 %v2184_v8 }
  0x9d   : > { %2052 = vmatprep.subr.bf16.mxu0 %v2185_v9 }
  0xa0   : > { %2053 = vmatpush3.bf16.msra.mxu0 %v2185_v9 }
  0xa1   : > { %2054 = vmatprep.subr.bf16.mxu0 %v2186_v10 }
  0xa4   : > { %2055 = vmatpush3.bf16.msra.mxu0 %v2186_v10 }
  0xa7   : > { %2057 = vmatmul.mubr.bf16.vlgmr.msra.gmra.mrb[0].mxu0 %v1314_v3 }
  0xa9   : > { %v1431_v27 = vpop.permute.xlu0 %1430 }
  0xac   : > { %v1436_v18 = vpop.permute.xlu1 %1435 }
 0x159   : > { %v1958_v11 = vpop.f32.mrb[0].mxu1 }
 0x15a   : > { %v714_v13 = vpop.f32.mrb[1].mxu1 }
 0x15b   : > { %v1959_v14 = vpop.f32.mrb[2].mxu1 }
 0x15c   : > { %v717_v15 = vpop.f32.mrb[3].mxu1 }
 0x17a   : > { %v2058_v17 = vpop.f32.mrb[0].mxu0 }
 0x17b   : > { %v2060_v19 = vadd.f32 %v2058_v17, %v1958_v11  ;;  %v1400_v20 = vpop.f32.mrb[1].mxu0 }
 0x17c   : > { %v2061_v21 = vadd.f32 %v1400_v20, %v714_v13  ;;  %v2059_v22 = vpop.f32.mrb[2].mxu0 }
 0x17d   : > { %1419 = vst [vmem:[%s209_s9 + $0x10] sm:$0x7] %v2060_v19  ;;  %v1440_v23 = vmul.f32 %v2060_v19, %v1436_v18  ;;  %v1403_v24 = vpop.f32.mrb[3].mxu0 }
 0x17e   : > { %1417 = vst [vmem:[%s209_s9] sm:$0xff] %v2061_v21  ;;  %v1438_v25 = vmul.f32 %v2061_v21, %v1426_v16  ;;  %v2062_v26 = vadd.f32 %v1403_v24, %v717_v15 }
 0x17f   : > { %v1453_v29 = vmul.f32 %v2060_v19, %v1440_v23  ;;  %v1443_v32 = vsel %vm1442_vm3, %v1440_v23, 0.0 }
 0x180   : > { %1418 = vst [vmem:[%s209_s9 + $0x8] sm:$0xff] %v2062_v26  ;;  %v1439_v28 = vmul.f32 %v2062_v26, %v1431_v27  ;;  %v1451_v12 = vmul.f32 %v2061_v21, %v1438_v25 }
 0x181   : > { %v1455_v37 = vsel %vm1442_vm3, %v1453_v29, 0.0 }
 0x182   : > { %v1441_v30 = vadd.f32 %v1439_v28, %v1438_v25  ;;  %v1452_v31 = vmul.f32 %v2062_v26, %v1439_v28 }
 0x184   : > { %v1444_v34 = vadd.f32 %v1443_v32, %v1441_v30  ;;  %v1454_v36 = vadd.f32 %v1452_v31, %v1451_v12 }
 0x186   : > { %v1445_v38 = vrot.slane %v1444_v34, 4  ;;  %v1456_v39 = vadd.f32 %v1455_v37, %v1454_v36 }
 0x188   : > { %v1446_v40 = vadd.f32 %v1445_v38, %v1444_v34  ;;  %v1457_v41 = vrot.slane %v1456_v39, 4 }
 0x18a   : > { %v1447_v42 = vrot.slane %v1446_v40, 2  ;;  %v1458_v43 = vadd.f32 %v1457_v41, %v1456_v39 }
 0x18c   : > { %v1448_v44 = vadd.f32 %v1447_v42, %v1446_v40  ;;  %v1459_v45 = vrot.slane %v1458_v43, 2 }
 0x18e   : > { %v1449_v46 = vrot.slane %v1448_v44, 1  ;;  %v1460_v47 = vadd.f32 %v1459_v45, %v1458_v43 }
 0x190   : > { %v1461_v48 = vrot.slane %v1460_v47, 1  ;;  %v1450_v49 = vadd.f32 %v1449_v46, %v1448_v44 }
 0x192   : > { %v1462_v50 = vadd.f32 %v1461_v48, %v1460_v47 }
 0x194   : > { %v1464_v51 = vsel %vm1463_vm4, %v1450_v49, %v1462_v50 }
 0x195   : > { %1465 = vst [vmem:[%s213_s13] sm:$0x3] %v1464_v51 }
 0x196 PF: > { %s15_s15 = sadd.s32 1, %s2195_s15  }
 0x197   : > { %p12_p5 = scmp.ge.s32.totalorder %s15_s15, 4  }
 0x199   :  { %14 = sbr.rel (!%p12_p5) target bundleno = 1 (0x1), region = 85 }

// kernel: encoder_v1.10
= control target key start
LH: loop header
LB: loop body
LE: loop exit
PB: predicated region body
PF: predicated region fallthrough
CT: control target
= control target key end

     0   :  { %s1976_s15 = smov 0   ;;  %s2324_s0 = inlined_call_operand.vmem [shape: bf16[8,9,128], index: 0, kind: input, shape index: {}]   ;;  %s2325_s1 = inlined_call_operand.vmem [shape: bf16[9,128,128], index: 1, kind: input, shape index: {}]   ;;  %s2326_s2 = inlined_call_operand.vmem [shape: f32[5,1], index: 2, kind: input, shape index: {}]   ;;  %s2327_s3 = inlined_call_operand.vmem [shape: f32[2,5,128], index: 3, kind: output, shape index: {0}]   ;;  %s2328_s4 = inlined_call_operand.vmem [shape: f32[2,2,128], index: 4, kind: output, shape index: {1}]  }
   0x1 LB: > { %s1982_s16 = sadd.s32 4294967295, %s1946_s15   ;;  %p1343_p0 = scmp.ge.s32.totalorder %s1946_s15, 1  ;;  %s1946_s15 = sphi %s1976_s15, %s15_s15  }
   0x2   : > { %p167_p1 = scmp.lt.s32.totalorder %s1946_s15, 3 }
   0x4   : > { %p168_p2 = pnand %p1343_p0, %p167_p1 }
   0x5   : > { %v1863_v0 = vld [vmem:[%s2325_s1 + $0x40] sm:$0xff] (!%p168_p2)   ;;  %v1948_v1 = vmov (!%p168_p2), 0.0   ;;  %v1865_v3 = vld [vmem:[%s2325_s1 + $0x48] sm:$0xff] (!%p168_p2)   ;;  %vm1949_vm0 = vmmov (!%p168_p2), 0   ;;  %v1867_v5 = vld [vmem:[%s2325_s1 + $0x50] sm:$0xff] (!%p168_p2)   ;;  %s1344_s7 = sshll.u32 (!%p168_p2), %s1982_s16, 2 }
   0x6   : > { %171 = sbr.rel (%p168_p2) target bundleno = 400 (0x190), region = 32  ;;  %1642 = vmatprep.subr.bf16.mxu1 (!%p168_p2), %v1948_v1  ;;  %1722 = vmatprep.subr.bf16.mxu0 (!%p168_p2), %v1948_v1  ;;  %v1864_v2 = vld [vmem:[%s2325_s1 + $0x100] sm:$0xff] (!%p168_p2)   ;;  %v1866_v4 = vld [vmem:[%s2325_s1 + $0x108] sm:$0xff] (!%p168_p2)   ;;  %v1868_v6 = vld [vmem:[%s2325_s1 + $0x110] sm:$0xff] (!%p168_p2)   ;;  %p198_p3 = scmp.lt.s32.totalorder (!%p168_p2), %s1344_s7, 7  ;;  %v1950_v25 = vmov (!%p168_p2), 0  }
   0x7   : > { %1643 = vmatpush3.bf16.msra.mxu1 (!%p168_p2), %v1863_v0  ;;  %1658 = vmatprep.mubr.msk.bf16.mxu1 (!%p168_p2), %vm1949_vm0, %v1948_v1  ;;  %v1869_v7 = vld [vmem:[%s2325_s1 + $0x58] sm:$0xff] (!%p168_p2)   ;;  %v1871_v9 = vld [vmem:[%s2325_s1 + $0x60] sm:$0xff] (!%p168_p2)   ;;  %v1873_v11 = vld [vmem:[%s2325_s1 + $0x68] sm:$0xff] (!%p168_p2)   ;;  %p204_p4 = scmp.lt.s32.totalorder (!%p168_p2), %s1982_s16, 1  ;;  %vm1236_vm1 = vcmask (!%p168_p2), 1044480   ;;  %vm1252_vm2 = vcmask (!%p168_p2), 1040384  }
   0x8   : > { %1723 = vmatpush3.bf16.msra.mxu0 (!%p168_p2), %v1864_v2  ;;  %1644 = vmatprep.subr.bf16.mxu1 (!%p168_p2), %v1948_v1  ;;  %v1870_v8 = vld [vmem:[%s2325_s1 + $0x118] sm:$0xff] (!%p168_p2)   ;;  %v1872_v10 = vld [vmem:[%s2325_s1 + $0x120] sm:$0xff] (!%p168_p2)   ;;  %v1874_v12 = vld [vmem:[%s2325_s1 + $0x128] sm:$0xff] (!%p168_p2)  }
   0x9   : > { %1724 = vmatprep.subr.bf16.mxu0 (!%p168_p2), %v1948_v1  ;;  %1738 = vmatprep.mubr.msk.bf16.mxu0 (!%p168_p2), %vm1949_vm0, %v1948_v1  ;;  %v1875_v13 = vld [vmem:[%s2325_s1 + $0x70] sm:$0xff] (!%p168_p2)   ;;  %v1877_v15 = vld [vmem:[%s2325_s1 + $0x78] sm:$0xff] (!%p168_p2)   ;;  %v1879_v18 = vld [vmem:[%s2325_s1] sm:$0xff] (!%p168_p2)  }
   0xa   : > { %v1876_v14 = vld [vmem:[%s2325_s1 + $0x130] sm:$0xff] (!%p168_p2)   ;;  %v1878_v16 = vld [vmem:[%s2325_s1 + $0x138] sm:$0xff] (!%p168_p2)   ;;  %v1880_v20 = vld [vmem:[%s2325_s1 + $0x140] sm:$0xff] (!%p168_p2)   ;;  %1862 = vset.pattern.permute.xlu0 (!%p168_p2), %v1950_v25 }
   0xb   : > { %1645 = vmatpush3.bf16.msra.mxu1 (!%p168_p2), %v1865_v3  ;;  %v1881_v21 = vld [vmem:[%s2325_s1 + $0x8] sm:$0xff] (!%p168_p2)   ;;  %v1883_v23 = vld [vmem:[%s2325_s1 + $0x10] sm:$0xff] (!%p168_p2)   ;;  %v1885_v26 = vld [vmem:[%s2325_s1 + $0x18] sm:$0xff] (!%p168_p2)  }
   0xc   : > { %1725 = vmatpush3.bf16.msra.mxu0 (!%p168_p2), %v1866_v4  ;;  %1646 = vmatprep.subr.bf16.mxu1 (!%p168_p2), %v1948_v1  ;;  %v1882_v22 = vld [vmem:[%s2325_s1 + $0x148] sm:$0xff] (!%p168_p2)   ;;  %v1884_v24 = vld [vmem:[%s2325_s1 + $0x150] sm:$0xff] (!%p168_p2)   ;;  %v1886_v27 = vld [vmem:[%s2325_s1 + $0x158] sm:$0xff] (!%p168_p2)  }
   0xd   : > { %1726 = vmatprep.subr.bf16.mxu0 %v1948_v1  ;;  %s2330_s7 = smov (!%p198_p3, %s1344_s7), 7  ;;  %v1887_v28 = vld [vmem:[%s2325_s1 + $0x20] sm:$0xff]   ;;  %v1889_v32 = vld [vmem:[%s2325_s1 + $0x28] sm:$0xff]   ;;  %v1891_v34 = vld [vmem:[%s2325_s1 + $0x30] sm:$0xff]   ;;  %s2332_s16 = smov (!%p204_p4, %s1982_s16), 1 }
   0xe   : > { %s1560_s20 = sshll.u32 %s2330_s7, 3  ;;  %v1888_v30 = vld [vmem:[%s2325_s1 + $0x160] sm:$0xff]   ;;  %v1890_v33 = vld [vmem:[%s2325_s1 + $0x168] sm:$0xff]   ;;  %v1892_v36 = vld [vmem:[%s2325_s1 + $0x170] sm:$0xff]   ;;  %s1347_s29 = sshll.u32 %s2332_s16, 3 }
   0xf   : > { %1647 = vmatpush3.bf16.msra.mxu1 %v1867_v5  ;;  %s2050_s25 = scalar_lea.vmem %s2324_s0, %s1560_s20  ;;  %v1893_v37 = vld [vmem:[%s2325_s1 + $0x38] sm:$0xff]   ;;  %v1896_v42 = vld [vmem:[%s2325_s1 + $0x80] sm:$0xff]   ;;  %v1899_v45 = vld [vmem:[%s2325_s1 + $0x88] sm:$0xff]   ;;  %s1348_s6 = sshll.u32 %s2332_s16, 1 }
  0x10   : > { %1727 = vmatpush3.bf16.msra.mxu0 %v1868_v6  ;;  %1648 = vmatprep.subr.bf16.mxu1 %v1948_v1  ;;  %v1349_v17 = vld [vmem:[%s2050_s25 + $0x8] sm:$0x7]  ;;  %v1432_v19 = vld [vmem:[%s2050_s25 + $0x18] sm:$0x7]  ;;  %v2102_v29 = vld [vmem:[%s2050_s25 + $0x10] sm:$0x7]  ;;  %s211_s9 = scalar_lea.vmem %s2328_s4, %s1348_s6 }
  0x11   : > { %1728 = vmatprep.subr.bf16.mxu0 %v1948_v1  ;;  %v1473_v31 = vcombine.low %v2102_v29, %v2102_v29  ;;  %v1894_v40 = vld [vmem:[%s2325_s1 + $0x178] sm:$0xff]   ;;  %v213_v41 = vld [vmem:[%s2050_s25] sm:$0x7]  ;;  %v1900_v46 = vld [vmem:[%s2325_s1 + $0x188] sm:$0xff]  }
  0x12   : > { %v1898_v44 = vld [vmem:[%s2325_s1 + $0x180] sm:$0xff]   ;;  %v1901_v47 = vld [vmem:[%s2325_s1 + $0x90] sm:$0xff]   ;;  %v1903_v49 = vld [vmem:[%s2325_s1 + $0x98] sm:$0xff]   ;;  %v1398_v54 = vcombine.low %v213_v41, %v213_v41 }
  0x13   : > { %1649 = vmatpush3.bf16.msra.mxu1 %v1869_v7  ;;  %v781_v35 = vshll.u32 %v1473_v31, 16  ;;  %v779_v38 = vshrl.u32 %v1473_v31, 16  ;;  %v1902_v48 = vld [vmem:[%s2325_s1 + $0x190] sm:$0xff]   ;;  %v1904_v50 = vld [vmem:[%s2325_s1 + $0x198] sm:$0xff]   ;;  %v1229_v51 = vld [vmem:[%s2326_s2] sm:$0x1f] }
  0x14   : > { %1729 = vmatpush3.bf16.msra.mxu0 %v1870_v8  ;;  %1650 = vmatprep.subr.bf16.mxu1 %v1948_v1  ;;  %v1905_v52 = vld [vmem:[%s2325_s1 + $0xa0] sm:$0xff]   ;;  %v1907_v55 = vld [vmem:[%s2325_s1 + $0xa8] sm:$0xff]   ;;  %v448_v58 = vshll.u32 %v1398_v54, 16  ;;  %v1909_v59 = vld [vmem:[%s2325_s1 + $0xb0] sm:$0xff]   ;;  %v446_v63 = vshrl.u32 %v1398_v54, 16 }
  0x15   : > { %1730 = vmatprep.subr.bf16.mxu0 %v1948_v1  ;;  %v783_v39 = vrot.slane %v781_v35, 1  ;;  %1232 = vperm.xlu0 %1862, %v1229_v51   ;;  %v1906_v53 = vld [vmem:[%s2325_s1 + $0x1a0] sm:$0xff]   ;;  %v1908_v57 = vld [vmem:[%s2325_s1 + $0x1a8] sm:$0xff]   ;;  %v1910_v62 = vld [vmem:[%s2325_s1 + $0x1b0] sm:$0xff]  }
  0x16   : > { %v1914_v56 = vld [vmem:[%s2050_s25] ss:$0 sps:$4 sm:$0xee]   ;;  %v450_v0 = vrot.slane %v448_v58, 1  ;;  %v1911_v2 = vld [vmem:[%s2325_s1 + $0xb8] sm:$0xff]   ;;  %v1936_v35 = vld [vmem:[%s2325_s1 + $0x228] sm:$0xff]  }
  0x17   : > { %1651 = vmatpush3.bf16.msra.mxu1 %v1871_v9  ;;  %v784_v43 = vor.u32 %v783_v39, %v779_v38  ;;  %v897_v60 = vshrl.u32 %v1914_v56, 16  ;;  %v900_v61 = vshll.u32 %v1914_v56, 16  ;;  %v1912_v5 = vld [vmem:[%s2325_s1 + $0x1b8] sm:$0xff]   ;;  %v1913_v7 = vld [vmem:[%s2325_s1 + $0xc0] sm:$0xff]  }
  0x18   : > { %1731 = vmatpush3.bf16.msra.mxu0 %v1872_v10  ;;  %1652 = vmatprep.subr.bf16.mxu1 %v1948_v1  ;;  %v451_v6 = vor.u32 %v450_v0, %v446_v63  ;;  %v1915_v9 = vld [vmem:[%s2325_s1 + $0x1c0] sm:$0xff]   ;;  %v1916_v10 = vld [vmem:[%s2325_s1 + $0xc8] sm:$0xff]   ;;  %v1928_v25 = vld [vmem:[%s2325_s1 + $0xf8] sm:$0xff]  }
  0x19   : > { %1732 = vmatprep.subr.bf16.mxu0 %v1948_v1  ;;  %v899_v3 = vrot.slane %v897_v60, 1  ;;  %v902_v4 = vrot.slane %v900_v61, 2  ;;  %v1931_v31 = vld [vmem:[%s2325_s1 + $0x200] sm:$0xff]   ;;  %v1938_v38 = vld [vmem:[%s2325_s1 + $0x238] sm:$0xff]  }
  0x1b   : > { %1653 = vmatpush3.bf16.msra.mxu1 %v1873_v11  ;;  %v903_v8 = vor.u32 %v902_v4, %v899_v3  ;;  %v1917_v11 = vld [vmem:[%s2325_s1 + $0x1c8] sm:$0xff]  }
  0x1c   : > { %1733 = vmatpush3.bf16.msra.mxu0 %v1874_v12  ;;  %1654 = vmatprep.subr.bf16.mxu1 %v1948_v1  ;;  %v1918_v12 = vld [vmem:[%s2325_s1 + $0xd0] sm:$0xff]  }
  0x1d   : > { %1734 = vmatprep.subr.bf16.mxu0 %v1948_v1 }
  0x1f   : > { %1655 = vmatpush3.bf16.msra.mxu1 %v1875_v13  ;;  %v1919_v13 = vld [vmem:[%s2325_s1 + $0x1d0] sm:$0xff]  }
  0x20   : > { %1735 = vmatpush3.bf16.msra.mxu0 %v1876_v14  ;;  %1656 = vmatprep.subr.bf16.mxu1 %v1948_v1  ;;  %v1920_v14 = vld [vmem:[%s2325_s1 + $0xd8] sm:$0xff]  }
  0x21   : > { %1736 = vmatprep.subr.bf16.mxu0 %v1948_v1 }
  0x23   : > { %1657 = vmatpush3.bf16.msra.mxu1 %v1877_v15  ;;  %v1921_v15 = vld [vmem:[%s2325_s1 + $0x1d8] sm:$0xff]  }
  0x24   : > { %1737 = vmatpush3.bf16.msra.mxu0 %v1878_v16  ;;  %1662 = vmatprep.subr.bf16.mxu1 %v1948_v1  ;;  %v1922_v16 = vld [vmem:[%s2325_s1 + $0xe0] sm:$0xff]  }
  0x25   : > { %1742 = vmatprep.subr.bf16.mxu0 %v1948_v1 }
  0x26   : > { %1659 = vmatmul.mubr.bf16.vlgmr.msra.gmra.mrb[0].mxu1 %v1349_v17  ;;  %v1923_v17 = vld [vmem:[%s2325_s1 + $0x1e0] sm:$0xff]  }
  0x27   : > { %1663 = vmatpush3.bf16.msra.mxu1 %v1879_v18  ;;  %1739 = vmatmul.mubr.bf16.vlgmr.msra.gmra.mrb[0].mxu0 %v1432_v19  ;;  %v1924_v18 = vld [vmem:[%s2325_s1 + $0xe8] sm:$0xff]  }
  0x28   : > { %1743 = vmatpush3.bf16.msra.mxu0 %v1880_v20  ;;  %1664 = vmatprep.subr.bf16.mxu1 %v1948_v1  ;;  %v1930_v19 = vld [vmem:[%s2050_s25 + $0x8] ss:$0 sps:$4 sm:$0xee]  }
  0x29   : > { %1744 = vmatprep.subr.bf16.mxu0 %v1948_v1  ;;  %1678 = vmatprep.mubr.msk.bf16.mxu1 %vm1949_vm0, %v1948_v1  ;;  %v1925_v20 = vld [vmem:[%s2325_s1 + $0x1e8] sm:$0xff]  }
  0x2a   : > { %1758 = vmatprep.mubr.msk.bf16.mxu0 %vm1949_vm0, %v1948_v1 }
  0x2b   : > { %1665 = vmatpush3.bf16.msra.mxu1 %v1881_v21  ;;  %v1926_v21 = vld [vmem:[%s2325_s1 + $0xf0] sm:$0xff]  }
  0x2c   : > { %1745 = vmatpush3.bf16.msra.mxu0 %v1882_v22  ;;  %1666 = vmatprep.subr.bf16.mxu1 %v1948_v1  ;;  %v1016_v22 = vshrl.u32 %v1930_v19, 16 }
  0x2d   : > { %1746 = vmatprep.subr.bf16.mxu0 %v1948_v1 }
  0x2f   : > { %1667 = vmatpush3.bf16.msra.mxu1 %v1883_v23  ;;  %v1019_v23 = vshll.u32 %v1930_v19, 16 }
  0x30   : > { %1747 = vmatpush3.bf16.msra.mxu0 %v1884_v24  ;;  %1668 = vmatprep.subr.bf16.mxu1 %v1948_v1  ;;  %v1927_v24 = vld [vmem:[%s2325_s1 + $0x1f0] sm:$0xff]  }
  0x31   : > { %1748 = vmatprep.subr.bf16.mxu0 %v1948_v1 }
  0x33   : > { %1669 = vmatpush3.bf16.msra.mxu1 %v1885_v26  ;;  %v1018_v26 = vrot.slane %v1016_v22, 1 }
  0x34   : > { %1749 = vmatpush3.bf16.msra.mxu0 %v1886_v27  ;;  %1670 = vmatprep.subr.bf16.mxu1 %v1948_v1  ;;  %v1021_v27 = vrot.slane %v1019_v23, 2 }
  0x35   : > { %1750 = vmatprep.subr.bf16.mxu0 %v1948_v1 }
  0x37   : > { %1671 = vmatpush3.bf16.msra.mxu1 %v1887_v28  ;;  %v1929_v28 = vld [vmem:[%s2325_s1 + $0x1f8] sm:$0xff]  }
  0x38   : > { %1751 = vmatpush3.bf16.msra.mxu0 %v1888_v30  ;;  %1672 = vmatprep.subr.bf16.mxu1 %v1948_v1  ;;  %v1022_v30 = vor.u32 %v1021_v27, %v1018_v26 }
  0x39   : > { %1752 = vmatprep.subr.bf16.mxu0 %v1948_v1 }
  0x3b   : > { %1673 = vmatpush3.bf16.msra.mxu1 %v1889_v32  ;;  %v1932_v32 = vld [vmem:[%s2325_s1 + $0x208] sm:$0xff]  }
  0x3c   : > { %1753 = vmatpush3.bf16.msra.mxu0 %v1890_v33  ;;  %1674 = vmatprep.subr.bf16.mxu1 %v1948_v1  ;;  %v1933_v33 = vld [vmem:[%s2325_s1 + $0x210] sm:$0xff]  }
  0x3d   : > { %1754 = vmatprep.subr.bf16.mxu0 %v1948_v1 }
  0x3f   : > { %1675 = vmatpush3.bf16.msra.mxu1 %v1891_v34  ;;  %v1935_v34 = vld [vmem:[%s2325_s1 + $0x220] sm:$0xff]  }
  0x40   : > { %1755 = vmatpush3.bf16.msra.mxu0 %v1892_v36  ;;  %1676 = vmatprep.subr.bf16.mxu1 %v1948_v1  ;;  %v1937_v36 = vld [vmem:[%s2325_s1 + $0x230] sm:$0xff]  }
  0x41   : > { %1756 = vmatprep.subr.bf16.mxu0 %v1948_v1 }
  0x43   : > { %1677 = vmatpush3.bf16.msra.mxu1 %v1893_v37  ;;  %v1939_v37 = vld [vmem:[%s2050_s25] sm:$0x1c]   ;;  %s207_s25 = scalar_lea.vmem %s2327_s3, %s1347_s29 }
  0x44   : > { %1757 = vmatpush3.bf16.msra.mxu0 %v1894_v40  ;;  %1682 = vmatprep.subr.bf16.mxu1 %v1948_v1  ;;  %v1137_v39 = vrot.slane %v1939_v37, 2 }
  0x45   : > { %1762 = vmatprep.subr.bf16.mxu0 %v1948_v1 }
  0x46   : > { %1679 = vmatmul.mubr.bf16.vlgmr.msra.gmra.mrb[0].mxu1 %v213_v41 }
  0x47   : > { %1683 = vmatpush3.bf16.msra.mxu1 %v1896_v42  ;;  %1759 = vmatmul.mubr.bf16.vlgmr.msra.gmra.mrb[0].mxu0 %v784_v43 }
  0x48   : > { %1763 = vmatpush3.bf16.msra.mxu0 %v1898_v44  ;;  %1684 = vmatprep.subr.bf16.mxu1 %v1948_v1 }
  0x49   : > { %1764 = vmatprep.subr.bf16.mxu0 %v1948_v1  ;;  %1698 = vmatprep.mubr.msk.bf16.mxu1 %vm1949_vm0, %v1948_v1 }
  0x4a   : > { %1778 = vmatprep.mubr.msk.bf16.mxu0 %vm1949_vm0, %v1948_v1 }
  0x4b   : > { %1685 = vmatpush3.bf16.msra.mxu1 %v1899_v45 }
  0x4c   : > { %1765 = vmatpush3.bf16.msra.mxu0 %v1900_v46  ;;  %1686 = vmatprep.subr.bf16.mxu1 %v1948_v1 }
  0x4d   : > { %1766 = vmatprep.subr.bf16.mxu0 %v1948_v1 }
  0x4f   : > { %1687 = vmatpush3.bf16.msra.mxu1 %v1901_v47 }
  0x50   : > { %1767 = vmatpush3.bf16.msra.mxu0 %v1902_v48  ;;  %1688 = vmatprep.subr.bf16.mxu1 %v1948_v1 }
  0x51   : > { %1768 = vmatprep.subr.bf16.mxu0 %v1948_v1 }
  0x53   : > { %1689 = vmatpush3.bf16.msra.mxu1 %v1903_v49 }
  0x54   : > { %1769 = vmatpush3.bf16.msra.mxu0 %v1904_v50  ;;  %1690 = vmatprep.subr.bf16.mxu1 %v1948_v1 }
  0x55   : > { %1770 = vmatprep.subr.bf16.mxu0 %v1948_v1 }
  0x57   : > { %1691 = vmatpush3.bf16.msra.mxu1 %v1905_v52 }
  0x58   : > { %1771 = vmatpush3.bf16.msra.mxu0 %v1906_v53  ;;  %1692 = vmatprep.subr.bf16.mxu1 %v1948_v1 }
  0x59   : > { %1772 = vmatprep.subr.bf16.mxu0 %v1948_v1 }
  0x5b   : > { %1693 = vmatpush3.bf16.msra.mxu1 %v1907_v55 }
  0x5c   : > { %1773 = vmatpush3.bf16.msra.mxu0 %v1908_v57  ;;  %1694 = vmatprep.subr.bf16.mxu1 %v1948_v1 }
  0x5d   : > { %1774 = vmatprep.subr.bf16.mxu0 %v1948_v1 }
  0x5f   : > { %1695 = vmatpush3.bf16.msra.mxu1 %v1909_v59 }
  0x60   : > { %1775 = vmatpush3.bf16.msra.mxu0 %v1910_v62  ;;  %1696 = vmatprep.subr.bf16.mxu1 %v1948_v1 }
  0x61   : > { %1776 = vmatprep.subr.bf16.mxu0 %v1948_v1 }
  0x63   : > { %1697 = vmatpush3.bf16.msra.mxu1 %v1911_v2 }
  0x64   : > { %1777 = vmatpush3.bf16.msra.mxu0 %v1912_v5  ;;  %1702 = vmatprep.subr.bf16.mxu1 %v1948_v1 }
  0x65   : > { %1782 = vmatprep.subr.bf16.mxu0 %v1948_v1 }
  0x66   : > { %1699 = vmatmul.mubr.bf16.vlgmr.msra.gmra.mrb[0].mxu1 %v451_v6 }
  0x67   : > { %1703 = vmatpush3.bf16.msra.mxu1 %v1913_v7  ;;  %1779 = vmatmul.mubr.bf16.vlgmr.msra.gmra.mrb[0].mxu0 %v903_v8 }
  0x68   : > { %1783 = vmatpush3.bf16.msra.mxu0 %v1915_v9  ;;  %1704 = vmatprep.subr.bf16.mxu1 %v1948_v1 }
  0x69   : > { %1784 = vmatprep.subr.bf16.mxu0 %v1948_v1  ;;  %1718 = vmatprep.mubr.msk.bf16.mxu1 %vm1949_vm0, %v1948_v1 }
  0x6a   : > { %1798 = vmatprep.mubr.msk.bf16.mxu0 %vm1949_vm0, %v1948_v1 }
  0x6b   : > { %1705 = vmatpush3.bf16.msra.mxu1 %v1916_v10 }
  0x6c   : > { %1785 = vmatpush3.bf16.msra.mxu0 %v1917_v11  ;;  %1706 = vmatprep.subr.bf16.mxu1 %v1948_v1 }
  0x6d   : > { %1786 = vmatprep.subr.bf16.mxu0 %v1948_v1 }
  0x6f   : > { %1707 = vmatpush3.bf16.msra.mxu1 %v1918_v12 }
  0x70   : > { %1787 = vmatpush3.bf16.msra.mxu0 %v1919_v13  ;;  %1708 = vmatprep.subr.bf16.mxu1 %v1948_v1 }
  0x71   : > { %1788 = vmatprep.subr.bf16.mxu0 %v1948_v1 }
  0x73   : > { %1709 = vmatpush3.bf16.msra.mxu1 %v1920_v14 }
  0x74   : > { %1789 = vmatpush3.bf16.msra.mxu0 %v1921_v15  ;;  %1710 = vmatprep.subr.bf16.mxu1 %v1948_v1 }
  0x75   : > { %1790 = vmatprep.subr.bf16.mxu0 %v1948_v1 }
  0x77   : > { %1711 = vmatpush3.bf16.msra.mxu1 %v1922_v16 }
  0x78   : > { %1791 = vmatpush3.bf16.msra.mxu0 %v1923_v17  ;;  %1712 = vmatprep.subr.bf16.mxu1 %v1948_v1 }
  0x79   : > { %1792 = vmatprep.subr.bf16.mxu0 %v1948_v1 }
  0x7b   : > { %1713 = vmatpush3.bf16.msra.mxu1 %v1924_v18 }
  0x7c   : > { %1793 = vmatpush3.bf16.msra.mxu0 %v1925_v20  ;;  %1714 = vmatprep.subr.bf16.mxu1 %v1948_v1 }
  0x7d   : > { %1794 = vmatprep.subr.bf16.mxu0 %v1948_v1 }
  0x7f   : > { %1715 = vmatpush3.bf16.msra.mxu1 %v1926_v21 }
  0x80   : > { %1795 = vmatpush3.bf16.msra.mxu0 %v1927_v24  ;;  %1716 = vmatprep.subr.bf16.mxu1 %v1948_v1 }
  0x81   : > { %1796 = vmatprep.subr.bf16.mxu0 %v1948_v1 }
  0x83   : > { %1717 = vmatpush3.bf16.msra.mxu1 %v1928_v25 }
  0x84   : > { %1797 = vmatpush3.bf16.msra.mxu0 %v1929_v28 }
  0x85   : > { %1802 = vmatprep.subr.bf16.mxu0 %v1948_v1 }
  0x86   : > { %1719 = vmatmul.mubr.bf16.vlgmr.msra.gmra.mrb[0].mxu1 %v2102_v29  ;;  %v1934_v29 = vld [vmem:[%s2325_s1 + $0x218] sm:$0xff]  }
  0x87   : > { %1799 = vmatmul.mubr.bf16.vlgmr.msra.gmra.mrb[0].mxu0 %v1022_v30 }
  0x88   : > { %1803 = vmatpush3.bf16.msra.mxu0 %v1931_v31  ;;  %1818 = vmatprep.mubr.msk.bf16.mxu0 %vm1949_vm0, %v1948_v1 }
  0x89   : > { %1804 = vmatprep.subr.bf16.mxu0 %v1948_v1 }
  0x8c   : > { %1805 = vmatpush3.bf16.msra.mxu0 %v1932_v32 }
  0x8d   : > { %1806 = vmatprep.subr.bf16.mxu0 %v1948_v1 }
  0x90   : > { %1807 = vmatpush3.bf16.msra.mxu0 %v1933_v33 }
  0x91   : > { %1808 = vmatprep.subr.bf16.mxu0 %v1948_v1 }
  0x94   : > { %1809 = vmatpush3.bf16.msra.mxu0 %v1934_v29  ;;  %v1233_v45 = vpop.permute.xlu0 %1232 }
  0x95   : > { %1810 = vmatprep.subr.bf16.mxu0 %v1948_v1 }
  0x98   : > { %1811 = vmatpush3.bf16.msra.mxu0 %v1935_v34 }
  0x99   : > { %1812 = vmatprep.subr.bf16.mxu0 %v1948_v1 }
  0x9c   : > { %1813 = vmatpush3.bf16.msra.mxu0 %v1936_v35 }
  0x9d   : > { %1814 = vmatprep.subr.bf16.mxu0 %v1948_v1 }
  0xa0   : > { %1815 = vmatpush3.bf16.msra.mxu0 %v1937_v36 }
  0xa1   : > { %1816 = vmatprep.subr.bf16.mxu0 %v1948_v1 }
  0xa4   : > { %1817 = vmatpush3.bf16.msra.mxu0 %v1938_v38 }
  0xa7   : > { %1819 = vmatmul.mubr.bf16.vlgmr.msra.gmra.mrb[0].mxu0 %v1137_v39 }
 0x159   : > { %v643_v40 = vpop.f32.mrb[0].mxu1 }
 0x15a   : > { %v1720_v41 = vpop.f32.mrb[1].mxu1 }
 0x15b   : > { %v646_v42 = vpop.f32.mrb[2].mxu1 }
 0x15c   : > { %v1721_v43 = vpop.f32.mrb[3].mxu1 }
 0x17a   : > { %v1221_v44 = vpop.f32.mrb[0].mxu0 }
 0x17b   : > { %v1822_v46 = vadd.f32 %v1221_v44, %v643_v40  ;;  %v1820_v47 = vpop.f32.mrb[1].mxu0 }
 0x17c   : > { %v1224_v1 = vpop.f32.mrb[2].mxu0 }
 0x17d   : > { %1228 = vst [vmem:[%s207_s25] sm:$0x1f] %v1822_v46  ;;  %v1235_v48 = vmul.f32 %v1822_v46, %v1233_v45  ;;  %v1821_v49 = vpop.f32.mrb[3].mxu0 }
 0x17f   : > { %v1237_v50 = vsel %vm1236_vm1, %v1235_v48, 0.0  ;;  %v1244_v51 = vmul.f32 %v1822_v46, %v1235_v48 }
 0x180   : > { %v1238_v52 = vrot.slane %v1237_v50, 4 }
 0x181   : > { %v1245_v53 = vsel %vm1236_vm1, %v1244_v51, 0.0 }
 0x182   : > { %v1239_v54 = vadd.f32 %v1238_v52, %v1237_v50  ;;  %v1246_v55 = vrot.slane %v1245_v53, 4 }
 0x184   : > { %v1240_v56 = vrot.slane %v1239_v54, 2  ;;  %v1247_v57 = vadd.f32 %v1246_v55, %v1245_v53 }
 0x186   : > { %v1241_v58 = vadd.f32 %v1240_v56, %v1239_v54  ;;  %v1248_v59 = vrot.slane %v1247_v57, 2 }
 0x188   : > { %v1242_v60 = vrot.slane %v1241_v58, 1  ;;  %v1249_v61 = vadd.f32 %v1248_v59, %v1247_v57 }
 0x18a   : > { %v1250_v62 = vrot.slane %v1249_v61, 1  ;;  %v1243_v63 = vadd.f32 %v1242_v60, %v1241_v58 }
 0x18c   : > { %v1251_v0 = vadd.f32 %v1250_v62, %v1249_v61 }
 0x18e   : > { %v1253_v2 = vsel %vm1252_vm2, %v1243_v63, %v1251_v0 }
 0x18f   : > { %1254 = vst [vmem:[%s211_s9] sm:$0x3] %v1253_v2 }
 0x190 PF: > { %s15_s15 = sadd.s32 1, %s1946_s15  }
 0x191   : > { %p12_p5 = scmp.ge.s32.totalorder %s15_s15, 4  }
 0x193   :  { %14 = sbr.rel (!%p12_p5) target bundleno = 1 (0x1), region = 85 }

</bundles_post_ra>
